<compile_context>
chip_gen: v7x
topology: tpu7x:2x2x1
jax: 0.10.0
libtpu: 0.0.40
codegen_flags: <defaults>
</compile_context>

<pallas_src>
import math
import functools

import jax
import jax.numpy as jnp
from jax.experimental import pallas as pl
from jax.experimental.pallas import tpu as pltpu

LN_EPS = 1e-5


def _relation_kernel(main_ref, ref_ref, wq_ref, wk_ref, wv_ref,
                     bq_ref, bk_ref, bv_ref, wo_ref, bo_ref,
                     gamma_ref, beta_ref,
                     refined_ref, sims_ref,
                     k_s, v_s, ctx_s,
                     *, num_heads, valid_s):
    f32 = jnp.float32
    bf16 = jnp.bfloat16

    x = main_ref[0]                                   # (tL, E) f32 query + residual source
    tL, E = x.shape
    Sp = ref_ref.shape[1]
    D = E // num_heads

    # ---- K/V projections, hoisted out of the L-tile loop: recomputed only on the first
    #      L tile of each batch element (scratches persist across grid iterations).
    @pl.when(pl.program_id(1) == 0)
    def _():
        r = ref_ref[0]                                              # (Sp, E) bf16
        k_s[...] = (jnp.dot(r, wk_ref[...], preferred_element_type=f32)
                    + bk_ref[...]).astype(bf16)
        v_s[...] = (jnp.dot(r, wv_ref[...], preferred_element_type=f32)
                    + bv_ref[...]).astype(bf16)

    # ---- Q projection (1/sqrt(D) already folded into wq/bq at pre-pack time).
    q = (jnp.dot(x.astype(bf16), wq_ref[...], preferred_element_type=f32)
         + bq_ref[...]).astype(bf16)                                # (tL, E) bf16

    k = k_s[...]                                                    # (Sp, E) bf16
    v = v_s[...]                                                    # (Sp, E) bf16

    # Additive key-padding mask for the padded S columns (static; hoisted so the broadcast
    # is materialized once, not once per head).
    if valid_s < Sp:
        col = jax.lax.broadcasted_iota(jnp.int32, (tL, Sp), 1)
        neg = jnp.where(col < valid_s, 0.0, -1e30).astype(f32)
    else:
        neg = None

    # ---- Per-head attention.  Contexts are assembled into the (tL, E) ctx scratch so the
    #      output projection is a single K=E matmul after the loop.
    # NOTE: a static Python loop is fine for small num_heads; for very large H switch to
    # lax.fori_loop(..., unroll=2) once per-head slices are lane-aligned (D >= 128).
    qk_dims = (((1,), (1,)), ((), ()))        # contract last dims: (tL,D) x (Sp,D) -> (tL,Sp)
    aff_sum = jnp.zeros((tL, Sp), dtype=f32)
    for h in range(num_heads):
        sl = slice(h * D, (h + 1) * D)
        s = jax.lax.dot_general(q[:, sl], k[:, sl], qk_dims,
                                preferred_element_type=f32)         # (tL, Sp)
        if neg is not None:
            s = s + neg
        s = s - jnp.max(s, axis=-1, keepdims=True)
        p = jnp.exp(s)
        p = p * pl.reciprocal(jnp.sum(p, axis=-1, keepdims=True), approx=True)
        aff_sum = aff_sum + p
        ctx_s[:, sl] = jnp.dot(p.astype(bf16), v[:, sl],
                               preferred_element_type=f32)          # (tL, D) f32

    # ---- Single output projection over all heads (K = E, bf16 operands, f32 acc).
    attn = (jnp.dot(ctx_s[...].astype(bf16), wo_ref[...],
                    preferred_element_type=f32) + bo_ref[...])      # (tL, E) f32

    # ---- sims = log(mean_h(p) * S): 1/num_heads and log(S) folded into one log.
    sims_ref[0] = jnp.log(aff_sum * (float(valid_s) / num_heads))

    # ---- Residual + LayerNorm in f32 (dropout is identity in eval mode).
    y = x + attn
    mu = jnp.mean(y, axis=-1, keepdims=True)
    yc = y - mu
    var = jnp.mean(yc * yc, axis=-1, keepdims=True)
    refined_ref[0] = (yc * jax.lax.rsqrt(var + LN_EPS)) * gamma_ref[...] + beta_ref[...]


# ----------------------------------------------------------------------------- wrapper --

def _round_up(x, m):
    return (x + m - 1) // m * m


def _physical_vmem_bytes():
    """Per-core VMEM capacity; conservative 64 MiB (v7x) fallback."""
    try:
        info = pltpu.get_tpu_info()
        v = getattr(info, "vmem_capacity_bytes", None)
        if v:
            return int(v)
    except Exception:
        pass
    return 64 * 1024 * 1024


def _fixed_vmem_bytes(E, Sp):
    weights = 4 * E * E * 2              # Wq/Wk/Wv/Wo^T in bf16
    biases = 6 * E * 4                   # bq/bk/bv/bo/gamma/beta in f32
    ref_block = Sp * E * 2               # bf16 ref_feats tile
    kv_scratch = 2 * Sp * E * 2          # persistent bf16 K/V scratches
    return 2 * (weights + biases + ref_block) + kv_scratch   # x2: default double buffering


def _tile_vmem_bytes(tL, E, Sp):
    # main-in + refined/sims-out blocks (double-buffered), ctx scratch and the dominant
    # in-kernel f32 temporaries (q/attn/y and s/p/aff_sum).
    io = 2 * (tL * E * 4) + 2 * (tL * E * 4) + 2 * (tL * Sp * 4)
    ctx = tL * E * 4
    temps = 3 * tL * E * 4 + 3 * tL * Sp * 4
    return io + ctx + temps


def _pick_l_tile(Lp, E, Sp, budget_bytes):
    """Largest lane/sublane-friendly L tile whose working set fits the per-chip budget."""
    candidates = [t for t in (1024, 512, 256, 128) if Lp % t == 0]
    for t in candidates:
        if _tile_vmem_bytes(t, E, Sp) <= budget_bytes:
            return t
    if candidates:
        return candidates[-1]
    return Lp          # Lp < 128 (already padded to a multiple of 8)


def vanilla_relation(main_feats, ref_feats, params, num_heads):
    B, L, E = main_feats.shape
    _, S, _ = ref_feats.shape
    assert E % num_heads == 0, "embed_dim must be divisible by num_heads"
    D = E // num_heads
    scale = 1.0 / math.sqrt(D)
    f32, bf16 = jnp.float32, jnp.bfloat16

    # ---- pad L to a sublane (8) multiple and S to a lane (128) multiple so output stores
    #      are dense; padded key columns are masked with -1e30 before the softmax.
    Lp = _round_up(L, 8)
    Sp = _round_up(S, 128)
    main_p = jnp.pad(main_feats.astype(f32), ((0, 0), (0, Lp - L), (0, 0)))
    ref_p = jnp.pad(ref_feats, ((0, 0), (0, Sp - S), (0, 0))).astype(bf16)
    # TODO(synk): also pad E to a multiple of 128 (needs masked LayerNorm statistics) so
    # the refined-output stores are lane-dense when embed_dim is not 128-aligned.

    # ---- pre-pack weights (K-major, bf16 matmul operands, f32 biases); fold 1/sqrt(D)
    #      into the Q projection.
    w = params["in_proj_weight"]                      # (3E, E) = [Wq; Wk; Wv]
    b = params["in_proj_bias"]                        # (3E,)
    wq_t = (w[:E].T * scale).astype(bf16)
    wk_t = w[E:2 * E].T.astype(bf16)
    wv_t = w[2 * E:].T.astype(bf16)
    bq = (b[:E] * scale).reshape(1, E).astype(f32)
    bk = b[E:2 * E].reshape(1, E).astype(f32)
    bv = b[2 * E:].reshape(1, E).astype(f32)
    wo_t = params["out_proj_weight"].T.astype(bf16)   # (E, E), kept whole (K=E projection)
    bo = params["out_proj_bias"].reshape(1, E).astype(f32)
    gamma = params["ln_weight"].reshape(1, E).astype(f32)
    beta = params["ln_bias"].reshape(1, E).astype(f32)

    # ---- generation-aware VMEM budget, tile choice and explicit scoped-VMEM limit.
    phys_vmem = _physical_vmem_bytes()
    fixed = _fixed_vmem_bytes(E, Sp)
    tL = _pick_l_tile(Lp, E, Sp, int(0.80 * phys_vmem) - fixed)
    vmem_est = fixed + _tile_vmem_bytes(tL, E, Sp)
    vmem_limit = int(min(0.85 * phys_vmem,
                         max(32 * 1024 * 1024, vmem_est + (16 << 20))))

    # NOTE(v7x occupancy): only the B axis is megacore-parallel (the L axis carries the
    # K/V-scratch dependency), so B >= num_cores is needed to feed both TensorCores.
    grid = (B, Lp // tL)
    kernel = functools.partial(_relation_kernel, num_heads=num_heads, valid_s=S)

    def _call(single_buffer_consts):
        def const_spec(shape):
            idx = lambda bi, li: (0,) * len(shape)          # noqa: E731
            if single_buffer_consts:
                # Grid-invariant operands: no point double-buffering them (halves their
                # VMEM footprint, which matters most on v7x's 64 MiB VMEM).
                return pl.BlockSpec(shape, idx, pipeline_mode=pl.Buffered(1))
            return pl.BlockSpec(shape, idx)

        grid_spec = pltpu.PrefetchScalarGridSpec(
            num_scalar_prefetch=0,
            grid=grid,
            in_specs=[
                pl.BlockSpec((1, tL, E), lambda bi, li: (bi, li, 0)),   # main_feats tile
                pl.BlockSpec((1, Sp, E), lambda bi, li: (bi, 0, 0)),    # ref_feats (full S)
                const_spec((E, E)),        # Wq^T (scaled)
                const_spec((E, E)),        # Wk^T
                const_spec((E, E)),        # Wv^T
                const_spec((1, E)),        # bq (scaled)
                const_spec((1, E)),        # bk
                const_spec((1, E)),        # bv
                const_spec((E, E)),        # Wo^T
                const_spec((1, E)),        # bo
                const_spec((1, E)),        # LN gamma
                const_spec((1, E)),        # LN beta
            ],
            out_specs=(
                pl.BlockSpec((1, tL, E), lambda bi, li: (bi, li, 0)),   # refined_feats
                pl.BlockSpec((1, tL, Sp), lambda bi, li: (bi, li, 0)),  # sims (lane-dense)
            ),
            scratch_shapes=[
                pltpu.VMEM((Sp, E), bf16),      # K, persistent across L tiles of a batch
                pltpu.VMEM((Sp, E), bf16),      # V
                pltpu.VMEM((tL, E), f32),       # per-head context assembly
            ],
        )
        return pl.pallas_call(
            kernel,
            out_shape=(jax.ShapeDtypeStruct((B, Lp, E), f32),
                       jax.ShapeDtypeStruct((B, Lp, Sp), f32)),
            grid_spec=grid_spec,
            compiler_params=pltpu.CompilerParams(
                # B is megacore-parallel; L must stay sequential ("arbitrary") because the
                # K/V scratches are filled at li == 0 and reused by later L tiles.
                dimension_semantics=("parallel", "arbitrary"),
                vmem_limit_bytes=vmem_limit),
        )(main_p, ref_p, wq_t, wk_t, wv_t, bq, bk, bv, wo_t, bo, gamma, beta)

    try:
        refined_p, sims_p = _call(True)
    except Exception:
        # pl.Buffered(1) not supported by this Pallas build -> plain double buffering.
        refined_p, sims_p = _call(False)

    refined = refined_p[:, :L, :]
    sims = sims_p[:, :L, :S]
    sim_target = jnp.full((B, L, S), -1.0, dtype=f32)
    return refined, {"sims": sims, "sim_target": sim_target}


# ---------------------------------------------------------------------------- reference --

def reference(main, ref, params, num_heads):
    """Pure-JAX f32 reference for numerical sanity check."""
    B, L, E = main.shape
    S = ref.shape[1]
    D = E // num_heads
    w, b = params["in_proj_weight"], params["in_proj_bias"]
    q = main @ w[:E].T + b[:E]
    k = ref @ w[E:2 * E].T + b[E:2 * E]
    v = ref @ w[2 * E:].T + b[2 * E:]
    q = q.reshape(B, L, num_heads, D).transpose(0, 2, 1, 3)
    k = k.reshape(B, S, num_heads, D).transpose(0, 2, 1, 3)
    v = v.reshape(B, S, num_heads, D).transpose(0, 2, 1, 3)
    s = jnp.einsum("bhld,bhsd->bhls", q, k) / math.sqrt(D)
    p = jax.nn.softmax(s, axis=-1)
    ctx = jnp.einsum("bhls,bhsd->bhld", p, v).transpose(0, 2, 1, 3).reshape(B, L, E)
    attn = ctx @ params["out_proj_weight"].T + params["out_proj_bias"]
    aff = p.mean(axis=1)
    y = main + attn
    mu = y.mean(-1, keepdims=True)
    var = ((y - mu) ** 2).mean(-1, keepdims=True)
    refined = (y - mu) / jnp.sqrt(var + LN_EPS) * params["ln_weight"] + params["ln_bias"]
    sims = jnp.log(aff) + math.log(S)
    return refined, sims


if __name__ == "__main__":
    B, L, S, E, H = 2, 8, 8, 32, 8     # embed_dim=32, num_heads=8 (head_dim=4)

    key = jax.random.PRNGKey(0)
    k_main, k_ref, k_w, k_b, k_wo = jax.random.split(key, 5)

    main_feats = jax.random.normal(k_main, (B, L, E), dtype=jnp.float32)
    ref_feats = jax.random.normal(k_ref, (B, S, E), dtype=jnp.float32)

    # deterministic synthetic parameters (nn.MultiheadAttention + LayerNorm shapes)
    params = {
        "in_proj_weight": jax.random.normal(k_w, (3 * E, E), dtype=jnp.float32) * 0.05,
        "in_proj_bias": jax.random.normal(k_b, (3 * E,), dtype=jnp.float32) * 0.01,
        "out_proj_weight": jax.random.normal(k_wo, (E, E), dtype=jnp.float32) * 0.05,
        "out_proj_bias": jnp.zeros((E,), dtype=jnp.float32),
        "ln_weight": jnp.ones((E,), dtype=jnp.float32),
        "ln_bias": jnp.zeros((E,), dtype=jnp.float32),
    }

    refined, aux = vanilla_relation(main_feats, ref_feats, params, num_heads=H)
    jax.block_until_ready((refined, aux["sims"], aux["sim_target"]))

    ref_refined, ref_sims = reference(main_feats, ref_feats, params, num_heads=H)

    assert refined.shape == (B, L, E)
    assert aux["sims"].shape == (B, L, S)
    # bf16 matmul operands + approx softmax reciprocal -> slightly looser tolerance.
    assert jnp.allclose(refined, ref_refined, atol=1e-2, rtol=1e-2)
    assert jnp.allclose(aux["sims"], ref_sims, atol=1e-2, rtol=1e-2)
    assert aux["sim_target"].shape == (B, L, S)
    assert bool(jnp.all(aux["sim_target"] == -1.0))

    print("KERNEL_OK")
</pallas_src>

<mosaic_0001>
module attributes {stable_mosaic.version = 11 : i64} {
  func.func @_relation_kernel(%arg0: i32, %arg1: i32, %arg2: memref<1x8x32xf32, #tpu.memory_space<vmem>>, %arg3: memref<1x128x32xbf16, #tpu.memory_space<vmem>>, %arg4: memref<32x32xbf16, #tpu.memory_space<vmem>>, %arg5: memref<32x32xbf16, #tpu.memory_space<vmem>>, %arg6: memref<32x32xbf16, #tpu.memory_space<vmem>>, %arg7: memref<1x32xf32, #tpu.memory_space<vmem>>, %arg8: memref<1x32xf32, #tpu.memory_space<vmem>>, %arg9: memref<1x32xf32, #tpu.memory_space<vmem>>, %arg10: memref<32x32xbf16, #tpu.memory_space<vmem>>, %arg11: memref<1x32xf32, #tpu.memory_space<vmem>>, %arg12: memref<1x32xf32, #tpu.memory_space<vmem>>, %arg13: memref<1x32xf32, #tpu.memory_space<vmem>>, %arg14: memref<1x8x32xf32, #tpu.memory_space<vmem>>, %arg15: memref<1x8x128xf32, #tpu.memory_space<vmem>>, %arg16: memref<128x32xbf16, #tpu.memory_space<vmem>>, %arg17: memref<128x32xbf16, #tpu.memory_space<vmem>>, %arg18: memref<8x32xf32, #tpu.memory_space<vmem>>) attributes {dimension_semantics = [#tpu.dimension_semantics<parallel>, #tpu.dimension_semantics<arbitrary>], iteration_bounds = array<i64: 2, 1>, scalar_prefetch = 0 : i64, scratch_operands = 3 : i64, tpu.core_type = #tpu.core_type<tc>, window_params = [{transform_indices = @transform_0, window_bounds = array<i64: 1, 8, 32>}, {transform_indices = @transform_1, window_bounds = array<i64: 1, 128, 32>}, {pipeline_mode = #tpu.pipeline_mode<synchronous>, transform_indices = @transform_2, window_bounds = array<i64: 32, 32>}, {pipeline_mode = #tpu.pipeline_mode<synchronous>, transform_indices = @transform_3, window_bounds = array<i64: 32, 32>}, {pipeline_mode = #tpu.pipeline_mode<synchronous>, transform_indices = @transform_4, window_bounds = array<i64: 32, 32>}, {pipeline_mode = #tpu.pipeline_mode<synchronous>, transform_indices = @transform_5, window_bounds = array<i64: 1, 32>}, {pipeline_mode = #tpu.pipeline_mode<synchronous>, transform_indices = @transform_6, window_bounds = array<i64: 1, 32>}, {pipeline_mode = #tpu.pipeline_mode<synchronous>, transform_indices = @transform_7, window_bounds = array<i64: 1, 32>}, {pipeline_mode = #tpu.pipeline_mode<synchronous>, transform_indices = @transform_8, window_bounds = array<i64: 32, 32>}, {pipeline_mode = #tpu.pipeline_mode<synchronous>, transform_indices = @transform_9, window_bounds = array<i64: 1, 32>}, {pipeline_mode = #tpu.pipeline_mode<synchronous>, transform_indices = @transform_10, window_bounds = array<i64: 1, 32>}, {pipeline_mode = #tpu.pipeline_mode<synchronous>, transform_indices = @transform_11, window_bounds = array<i64: 1, 32>}, {transform_indices = @transform_12, window_bounds = array<i64: 1, 8, 32>}, {transform_indices = @transform_13, window_bounds = array<i64: 1, 8, 128>}]} {
    %c0 = arith.constant 0 : index
    %c0_0 = arith.constant 0 : index
    %c0_1 = arith.constant 0 : index
    %0 = vector.load %arg2[%c0, %c0_0, %c0_1] : memref<1x8x32xf32, #tpu.memory_space<vmem>>, vector<1x8x32xf32>
    %1 = vector.shape_cast %0 : vector<1x8x32xf32> to vector<8x32xf32>
    %c0_i32 = arith.constant 0 : i32
    %2 = arith.cmpi eq, %arg1, %c0_i32 : i32
    %3 = arith.extui %2 : i1 to i32
    %c0_i32_2 = arith.constant 0 : i32
    %4 = arith.cmpi ne, %3, %c0_i32_2 : i32
    scf.if %4 {
      %c0_78 = arith.constant 0 : index
      %c0_79 = arith.constant 0 : index
      %c0_80 = arith.constant 0 : index
      %212 = vector.load %arg3[%c0_78, %c0_79, %c0_80] : memref<1x128x32xbf16, #tpu.memory_space<vmem>>, vector<1x128x32xbf16>
      %213 = vector.shape_cast %212 : vector<1x128x32xbf16> to vector<128x32xbf16>
      %c0_81 = arith.constant 0 : index
      %c0_82 = arith.constant 0 : index
      %214 = vector.load %arg5[%c0_81, %c0_82] : memref<32x32xbf16, #tpu.memory_space<vmem>>, vector<32x32xbf16>
      %cst_83 = arith.constant dense<0.000000e+00> : vector<128x32xf32>
      %215 = tpu.matmul %213, %214, %cst_83 {dimension_numbers = #tpu.dot_dimension_numbers<[1], [0], [0], [1], [0, 0, 1, 1], [], []>} : vector<128x32xbf16>, vector<32x32xbf16>, vector<128x32xf32> -> vector<128x32xf32>
      %c0_84 = arith.constant 0 : index
      %c0_85 = arith.constant 0 : index
      %216 = vector.load %arg8[%c0_84, %c0_85] : memref<1x32xf32, #tpu.memory_space<vmem>>, vector<1x32xf32>
      %217 = vector.broadcast %216 : vector<1x32xf32> to vector<128x32xf32>
      %218 = arith.addf %215, %217 : vector<128x32xf32>
      %219 = arith.truncf %218 : vector<128x32xf32> to vector<128x32xbf16>
      %c0_86 = arith.constant 0 : index
      %c0_87 = arith.constant 0 : index
      %220 = vector.load %arg16[%c0_86, %c0_87] : memref<128x32xbf16, #tpu.memory_space<vmem>>, vector<128x32xbf16>
      tpu.vector_store %arg16[%c0_86, %c0_87], %219 {strides = array<i32>} : memref<128x32xbf16, #tpu.memory_space<vmem>>, vector<128x32xbf16>,
      %c0_88 = arith.constant 0 : index
      %c0_89 = arith.constant 0 : index
      %221 = vector.load %arg6[%c0_88, %c0_89] : memref<32x32xbf16, #tpu.memory_space<vmem>>, vector<32x32xbf16>
      %cst_90 = arith.constant dense<0.000000e+00> : vector<128x32xf32>
      %222 = tpu.matmul %213, %221, %cst_90 {dimension_numbers = #tpu.dot_dimension_numbers<[1], [0], [0], [1], [0, 0, 1, 1], [], []>} : vector<128x32xbf16>, vector<32x32xbf16>, vector<128x32xf32> -> vector<128x32xf32>
      %c0_91 = arith.constant 0 : index
      %c0_92 = arith.constant 0 : index
      %223 = vector.load %arg9[%c0_91, %c0_92] : memref<1x32xf32, #tpu.memory_space<vmem>>, vector<1x32xf32>
      %224 = vector.broadcast %223 : vector<1x32xf32> to vector<128x32xf32>
      %225 = arith.addf %222, %224 : vector<128x32xf32>
      %226 = arith.truncf %225 : vector<128x32xf32> to vector<128x32xbf16>
      %c0_93 = arith.constant 0 : index
      %c0_94 = arith.constant 0 : index
      %227 = vector.load %arg17[%c0_93, %c0_94] : memref<128x32xbf16, #tpu.memory_space<vmem>>, vector<128x32xbf16>
      tpu.vector_store %arg17[%c0_93, %c0_94], %226 {strides = array<i32>} : memref<128x32xbf16, #tpu.memory_space<vmem>>, vector<128x32xbf16>,
    } else {
    }
    %5 = arith.truncf %1 : vector<8x32xf32> to vector<8x32xbf16>
    %c0_3 = arith.constant 0 : index
    %c0_4 = arith.constant 0 : index
    %6 = vector.load %arg4[%c0_3, %c0_4] : memref<32x32xbf16, #tpu.memory_space<vmem>>, vector<32x32xbf16>
    %cst = arith.constant dense<0.000000e+00> : vector<8x32xf32>
    %7 = tpu.matmul %5, %6, %cst {dimension_numbers = #tpu.dot_dimension_numbers<[1], [0], [0], [1], [0, 0, 1, 1], [], []>} : vector<8x32xbf16>, vector<32x32xbf16>, vector<8x32xf32> -> vector<8x32xf32>
    %c0_5 = arith.constant 0 : index
    %c0_6 = arith.constant 0 : index
    %8 = vector.load %arg7[%c0_5, %c0_6] : memref<1x32xf32, #tpu.memory_space<vmem>>, vector<1x32xf32>
    %9 = vector.broadcast %8 : vector<1x32xf32> to vector<8x32xf32>
    %10 = arith.addf %7, %9 : vector<8x32xf32>
    %11 = arith.truncf %10 : vector<8x32xf32> to vector<8x32xbf16>
    %c0_7 = arith.constant 0 : index
    %c0_8 = arith.constant 0 : index
    %12 = vector.load %arg16[%c0_7, %c0_8] : memref<128x32xbf16, #tpu.memory_space<vmem>>, vector<128x32xbf16>
    %c0_9 = arith.constant 0 : index
    %c0_10 = arith.constant 0 : index
    %13 = vector.load %arg17[%c0_9, %c0_10] : memref<128x32xbf16, #tpu.memory_space<vmem>>, vector<128x32xbf16>
    %14 = tpu.iota {dimensions = array<i32: 1>} : vector<8x128xi32>
    %c8_i32 = arith.constant 8 : i32
    %15 = vector.broadcast %c8_i32 : i32 to vector<8x128xi32>
    %16 = arith.cmpi slt, %14, %15 : vector<8x128xi32>
    %cst_11 = arith.constant 0.000000e+00 : f32
    %cst_12 = arith.constant -1.000000e+30 : f32
    %17 = vector.broadcast %cst_11 : f32 to vector<8x128xf32>
    %18 = vector.broadcast %cst_12 : f32 to vector<8x128xf32>
    %19 = arith.select %16, %17, %18 : vector<8x128xi1>, vector<8x128xf32>
    %cst_13 = arith.constant 0.000000e+00 : f32
    %20 = vector.broadcast %cst_13 : f32 to vector<8x128xf32>
    %21 = vector.extract_strided_slice %11 {offsets = [0, 0], sizes = [8, 4], strides = [1, 1]} : vector<8x32xbf16> to vector<8x4xbf16>
    %22 = vector.extract_strided_slice %12 {offsets = [0, 0], sizes = [128, 4], strides = [1, 1]} : vector<128x32xbf16> to vector<128x4xbf16>
    %cst_14 = arith.constant dense<0.000000e+00> : vector<8x128xf32>
    %23 = tpu.matmul %21, %22, %cst_14 {dimension_numbers = #tpu.dot_dimension_numbers<[1], [1], [0], [0], [0, 0, 1, 0], [], []>} : vector<8x4xbf16>, vector<128x4xbf16>, vector<8x128xf32> -> vector<8x128xf32>
    %24 = arith.addf %23, %19 : vector<8x128xf32>
    %cst_15 = arith.constant dense<0xFF800000> : vector<8xf32>
    %25 = vector.multi_reduction <maximumf>, %24, %cst_15 [1] : vector<8x128xf32> to vector<8xf32>
    %26 = vector.shape_cast %25 : vector<8xf32> to vector<8x1xf32>
    %27 = vector.broadcast %26 : vector<8x1xf32> to vector<8x128xf32>
    %28 = arith.subf %24, %27 : vector<8x128xf32>
    %29 = math.exp %28 : vector<8x128xf32>
    %cst_16 = arith.constant dense<0.000000e+00> : vector<8xf32>
    %30 = vector.multi_reduction <add>, %29, %cst_16 [1] : vector<8x128xf32> to vector<8xf32>
    %31 = vector.shape_cast %30 : vector<8xf32> to vector<8x1xf32>
    %32 = tpu.reciprocal %31 {approx = true} : vector<8x1xf32> -> vector<8x1xf32>
    %33 = vector.broadcast %32 : vector<8x1xf32> to vector<8x128xf32>
    %34 = arith.mulf %29, %33 : vector<8x128xf32>
    %35 = arith.addf %20, %34 : vector<8x128xf32>
    %36 = arith.truncf %34 : vector<8x128xf32> to vector<8x128xbf16>
    %37 = vector.extract_strided_slice %13 {offsets = [0, 0], sizes = [128, 4], strides = [1, 1]} : vector<128x32xbf16> to vector<128x4xbf16>
    %cst_17 = arith.constant dense<0.000000e+00> : vector<8x4xf32>
    %38 = tpu.matmul %36, %37, %cst_17 {dimension_numbers = #tpu.dot_dimension_numbers<[1], [0], [0], [1], [0, 0, 1, 1], [], []>} : vector<8x128xbf16>, vector<128x4xbf16>, vector<8x4xf32> -> vector<8x4xf32>
    %c0_18 = arith.constant 0 : index
    %c0_19 = arith.constant 0 : index
    %39 = vector.load %arg18[%c0_18, %c0_19] : memref<8x32xf32, #tpu.memory_space<vmem>>, vector<8x4xf32>
    tpu.vector_store %arg18[%c0_18, %c0_19], %38 {strides = array<i32>} : memref<8x32xf32, #tpu.memory_space<vmem>>, vector<8x4xf32>,
    %40 = vector.extract_strided_slice %11 {offsets = [0, 4], sizes = [8, 4], strides = [1, 1]} : vector<8x32xbf16> to vector<8x4xbf16>
    %41 = vector.extract_strided_slice %12 {offsets = [0, 4], sizes = [128, 4], strides = [1, 1]} : vector<128x32xbf16> to vector<128x4xbf16>
    %cst_20 = arith.constant dense<0.000000e+00> : vector<8x128xf32>
    %42 = tpu.matmul %40, %41, %cst_20 {dimension_numbers = #tpu.dot_dimension_numbers<[1], [1], [0], [0], [0, 0, 1, 0], [], []>} : vector<8x4xbf16>, vector<128x4xbf16>, vector<8x128xf32> -> vector<8x128xf32>
    %43 = arith.addf %42, %19 : vector<8x128xf32>
    %cst_21 = arith.constant dense<0xFF800000> : vector<8xf32>
    %44 = vector.multi_reduction <maximumf>, %43, %cst_21 [1] : vector<8x128xf32> to vector<8xf32>
    %45 = vector.shape_cast %44 : vector<8xf32> to vector<8x1xf32>
    %46 = vector.broadcast %45 : vector<8x1xf32> to vector<8x128xf32>
    %47 = arith.subf %43, %46 : vector<8x128xf32>
    %48 = math.exp %47 : vector<8x128xf32>
    %cst_22 = arith.constant dense<0.000000e+00> : vector<8xf32>
    %49 = vector.multi_reduction <add>, %48, %cst_22 [1] : vector<8x128xf32> to vector<8xf32>
    %50 = vector.shape_cast %49 : vector<8xf32> to vector<8x1xf32>
    %51 = tpu.reciprocal %50 {approx = true} : vector<8x1xf32> -> vector<8x1xf32>
    %52 = vector.broadcast %51 : vector<8x1xf32> to vector<8x128xf32>
    %53 = arith.mulf %48, %52 : vector<8x128xf32>
    %54 = arith.addf %35, %53 : vector<8x128xf32>
    %55 = arith.truncf %53 : vector<8x128xf32> to vector<8x128xbf16>
    %56 = vector.extract_strided_slice %13 {offsets = [0, 4], sizes = [128, 4], strides = [1, 1]} : vector<128x32xbf16> to vector<128x4xbf16>
    %cst_23 = arith.constant dense<0.000000e+00> : vector<8x4xf32>
    %57 = tpu.matmul %55, %56, %cst_23 {dimension_numbers = #tpu.dot_dimension_numbers<[1], [0], [0], [1], [0, 0, 1, 1], [], []>} : vector<8x128xbf16>, vector<128x4xbf16>, vector<8x4xf32> -> vector<8x4xf32>
    %c0_24 = arith.constant 0 : index
    %c4 = arith.constant 4 : index
    %58 = vector.load %arg18[%c0_24, %c4] : memref<8x32xf32, #tpu.memory_space<vmem>>, vector<8x4xf32>
    tpu.vector_store %arg18[%c0_24, %c4], %57 {strides = array<i32>} : memref<8x32xf32, #tpu.memory_space<vmem>>, vector<8x4xf32>,
    %59 = vector.extract_strided_slice %11 {offsets = [0, 8], sizes = [8, 4], strides = [1, 1]} : vector<8x32xbf16> to vector<8x4xbf16>
    %60 = vector.extract_strided_slice %12 {offsets = [0, 8], sizes = [128, 4], strides = [1, 1]} : vector<128x32xbf16> to vector<128x4xbf16>
    %cst_25 = arith.constant dense<0.000000e+00> : vector<8x128xf32>
    %61 = tpu.matmul %59, %60, %cst_25 {dimension_numbers = #tpu.dot_dimension_numbers<[1], [1], [0], [0], [0, 0, 1, 0], [], []>} : vector<8x4xbf16>, vector<128x4xbf16>, vector<8x128xf32> -> vector<8x128xf32>
    %62 = arith.addf %61, %19 : vector<8x128xf32>
    %cst_26 = arith.constant dense<0xFF800000> : vector<8xf32>
    %63 = vector.multi_reduction <maximumf>, %62, %cst_26 [1] : vector<8x128xf32> to vector<8xf32>
    %64 = vector.shape_cast %63 : vector<8xf32> to vector<8x1xf32>
    %65 = vector.broadcast %64 : vector<8x1xf32> to vector<8x128xf32>
    %66 = arith.subf %62, %65 : vector<8x128xf32>
    %67 = math.exp %66 : vector<8x128xf32>
    %cst_27 = arith.constant dense<0.000000e+00> : vector<8xf32>
    %68 = vector.multi_reduction <add>, %67, %cst_27 [1] : vector<8x128xf32> to vector<8xf32>
    %69 = vector.shape_cast %68 : vector<8xf32> to vector<8x1xf32>
    %70 = tpu.reciprocal %69 {approx = true} : vector<8x1xf32> -> vector<8x1xf32>
    %71 = vector.broadcast %70 : vector<8x1xf32> to vector<8x128xf32>
    %72 = arith.mulf %67, %71 : vector<8x128xf32>
    %73 = arith.addf %54, %72 : vector<8x128xf32>
    %74 = arith.truncf %72 : vector<8x128xf32> to vector<8x128xbf16>
    %75 = vector.extract_strided_slice %13 {offsets = [0, 8], sizes = [128, 4], strides = [1, 1]} : vector<128x32xbf16> to vector<128x4xbf16>
    %cst_28 = arith.constant dense<0.000000e+00> : vector<8x4xf32>
    %76 = tpu.matmul %74, %75, %cst_28 {dimension_numbers = #tpu.dot_dimension_numbers<[1], [0], [0], [1], [0, 0, 1, 1], [], []>} : vector<8x128xbf16>, vector<128x4xbf16>, vector<8x4xf32> -> vector<8x4xf32>
    %c0_29 = arith.constant 0 : index
    %c8 = arith.constant 8 : index
    %77 = vector.load %arg18[%c0_29, %c8] : memref<8x32xf32, #tpu.memory_space<vmem>>, vector<8x4xf32>
    tpu.vector_store %arg18[%c0_29, %c8], %76 {strides = array<i32>} : memref<8x32xf32, #tpu.memory_space<vmem>>, vector<8x4xf32>,
    %78 = vector.extract_strided_slice %11 {offsets = [0, 12], sizes = [8, 4], strides = [1, 1]} : vector<8x32xbf16> to vector<8x4xbf16>
    %79 = vector.extract_strided_slice %12 {offsets = [0, 12], sizes = [128, 4], strides = [1, 1]} : vector<128x32xbf16> to vector<128x4xbf16>
    %cst_30 = arith.constant dense<0.000000e+00> : vector<8x128xf32>
    %80 = tpu.matmul %78, %79, %cst_30 {dimension_numbers = #tpu.dot_dimension_numbers<[1], [1], [0], [0], [0, 0, 1, 0], [], []>} : vector<8x4xbf16>, vector<128x4xbf16>, vector<8x128xf32> -> vector<8x128xf32>
    %81 = arith.addf %80, %19 : vector<8x128xf32>
    %cst_31 = arith.constant dense<0xFF800000> : vector<8xf32>
    %82 = vector.multi_reduction <maximumf>, %81, %cst_31 [1] : vector<8x128xf32> to vector<8xf32>
    %83 = vector.shape_cast %82 : vector<8xf32> to vector<8x1xf32>
    %84 = vector.broadcast %83 : vector<8x1xf32> to vector<8x128xf32>
    %85 = arith.subf %81, %84 : vector<8x128xf32>
    %86 = math.exp %85 : vector<8x128xf32>
    %cst_32 = arith.constant dense<0.000000e+00> : vector<8xf32>
    %87 = vector.multi_reduction <add>, %86, %cst_32 [1] : vector<8x128xf32> to vector<8xf32>
    %88 = vector.shape_cast %87 : vector<8xf32> to vector<8x1xf32>
    %89 = tpu.reciprocal %88 {approx = true} : vector<8x1xf32> -> vector<8x1xf32>
    %90 = vector.broadcast %89 : vector<8x1xf32> to vector<8x128xf32>
    %91 = arith.mulf %86, %90 : vector<8x128xf32>
    %92 = arith.addf %73, %91 : vector<8x128xf32>
    %93 = arith.truncf %91 : vector<8x128xf32> to vector<8x128xbf16>
    %94 = vector.extract_strided_slice %13 {offsets = [0, 12], sizes = [128, 4], strides = [1, 1]} : vector<128x32xbf16> to vector<128x4xbf16>
    %cst_33 = arith.constant dense<0.000000e+00> : vector<8x4xf32>
    %95 = tpu.matmul %93, %94, %cst_33 {dimension_numbers = #tpu.dot_dimension_numbers<[1], [0], [0], [1], [0, 0, 1, 1], [], []>} : vector<8x128xbf16>, vector<128x4xbf16>, vector<8x4xf32> -> vector<8x4xf32>
    %c0_34 = arith.constant 0 : index
    %c12 = arith.constant 12 : index
    %96 = vector.load %arg18[%c0_34, %c12] : memref<8x32xf32, #tpu.memory_space<vmem>>, vector<8x4xf32>
    tpu.vector_store %arg18[%c0_34, %c12], %95 {strides = array<i32>} : memref<8x32xf32, #tpu.memory_space<vmem>>, vector<8x4xf32>,
    %97 = vector.extract_strided_slice %11 {offsets = [0, 16], sizes = [8, 4], strides = [1, 1]} : vector<8x32xbf16> to vector<8x4xbf16>
    %98 = vector.extract_strided_slice %12 {offsets = [0, 16], sizes = [128, 4], strides = [1, 1]} : vector<128x32xbf16> to vector<128x4xbf16>
    %cst_35 = arith.constant dense<0.000000e+00> : vector<8x128xf32>
    %99 = tpu.matmul %97, %98, %cst_35 {dimension_numbers = #tpu.dot_dimension_numbers<[1], [1], [0], [0], [0, 0, 1, 0], [], []>} : vector<8x4xbf16>, vector<128x4xbf16>, vector<8x128xf32> -> vector<8x128xf32>
    %100 = arith.addf %99, %19 : vector<8x128xf32>
    %cst_36 = arith.constant dense<0xFF800000> : vector<8xf32>
    %101 = vector.multi_reduction <maximumf>, %100, %cst_36 [1] : vector<8x128xf32> to vector<8xf32>
    %102 = vector.shape_cast %101 : vector<8xf32> to vector<8x1xf32>
    %103 = vector.broadcast %102 : vector<8x1xf32> to vector<8x128xf32>
    %104 = arith.subf %100, %103 : vector<8x128xf32>
    %105 = math.exp %104 : vector<8x128xf32>
    %cst_37 = arith.constant dense<0.000000e+00> : vector<8xf32>
    %106 = vector.multi_reduction <add>, %105, %cst_37 [1] : vector<8x128xf32> to vector<8xf32>
    %107 = vector.shape_cast %106 : vector<8xf32> to vector<8x1xf32>
    %108 = tpu.reciprocal %107 {approx = true} : vector<8x1xf32> -> vector<8x1xf32>
    %109 = vector.broadcast %108 : vector<8x1xf32> to vector<8x128xf32>
    %110 = arith.mulf %105, %109 : vector<8x128xf32>
    %111 = arith.addf %92, %110 : vector<8x128xf32>
    %112 = arith.truncf %110 : vector<8x128xf32> to vector<8x128xbf16>
    %113 = vector.extract_strided_slice %13 {offsets = [0, 16], sizes = [128, 4], strides = [1, 1]} : vector<128x32xbf16> to vector<128x4xbf16>
    %cst_38 = arith.constant dense<0.000000e+00> : vector<8x4xf32>
    %114 = tpu.matmul %112, %113, %cst_38 {dimension_numbers = #tpu.dot_dimension_numbers<[1], [0], [0], [1], [0, 0, 1, 1], [], []>} : vector<8x128xbf16>, vector<128x4xbf16>, vector<8x4xf32> -> vector<8x4xf32>
    %c0_39 = arith.constant 0 : index
    %c16 = arith.constant 16 : index
    %115 = vector.load %arg18[%c0_39, %c16] : memref<8x32xf32, #tpu.memory_space<vmem>>, vector<8x4xf32>
    tpu.vector_store %arg18[%c0_39, %c16], %114 {strides = array<i32>} : memref<8x32xf32, #tpu.memory_space<vmem>>, vector<8x4xf32>,
    %116 = vector.extract_strided_slice %11 {offsets = [0, 20], sizes = [8, 4], strides = [1, 1]} : vector<8x32xbf16> to vector<8x4xbf16>
    %117 = vector.extract_strided_slice %12 {offsets = [0, 20], sizes = [128, 4], strides = [1, 1]} : vector<128x32xbf16> to vector<128x4xbf16>
    %cst_40 = arith.constant dense<0.000000e+00> : vector<8x128xf32>
    %118 = tpu.matmul %116, %117, %cst_40 {dimension_numbers = #tpu.dot_dimension_numbers<[1], [1], [0], [0], [0, 0, 1, 0], [], []>} : vector<8x4xbf16>, vector<128x4xbf16>, vector<8x128xf32> -> vector<8x128xf32>
    %119 = arith.addf %118, %19 : vector<8x128xf32>
    %cst_41 = arith.constant dense<0xFF800000> : vector<8xf32>
    %120 = vector.multi_reduction <maximumf>, %119, %cst_41 [1] : vector<8x128xf32> to vector<8xf32>
    %121 = vector.shape_cast %120 : vector<8xf32> to vector<8x1xf32>
    %122 = vector.broadcast %121 : vector<8x1xf32> to vector<8x128xf32>
    %123 = arith.subf %119, %122 : vector<8x128xf32>
    %124 = math.exp %123 : vector<8x128xf32>
    %cst_42 = arith.constant dense<0.000000e+00> : vector<8xf32>
    %125 = vector.multi_reduction <add>, %124, %cst_42 [1] : vector<8x128xf32> to vector<8xf32>
    %126 = vector.shape_cast %125 : vector<8xf32> to vector<8x1xf32>
    %127 = tpu.reciprocal %126 {approx = true} : vector<8x1xf32> -> vector<8x1xf32>
    %128 = vector.broadcast %127 : vector<8x1xf32> to vector<8x128xf32>
    %129 = arith.mulf %124, %128 : vector<8x128xf32>
    %130 = arith.addf %111, %129 : vector<8x128xf32>
    %131 = arith.truncf %129 : vector<8x128xf32> to vector<8x128xbf16>
    %132 = vector.extract_strided_slice %13 {offsets = [0, 20], sizes = [128, 4], strides = [1, 1]} : vector<128x32xbf16> to vector<128x4xbf16>
    %cst_43 = arith.constant dense<0.000000e+00> : vector<8x4xf32>
    %133 = tpu.matmul %131, %132, %cst_43 {dimension_numbers = #tpu.dot_dimension_numbers<[1], [0], [0], [1], [0, 0, 1, 1], [], []>} : vector<8x128xbf16>, vector<128x4xbf16>, vector<8x4xf32> -> vector<8x4xf32>
    %c0_44 = arith.constant 0 : index
    %c20 = arith.constant 20 : index
    %134 = vector.load %arg18[%c0_44, %c20] : memref<8x32xf32, #tpu.memory_space<vmem>>, vector<8x4xf32>
    tpu.vector_store %arg18[%c0_44, %c20], %133 {strides = array<i32>} : memref<8x32xf32, #tpu.memory_space<vmem>>, vector<8x4xf32>,
    %135 = vector.extract_strided_slice %11 {offsets = [0, 24], sizes = [8, 4], strides = [1, 1]} : vector<8x32xbf16> to vector<8x4xbf16>
    %136 = vector.extract_strided_slice %12 {offsets = [0, 24], sizes = [128, 4], strides = [1, 1]} : vector<128x32xbf16> to vector<128x4xbf16>
    %cst_45 = arith.constant dense<0.000000e+00> : vector<8x128xf32>
    %137 = tpu.matmul %135, %136, %cst_45 {dimension_numbers = #tpu.dot_dimension_numbers<[1], [1], [0], [0], [0, 0, 1, 0], [], []>} : vector<8x4xbf16>, vector<128x4xbf16>, vector<8x128xf32> -> vector<8x128xf32>
    %138 = arith.addf %137, %19 : vector<8x128xf32>
    %cst_46 = arith.constant dense<0xFF800000> : vector<8xf32>
    %139 = vector.multi_reduction <maximumf>, %138, %cst_46 [1] : vector<8x128xf32> to vector<8xf32>
    %140 = vector.shape_cast %139 : vector<8xf32> to vector<8x1xf32>
    %141 = vector.broadcast %140 : vector<8x1xf32> to vector<8x128xf32>
    %142 = arith.subf %138, %141 : vector<8x128xf32>
    %143 = math.exp %142 : vector<8x128xf32>
    %cst_47 = arith.constant dense<0.000000e+00> : vector<8xf32>
    %144 = vector.multi_reduction <add>, %143, %cst_47 [1] : vector<8x128xf32> to vector<8xf32>
    %145 = vector.shape_cast %144 : vector<8xf32> to vector<8x1xf32>
    %146 = tpu.reciprocal %145 {approx = true} : vector<8x1xf32> -> vector<8x1xf32>
    %147 = vector.broadcast %146 : vector<8x1xf32> to vector<8x128xf32>
    %148 = arith.mulf %143, %147 : vector<8x128xf32>
    %149 = arith.addf %130, %148 : vector<8x128xf32>
    %150 = arith.truncf %148 : vector<8x128xf32> to vector<8x128xbf16>
    %151 = vector.extract_strided_slice %13 {offsets = [0, 24], sizes = [128, 4], strides = [1, 1]} : vector<128x32xbf16> to vector<128x4xbf16>
    %cst_48 = arith.constant dense<0.000000e+00> : vector<8x4xf32>
    %152 = tpu.matmul %150, %151, %cst_48 {dimension_numbers = #tpu.dot_dimension_numbers<[1], [0], [0], [1], [0, 0, 1, 1], [], []>} : vector<8x128xbf16>, vector<128x4xbf16>, vector<8x4xf32> -> vector<8x4xf32>
    %c0_49 = arith.constant 0 : index
    %c24 = arith.constant 24 : index
    %153 = vector.load %arg18[%c0_49, %c24] : memref<8x32xf32, #tpu.memory_space<vmem>>, vector<8x4xf32>
    tpu.vector_store %arg18[%c0_49, %c24], %152 {strides = array<i32>} : memref<8x32xf32, #tpu.memory_space<vmem>>, vector<8x4xf32>,
    %154 = vector.extract_strided_slice %11 {offsets = [0, 28], sizes = [8, 4], strides = [1, 1]} : vector<8x32xbf16> to vector<8x4xbf16>
    %155 = vector.extract_strided_slice %12 {offsets = [0, 28], sizes = [128, 4], strides = [1, 1]} : vector<128x32xbf16> to vector<128x4xbf16>
    %cst_50 = arith.constant dense<0.000000e+00> : vector<8x128xf32>
    %156 = tpu.matmul %154, %155, %cst_50 {dimension_numbers = #tpu.dot_dimension_numbers<[1], [1], [0], [0], [0, 0, 1, 0], [], []>} : vector<8x4xbf16>, vector<128x4xbf16>, vector<8x128xf32> -> vector<8x128xf32>
    %157 = arith.addf %156, %19 : vector<8x128xf32>
    %cst_51 = arith.constant dense<0xFF800000> : vector<8xf32>
    %158 = vector.multi_reduction <maximumf>, %157, %cst_51 [1] : vector<8x128xf32> to vector<8xf32>
    %159 = vector.shape_cast %158 : vector<8xf32> to vector<8x1xf32>
    %160 = vector.broadcast %159 : vector<8x1xf32> to vector<8x128xf32>
    %161 = arith.subf %157, %160 : vector<8x128xf32>
    %162 = math.exp %161 : vector<8x128xf32>
    %cst_52 = arith.constant dense<0.000000e+00> : vector<8xf32>
    %163 = vector.multi_reduction <add>, %162, %cst_52 [1] : vector<8x128xf32> to vector<8xf32>
    %164 = vector.shape_cast %163 : vector<8xf32> to vector<8x1xf32>
    %165 = tpu.reciprocal %164 {approx = true} : vector<8x1xf32> -> vector<8x1xf32>
    %166 = vector.broadcast %165 : vector<8x1xf32> to vector<8x128xf32>
    %167 = arith.mulf %162, %166 : vector<8x128xf32>
    %168 = arith.addf %149, %167 : vector<8x128xf32>
    %169 = arith.truncf %167 : vector<8x128xf32> to vector<8x128xbf16>
    %170 = vector.extract_strided_slice %13 {offsets = [0, 28], sizes = [128, 4], strides = [1, 1]} : vector<128x32xbf16> to vector<128x4xbf16>
    %cst_53 = arith.constant dense<0.000000e+00> : vector<8x4xf32>
    %171 = tpu.matmul %169, %170, %cst_53 {dimension_numbers = #tpu.dot_dimension_numbers<[1], [0], [0], [1], [0, 0, 1, 1], [], []>} : vector<8x128xbf16>, vector<128x4xbf16>, vector<8x4xf32> -> vector<8x4xf32>
    %c0_54 = arith.constant 0 : index
    %c28 = arith.constant 28 : index
    %172 = vector.load %arg18[%c0_54, %c28] : memref<8x32xf32, #tpu.memory_space<vmem>>, vector<8x4xf32>
    tpu.vector_store %arg18[%c0_54, %c28], %171 {strides = array<i32>} : memref<8x32xf32, #tpu.memory_space<vmem>>, vector<8x4xf32>,
    %c0_55 = arith.constant 0 : index
    %c0_56 = arith.constant 0 : index
    %173 = vector.load %arg18[%c0_55, %c0_56] : memref<8x32xf32, #tpu.memory_space<vmem>>, vector<8x32xf32>
    %174 = arith.truncf %173 : vector<8x32xf32> to vector<8x32xbf16>
    %c0_57 = arith.constant 0 : index
    %c0_58 = arith.constant 0 : index
    %175 = vector.load %arg10[%c0_57, %c0_58] : memref<32x32xbf16, #tpu.memory_space<vmem>>, vector<32x32xbf16>
    %cst_59 = arith.constant dense<0.000000e+00> : vector<8x32xf32>
    %176 = tpu.matmul %174, %175, %cst_59 {dimension_numbers = #tpu.dot_dimension_numbers<[1], [0], [0], [1], [0, 0, 1, 1], [], []>} : vector<8x32xbf16>, vector<32x32xbf16>, vector<8x32xf32> -> vector<8x32xf32>
    %c0_60 = arith.constant 0 : index
    %c0_61 = arith.constant 0 : index
    %177 = vector.load %arg11[%c0_60, %c0_61] : memref<1x32xf32, #tpu.memory_space<vmem>>, vector<1x32xf32>
    %178 = vector.broadcast %177 : vector<1x32xf32> to vector<8x32xf32>
    %179 = arith.addf %176, %178 : vector<8x32xf32>
    %cst_62 = arith.constant 1.000000e+00 : f32
    %180 = vector.broadcast %cst_62 : f32 to vector<8x128xf32>
    %181 = arith.mulf %168, %180 : vector<8x128xf32>
    %182 = math.log %181 : vector<8x128xf32>
    %c0_63 = arith.constant 0 : index
    %c0_64 = arith.constant 0 : index
    %c0_65 = arith.constant 0 : index
    %183 = vector.load %arg15[%c0_63, %c0_64, %c0_65] : memref<1x8x128xf32, #tpu.memory_space<vmem>>, vector<1x8x128xf32>
    %184 = vector.shape_cast %183 : vector<1x8x128xf32> to vector<8x128xf32>
    %185 = vector.shape_cast %182 : vector<8x128xf32> to vector<1x8x128xf32>
    tpu.vector_store %arg15[%c0_63, %c0_64, %c0_65], %185 {strides = array<i32>} : memref<1x8x128xf32, #tpu.memory_space<vmem>>, vector<1x8x128xf32>,
    %186 = arith.addf %1, %179 : vector<8x32xf32>
    %cst_66 = arith.constant dense<0.000000e+00> : vector<8xf32>
    %187 = vector.multi_reduction <add>, %186, %cst_66 [1] : vector<8x32xf32> to vector<8xf32>
    %188 = vector.shape_cast %187 : vector<8xf32> to vector<8x1xf32>
    %cst_67 = arith.constant 3.200000e+01 : f32
    %189 = vector.broadcast %cst_67 : f32 to vector<8x1xf32>
    %190 = arith.divf %188, %189 : vector<8x1xf32>
    %191 = vector.broadcast %190 : vector<8x1xf32> to vector<8x32xf32>
    %192 = arith.subf %186, %191 : vector<8x32xf32>
    %193 = arith.mulf %192, %192 : vector<8x32xf32>
    %cst_68 = arith.constant dense<0.000000e+00> : vector<8xf32>
    %194 = vector.multi_reduction <add>, %193, %cst_68 [1] : vector<8x32xf32> to vector<8xf32>
    %195 = vector.shape_cast %194 : vector<8xf32> to vector<8x1xf32>
    %cst_69 = arith.constant 3.200000e+01 : f32
    %196 = vector.broadcast %cst_69 : f32 to vector<8x1xf32>
    %197 = arith.divf %195, %196 : vector<8x1xf32>
    %cst_70 = arith.constant 9.99999974E-6 : f32
    %198 = vector.broadcast %cst_70 : f32 to vector<8x1xf32>
    %199 = arith.addf %197, %198 : vector<8x1xf32>
    %200 = math.rsqrt %199 : vector<8x1xf32>
    %201 = vector.broadcast %200 : vector<8x1xf32> to vector<8x32xf32>
    %202 = arith.mulf %192, %201 : vector<8x32xf32>
    %c0_71 = arith.constant 0 : index
    %c0_72 = arith.constant 0 : index
    %203 = vector.load %arg12[%c0_71, %c0_72] : memref<1x32xf32, #tpu.memory_space<vmem>>, vector<1x32xf32>
    %204 = vector.broadcast %203 : vector<1x32xf32> to vector<8x32xf32>
    %205 = arith.mulf %202, %204 : vector<8x32xf32>
    %c0_73 = arith.constant 0 : index
    %c0_74 = arith.constant 0 : index
    %206 = vector.load %arg13[%c0_73, %c0_74] : memref<1x32xf32, #tpu.memory_space<vmem>>, vector<1x32xf32>
    %207 = vector.broadcast %206 : vector<1x32xf32> to vector<8x32xf32>
    %208 = arith.addf %205, %207 : vector<8x32xf32>
    %c0_75 = arith.constant 0 : index
    %c0_76 = arith.constant 0 : index
    %c0_77 = arith.constant 0 : index
    %209 = vector.load %arg14[%c0_75, %c0_76, %c0_77] : memref<1x8x32xf32, #tpu.memory_space<vmem>>, vector<1x8x32xf32>
    %210 = vector.shape_cast %209 : vector<1x8x32xf32> to vector<8x32xf32>
    %211 = vector.shape_cast %208 : vector<8x32xf32> to vector<1x8x32xf32>
    tpu.vector_store %arg14[%c0_75, %c0_76, %c0_77], %211 {strides = array<i32>} : memref<1x8x32xf32, #tpu.memory_space<vmem>>, vector<1x8x32xf32>,
    return
  }
  func.func @transform_0(%arg0: i32, %arg1: i32) -> (i32, i32, i32) {
    %c0_i32 = arith.constant 0 : i32
    %c0_i32_0 = arith.constant 0 : i32
    return %arg0, %arg1, %c0_i32 : i32, i32, i32
  }
  func.func @transform_1(%arg0: i32, %arg1: i32) -> (i32, i32, i32) {
    %c0_i32 = arith.constant 0 : i32
    %c0_i32_0 = arith.constant 0 : i32
    %c0_i32_1 = arith.constant 0 : i32
    return %arg0, %c0_i32, %c0_i32_0 : i32, i32, i32
  }
  func.func @transform_2(%arg0: i32, %arg1: i32) -> (i32, i32) {
    %c0_i32 = arith.constant 0 : i32
    %c0_i32_0 = arith.constant 0 : i32
    %c0_i32_1 = arith.constant 0 : i32
    return %c0_i32, %c0_i32_0 : i32, i32
  }
  func.func @transform_3(%arg0: i32, %arg1: i32) -> (i32, i32) {
    %c0_i32 = arith.constant 0 : i32
    %c0_i32_0 = arith.constant 0 : i32
    %c0_i32_1 = arith.constant 0 : i32
    return %c0_i32, %c0_i32_0 : i32, i32
  }
  func.func @transform_4(%arg0: i32, %arg1: i32) -> (i32, i32) {
    %c0_i32 = arith.constant 0 : i32
    %c0_i32_0 = arith.constant 0 : i32
    %c0_i32_1 = arith.constant 0 : i32
    return %c0_i32, %c0_i32_0 : i32, i32
  }
  func.func @transform_5(%arg0: i32, %arg1: i32) -> (i32, i32) {
    %c0_i32 = arith.constant 0 : i32
    %c0_i32_0 = arith.constant 0 : i32
    %c0_i32_1 = arith.constant 0 : i32
    return %c0_i32, %c0_i32_0 : i32, i32
  }
  func.func @transform_6(%arg0: i32, %arg1: i32) -> (i32, i32) {
    %c0_i32 = arith.constant 0 : i32
    %c0_i32_0 = arith.constant 0 : i32
    %c0_i32_1 = arith.constant 0 : i32
    return %c0_i32, %c0_i32_0 : i32, i32
  }
  func.func @transform_7(%arg0: i32, %arg1: i32) -> (i32, i32) {
    %c0_i32 = arith.constant 0 : i32
    %c0_i32_0 = arith.constant 0 : i32
    %c0_i32_1 = arith.constant 0 : i32
    return %c0_i32, %c0_i32_0 : i32, i32
  }
  func.func @transform_8(%arg0: i32, %arg1: i32) -> (i32, i32) {
    %c0_i32 = arith.constant 0 : i32
    %c0_i32_0 = arith.constant 0 : i32
    %c0_i32_1 = arith.constant 0 : i32
    return %c0_i32, %c0_i32_0 : i32, i32
  }
  func.func @transform_9(%arg0: i32, %arg1: i32) -> (i32, i32) {
    %c0_i32 = arith.constant 0 : i32
    %c0_i32_0 = arith.constant 0 : i32
    %c0_i32_1 = arith.constant 0 : i32
    return %c0_i32, %c0_i32_0 : i32, i32
  }
  func.func @transform_10(%arg0: i32, %arg1: i32) -> (i32, i32) {
    %c0_i32 = arith.constant 0 : i32
    %c0_i32_0 = arith.constant 0 : i32
    %c0_i32_1 = arith.constant 0 : i32
    return %c0_i32, %c0_i32_0 : i32, i32
  }
  func.func @transform_11(%arg0: i32, %arg1: i32) -> (i32, i32) {
    %c0_i32 = arith.constant 0 : i32
    %c0_i32_0 = arith.constant 0 : i32
    %c0_i32_1 = arith.constant 0 : i32
    return %c0_i32, %c0_i32_0 : i32, i32
  }
  func.func @transform_12(%arg0: i32, %arg1: i32) -> (i32, i32, i32) {
    %c0_i32 = arith.constant 0 : i32
    %c0_i32_0 = arith.constant 0 : i32
    return %arg0, %arg1, %c0_i32 : i32, i32, i32
  }
  func.func @transform_13(%arg0: i32, %arg1: i32) -> (i32, i32, i32) {
    %c0_i32 = arith.constant 0 : i32
    %c0_i32_0 = arith.constant 0 : i32
    return %arg0, %arg1, %c0_i32 : i32, i32, i32
  }
}

module attributes {stable_mosaic.version = 11 : i64} {
  func.func @_relation_kernel(%arg0: i32, %arg1: i32, %arg2: memref<1x8x32xf32, #tpu.memory_space<vmem>>, %arg3: memref<1x128x32xbf16, #tpu.memory_space<vmem>>, %arg4: memref<32x32xbf16, #tpu.memory_space<vmem>>, %arg5: memref<32x32xbf16, #tpu.memory_space<vmem>>, %arg6: memref<32x32xbf16, #tpu.memory_space<vmem>>, %arg7: memref<1x32xf32, #tpu.memory_space<vmem>>, %arg8: memref<1x32xf32, #tpu.memory_space<vmem>>, %arg9: memref<1x32xf32, #tpu.memory_space<vmem>>, %arg10: memref<32x32xbf16, #tpu.memory_space<vmem>>, %arg11: memref<1x32xf32, #tpu.memory_space<vmem>>, %arg12: memref<1x32xf32, #tpu.memory_space<vmem>>, %arg13: memref<1x32xf32, #tpu.memory_space<vmem>>, %arg14: memref<1x8x32xf32, #tpu.memory_space<vmem>>, %arg15: memref<1x8x128xf32, #tpu.memory_space<vmem>>, %arg16: memref<128x32xbf16, #tpu.memory_space<vmem>>, %arg17: memref<128x32xbf16, #tpu.memory_space<vmem>>, %arg18: memref<8x32xf32, #tpu.memory_space<vmem>>) attributes {dimension_semantics = [#tpu.dimension_semantics<parallel>, #tpu.dimension_semantics<arbitrary>], iteration_bounds = array<i64: 2, 1>, scalar_prefetch = 0 : i64, scratch_operands = 3 : i64, tpu.core_type = #tpu.core_type<tc>, window_params = [{transform_indices = @transform_0, window_bounds = array<i64: 1, 8, 32>}, {transform_indices = @transform_1, window_bounds = array<i64: 1, 128, 32>}, {pipeline_mode = #tpu.pipeline_mode<synchronous>, transform_indices = @transform_2, window_bounds = array<i64: 32, 32>}, {pipeline_mode = #tpu.pipeline_mode<synchronous>, transform_indices = @transform_3, window_bounds = array<i64: 32, 32>}, {pipeline_mode = #tpu.pipeline_mode<synchronous>, transform_indices = @transform_4, window_bounds = array<i64: 32, 32>}, {pipeline_mode = #tpu.pipeline_mode<synchronous>, transform_indices = @transform_5, window_bounds = array<i64: 1, 32>}, {pipeline_mode = #tpu.pipeline_mode<synchronous>, transform_indices = @transform_6, window_bounds = array<i64: 1, 32>}, {pipeline_mode = #tpu.pipeline_mode<synchronous>, transform_indices = @transform_7, window_bounds = array<i64: 1, 32>}, {pipeline_mode = #tpu.pipeline_mode<synchronous>, transform_indices = @transform_8, window_bounds = array<i64: 32, 32>}, {pipeline_mode = #tpu.pipeline_mode<synchronous>, transform_indices = @transform_9, window_bounds = array<i64: 1, 32>}, {pipeline_mode = #tpu.pipeline_mode<synchronous>, transform_indices = @transform_10, window_bounds = array<i64: 1, 32>}, {pipeline_mode = #tpu.pipeline_mode<synchronous>, transform_indices = @transform_11, window_bounds = array<i64: 1, 32>}, {transform_indices = @transform_12, window_bounds = array<i64: 1, 8, 32>}, {transform_indices = @transform_13, window_bounds = array<i64: 1, 8, 128>}]} {
    %c0 = arith.constant 0 : index
    %c0_0 = arith.constant 0 : index
    %c0_1 = arith.constant 0 : index
    %0 = vector.load %arg2[%c0, %c0_0, %c0_1] : memref<1x8x32xf32, #tpu.memory_space<vmem>>, vector<1x8x32xf32>
    %1 = vector.shape_cast %0 : vector<1x8x32xf32> to vector<8x32xf32>
    %c0_i32 = arith.constant 0 : i32
    %2 = arith.cmpi eq, %arg1, %c0_i32 : i32
    %3 = arith.extui %2 : i1 to i32
    %c0_i32_2 = arith.constant 0 : i32
    %4 = arith.cmpi ne, %3, %c0_i32_2 : i32
    scf.if %4 {
      %c0_78 = arith.constant 0 : index
      %c0_79 = arith.constant 0 : index
      %c0_80 = arith.constant 0 : index
      %212 = vector.load %arg3[%c0_78, %c0_79, %c0_80] : memref<1x128x32xbf16, #tpu.memory_space<vmem>>, vector<1x128x32xbf16>
      %213 = vector.shape_cast %212 : vector<1x128x32xbf16> to vector<128x32xbf16>
      %c0_81 = arith.constant 0 : index
      %c0_82 = arith.constant 0 : index
      %214 = vector.load %arg5[%c0_81, %c0_82] : memref<32x32xbf16, #tpu.memory_space<vmem>>, vector<32x32xbf16>
      %cst_83 = arith.constant dense<0.000000e+00> : vector<128x32xf32>
      %215 = tpu.matmul %213, %214, %cst_83 {dimension_numbers = #tpu.dot_dimension_numbers<[1], [0], [0], [1], [0, 0, 1, 1], [], []>} : vector<128x32xbf16>, vector<32x32xbf16>, vector<128x32xf32> -> vector<128x32xf32>
      %c0_84 = arith.constant 0 : index
      %c0_85 = arith.constant 0 : index
      %216 = vector.load %arg8[%c0_84, %c0_85] : memref<1x32xf32, #tpu.memory_space<vmem>>, vector<1x32xf32>
      %217 = vector.broadcast %216 : vector<1x32xf32> to vector<128x32xf32>
      %218 = arith.addf %215, %217 : vector<128x32xf32>
      %219 = arith.truncf %218 : vector<128x32xf32> to vector<128x32xbf16>
      %c0_86 = arith.constant 0 : index
      %c0_87 = arith.constant 0 : index
      %220 = vector.load %arg16[%c0_86, %c0_87] : memref<128x32xbf16, #tpu.memory_space<vmem>>, vector<128x32xbf16>
      tpu.vector_store %arg16[%c0_86, %c0_87], %219 {strides = array<i32>} : memref<128x32xbf16, #tpu.memory_space<vmem>>, vector<128x32xbf16>,
      %c0_88 = arith.constant 0 : index
      %c0_89 = arith.constant 0 : index
      %221 = vector.load %arg6[%c0_88, %c0_89] : memref<32x32xbf16, #tpu.memory_space<vmem>>, vector<32x32xbf16>
      %cst_90 = arith.constant dense<0.000000e+00> : vector<128x32xf32>
      %222 = tpu.matmul %213, %221, %cst_90 {dimension_numbers = #tpu.dot_dimension_numbers<[1], [0], [0], [1], [0, 0, 1, 1], [], []>} : vector<128x32xbf16>, vector<32x32xbf16>, vector<128x32xf32> -> vector<128x32xf32>
      %c0_91 = arith.constant 0 : index
      %c0_92 = arith.constant 0 : index
      %223 = vector.load %arg9[%c0_91, %c0_92] : memref<1x32xf32, #tpu.memory_space<vmem>>, vector<1x32xf32>
      %224 = vector.broadcast %223 : vector<1x32xf32> to vector<128x32xf32>
      %225 = arith.addf %222, %224 : vector<128x32xf32>
      %226 = arith.truncf %225 : vector<128x32xf32> to vector<128x32xbf16>
      %c0_93 = arith.constant 0 : index
      %c0_94 = arith.constant 0 : index
      %227 = vector.load %arg17[%c0_93, %c0_94] : memref<128x32xbf16, #tpu.memory_space<vmem>>, vector<128x32xbf16>
      tpu.vector_store %arg17[%c0_93, %c0_94], %226 {strides = array<i32>} : memref<128x32xbf16, #tpu.memory_space<vmem>>, vector<128x32xbf16>,
    } else {
    }
    %5 = arith.truncf %1 : vector<8x32xf32> to vector<8x32xbf16>
    %c0_3 = arith.constant 0 : index
    %c0_4 = arith.constant 0 : index
    %6 = vector.load %arg4[%c0_3, %c0_4] : memref<32x32xbf16, #tpu.memory_space<vmem>>, vector<32x32xbf16>
    %cst = arith.constant dense<0.000000e+00> : vector<8x32xf32>
    %7 = tpu.matmul %5, %6, %cst {dimension_numbers = #tpu.dot_dimension_numbers<[1], [0], [0], [1], [0, 0, 1, 1], [], []>} : vector<8x32xbf16>, vector<32x32xbf16>, vector<8x32xf32> -> vector<8x32xf32>
    %c0_5 = arith.constant 0 : index
    %c0_6 = arith.constant 0 : index
    %8 = vector.load %arg7[%c0_5, %c0_6] : memref<1x32xf32, #tpu.memory_space<vmem>>, vector<1x32xf32>
    %9 = vector.broadcast %8 : vector<1x32xf32> to vector<8x32xf32>
    %10 = arith.addf %7, %9 : vector<8x32xf32>
    %11 = arith.truncf %10 : vector<8x32xf32> to vector<8x32xbf16>
    %c0_7 = arith.constant 0 : index
    %c0_8 = arith.constant 0 : index
    %12 = vector.load %arg16[%c0_7, %c0_8] : memref<128x32xbf16, #tpu.memory_space<vmem>>, vector<128x32xbf16>
    %c0_9 = arith.constant 0 : index
    %c0_10 = arith.constant 0 : index
    %13 = vector.load %arg17[%c0_9, %c0_10] : memref<128x32xbf16, #tpu.memory_space<vmem>>, vector<128x32xbf16>
    %14 = tpu.iota {dimensions = array<i32: 1>} : vector<8x128xi32>
    %c8_i32 = arith.constant 8 : i32
    %15 = vector.broadcast %c8_i32 : i32 to vector<8x128xi32>
    %16 = arith.cmpi slt, %14, %15 : vector<8x128xi32>
    %cst_11 = arith.constant 0.000000e+00 : f32
    %cst_12 = arith.constant -1.000000e+30 : f32
    %17 = vector.broadcast %cst_11 : f32 to vector<8x128xf32>
    %18 = vector.broadcast %cst_12 : f32 to vector<8x128xf32>
    %19 = arith.select %16, %17, %18 : vector<8x128xi1>, vector<8x128xf32>
    %cst_13 = arith.constant 0.000000e+00 : f32
    %20 = vector.broadcast %cst_13 : f32 to vector<8x128xf32>
    %21 = vector.extract_strided_slice %11 {offsets = [0, 0], sizes = [8, 4], strides = [1, 1]} : vector<8x32xbf16> to vector<8x4xbf16>
    %22 = vector.extract_strided_slice %12 {offsets = [0, 0], sizes = [128, 4], strides = [1, 1]} : vector<128x32xbf16> to vector<128x4xbf16>
    %cst_14 = arith.constant dense<0.000000e+00> : vector<8x128xf32>
    %23 = tpu.matmul %21, %22, %cst_14 {dimension_numbers = #tpu.dot_dimension_numbers<[1], [1], [0], [0], [0, 0, 1, 0], [], []>} : vector<8x4xbf16>, vector<128x4xbf16>, vector<8x128xf32> -> vector<8x128xf32>
    %24 = arith.addf %23, %19 : vector<8x128xf32>
    %cst_15 = arith.constant dense<0xFF800000> : vector<8xf32>
    %25 = vector.multi_reduction <maximumf>, %24, %cst_15 [1] : vector<8x128xf32> to vector<8xf32>
    %26 = vector.shape_cast %25 : vector<8xf32> to vector<8x1xf32>
    %27 = vector.broadcast %26 : vector<8x1xf32> to vector<8x128xf32>
    %28 = arith.subf %24, %27 : vector<8x128xf32>
    %29 = math.exp %28 : vector<8x128xf32>
    %cst_16 = arith.constant dense<0.000000e+00> : vector<8xf32>
    %30 = vector.multi_reduction <add>, %29, %cst_16 [1] : vector<8x128xf32> to vector<8xf32>
    %31 = vector.shape_cast %30 : vector<8xf32> to vector<8x1xf32>
    %32 = tpu.reciprocal %31 {approx = true} : vector<8x1xf32> -> vector<8x1xf32>
    %33 = vector.broadcast %32 : vector<8x1xf32> to vector<8x128xf32>
    %34 = arith.mulf %29, %33 : vector<8x128xf32>
    %35 = arith.addf %20, %34 : vector<8x128xf32>
    %36 = arith.truncf %34 : vector<8x128xf32> to vector<8x128xbf16>
    %37 = vector.extract_strided_slice %13 {offsets = [0, 0], sizes = [128, 4], strides = [1, 1]} : vector<128x32xbf16> to vector<128x4xbf16>
    %cst_17 = arith.constant dense<0.000000e+00> : vector<8x4xf32>
    %38 = tpu.matmul %36, %37, %cst_17 {dimension_numbers = #tpu.dot_dimension_numbers<[1], [0], [0], [1], [0, 0, 1, 1], [], []>} : vector<8x128xbf16>, vector<128x4xbf16>, vector<8x4xf32> -> vector<8x4xf32>
    %c0_18 = arith.constant 0 : index
    %c0_19 = arith.constant 0 : index
    %39 = vector.load %arg18[%c0_18, %c0_19] : memref<8x32xf32, #tpu.memory_space<vmem>>, vector<8x4xf32>
    tpu.vector_store %arg18[%c0_18, %c0_19], %38 {strides = array<i32>} : memref<8x32xf32, #tpu.memory_space<vmem>>, vector<8x4xf32>,
    %40 = vector.extract_strided_slice %11 {offsets = [0, 4], sizes = [8, 4], strides = [1, 1]} : vector<8x32xbf16> to vector<8x4xbf16>
    %41 = vector.extract_strided_slice %12 {offsets = [0, 4], sizes = [128, 4], strides = [1, 1]} : vector<128x32xbf16> to vector<128x4xbf16>
    %cst_20 = arith.constant dense<0.000000e+00> : vector<8x128xf32>
    %42 = tpu.matmul %40, %41, %cst_20 {dimension_numbers = #tpu.dot_dimension_numbers<[1], [1], [0], [0], [0, 0, 1, 0], [], []>} : vector<8x4xbf16>, vector<128x4xbf16>, vector<8x128xf32> -> vector<8x128xf32>
    %43 = arith.addf %42, %19 : vector<8x128xf32>
    %cst_21 = arith.constant dense<0xFF800000> : vector<8xf32>
    %44 = vector.multi_reduction <maximumf>, %43, %cst_21 [1] : vector<8x128xf32> to vector<8xf32>
    %45 = vector.shape_cast %44 : vector<8xf32> to vector<8x1xf32>
    %46 = vector.broadcast %45 : vector<8x1xf32> to vector<8x128xf32>
    %47 = arith.subf %43, %46 : vector<8x128xf32>
    %48 = math.exp %47 : vector<8x128xf32>
    %cst_22 = arith.constant dense<0.000000e+00> : vector<8xf32>
    %49 = vector.multi_reduction <add>, %48, %cst_22 [1] : vector<8x128xf32> to vector<8xf32>
    %50 = vector.shape_cast %49 : vector<8xf32> to vector<8x1xf32>
    %51 = tpu.reciprocal %50 {approx = true} : vector<8x1xf32> -> vector<8x1xf32>
    %52 = vector.broadcast %51 : vector<8x1xf32> to vector<8x128xf32>
    %53 = arith.mulf %48, %52 : vector<8x128xf32>
    %54 = arith.addf %35, %53 : vector<8x128xf32>
    %55 = arith.truncf %53 : vector<8x128xf32> to vector<8x128xbf16>
    %56 = vector.extract_strided_slice %13 {offsets = [0, 4], sizes = [128, 4], strides = [1, 1]} : vector<128x32xbf16> to vector<128x4xbf16>
    %cst_23 = arith.constant dense<0.000000e+00> : vector<8x4xf32>
    %57 = tpu.matmul %55, %56, %cst_23 {dimension_numbers = #tpu.dot_dimension_numbers<[1], [0], [0], [1], [0, 0, 1, 1], [], []>} : vector<8x128xbf16>, vector<128x4xbf16>, vector<8x4xf32> -> vector<8x4xf32>
    %c0_24 = arith.constant 0 : index
    %c4 = arith.constant 4 : index
    %58 = vector.load %arg18[%c0_24, %c4] : memref<8x32xf32, #tpu.memory_space<vmem>>, vector<8x4xf32>
    tpu.vector_store %arg18[%c0_24, %c4], %57 {strides = array<i32>} : memref<8x32xf32, #tpu.memory_space<vmem>>, vector<8x4xf32>,
    %59 = vector.extract_strided_slice %11 {offsets = [0, 8], sizes = [8, 4], strides = [1, 1]} : vector<8x32xbf16> to vector<8x4xbf16>
    %60 = vector.extract_strided_slice %12 {offsets = [0, 8], sizes = [128, 4], strides = [1, 1]} : vector<128x32xbf16> to vector<128x4xbf16>
    %cst_25 = arith.constant dense<0.000000e+00> : vector<8x128xf32>
    %61 = tpu.matmul %59, %60, %cst_25 {dimension_numbers = #tpu.dot_dimension_numbers<[1], [1], [0], [0], [0, 0, 1, 0], [], []>} : vector<8x4xbf16>, vector<128x4xbf16>, vector<8x128xf32> -> vector<8x128xf32>
    %62 = arith.addf %61, %19 : vector<8x128xf32>
    %cst_26 = arith.constant dense<0xFF800000> : vector<8xf32>
    %63 = vector.multi_reduction <maximumf>, %62, %cst_26 [1] : vector<8x128xf32> to vector<8xf32>
    %64 = vector.shape_cast %63 : vector<8xf32> to vector<8x1xf32>
    %65 = vector.broadcast %64 : vector<8x1xf32> to vector<8x128xf32>
    %66 = arith.subf %62, %65 : vector<8x128xf32>
    %67 = math.exp %66 : vector<8x128xf32>
    %cst_27 = arith.constant dense<0.000000e+00> : vector<8xf32>
    %68 = vector.multi_reduction <add>, %67, %cst_27 [1] : vector<8x128xf32> to vector<8xf32>
    %69 = vector.shape_cast %68 : vector<8xf32> to vector<8x1xf32>
    %70 = tpu.reciprocal %69 {approx = true} : vector<8x1xf32> -> vector<8x1xf32>
    %71 = vector.broadcast %70 : vector<8x1xf32> to vector<8x128xf32>
    %72 = arith.mulf %67, %71 : vector<8x128xf32>
    %73 = arith.addf %54, %72 : vector<8x128xf32>
    %74 = arith.truncf %72 : vector<8x128xf32> to vector<8x128xbf16>
    %75 = vector.extract_strided_slice %13 {offsets = [0, 8], sizes = [128, 4], strides = [1, 1]} : vector<128x32xbf16> to vector<128x4xbf16>
    %cst_28 = arith.constant dense<0.000000e+00> : vector<8x4xf32>
    %76 = tpu.matmul %74, %75, %cst_28 {dimension_numbers = #tpu.dot_dimension_numbers<[1], [0], [0], [1], [0, 0, 1, 1], [], []>} : vector<8x128xbf16>, vector<128x4xbf16>, vector<8x4xf32> -> vector<8x4xf32>
    %c0_29 = arith.constant 0 : index
    %c8 = arith.constant 8 : index
    %77 = vector.load %arg18[%c0_29, %c8] : memref<8x32xf32, #tpu.memory_space<vmem>>, vector<8x4xf32>
    tpu.vector_store %arg18[%c0_29, %c8], %76 {strides = array<i32>} : memref<8x32xf32, #tpu.memory_space<vmem>>, vector<8x4xf32>,
    %78 = vector.extract_strided_slice %11 {offsets = [0, 12], sizes = [8, 4], strides = [1, 1]} : vector<8x32xbf16> to vector<8x4xbf16>
    %79 = vector.extract_strided_slice %12 {offsets = [0, 12], sizes = [128, 4], strides = [1, 1]} : vector<128x32xbf16> to vector<128x4xbf16>
    %cst_30 = arith.constant dense<0.000000e+00> : vector<8x128xf32>
    %80 = tpu.matmul %78, %79, %cst_30 {dimension_numbers = #tpu.dot_dimension_numbers<[1], [1], [0], [0], [0, 0, 1, 0], [], []>} : vector<8x4xbf16>, vector<128x4xbf16>, vector<8x128xf32> -> vector<8x128xf32>
    %81 = arith.addf %80, %19 : vector<8x128xf32>
    %cst_31 = arith.constant dense<0xFF800000> : vector<8xf32>
    %82 = vector.multi_reduction <maximumf>, %81, %cst_31 [1] : vector<8x128xf32> to vector<8xf32>
    %83 = vector.shape_cast %82 : vector<8xf32> to vector<8x1xf32>
    %84 = vector.broadcast %83 : vector<8x1xf32> to vector<8x128xf32>
    %85 = arith.subf %81, %84 : vector<8x128xf32>
    %86 = math.exp %85 : vector<8x128xf32>
    %cst_32 = arith.constant dense<0.000000e+00> : vector<8xf32>
    %87 = vector.multi_reduction <add>, %86, %cst_32 [1] : vector<8x128xf32> to vector<8xf32>
    %88 = vector.shape_cast %87 : vector<8xf32> to vector<8x1xf32>
    %89 = tpu.reciprocal %88 {approx = true} : vector<8x1xf32> -> vector<8x1xf32>
    %90 = vector.broadcast %89 : vector<8x1xf32> to vector<8x128xf32>
    %91 = arith.mulf %86, %90 : vector<8x128xf32>
    %92 = arith.addf %73, %91 : vector<8x128xf32>
    %93 = arith.truncf %91 : vector<8x128xf32> to vector<8x128xbf16>
    %94 = vector.extract_strided_slice %13 {offsets = [0, 12], sizes = [128, 4], strides = [1, 1]} : vector<128x32xbf16> to vector<128x4xbf16>
    %cst_33 = arith.constant dense<0.000000e+00> : vector<8x4xf32>
    %95 = tpu.matmul %93, %94, %cst_33 {dimension_numbers = #tpu.dot_dimension_numbers<[1], [0], [0], [1], [0, 0, 1, 1], [], []>} : vector<8x128xbf16>, vector<128x4xbf16>, vector<8x4xf32> -> vector<8x4xf32>
    %c0_34 = arith.constant 0 : index
    %c12 = arith.constant 12 : index
    %96 = vector.load %arg18[%c0_34, %c12] : memref<8x32xf32, #tpu.memory_space<vmem>>, vector<8x4xf32>
    tpu.vector_store %arg18[%c0_34, %c12], %95 {strides = array<i32>} : memref<8x32xf32, #tpu.memory_space<vmem>>, vector<8x4xf32>,
    %97 = vector.extract_strided_slice %11 {offsets = [0, 16], sizes = [8, 4], strides = [1, 1]} : vector<8x32xbf16> to vector<8x4xbf16>
    %98 = vector.extract_strided_slice %12 {offsets = [0, 16], sizes = [128, 4], strides = [1, 1]} : vector<128x32xbf16> to vector<128x4xbf16>
    %cst_35 = arith.constant dense<0.000000e+00> : vector<8x128xf32>
    %99 = tpu.matmul %97, %98, %cst_35 {dimension_numbers = #tpu.dot_dimension_numbers<[1], [1], [0], [0], [0, 0, 1, 0], [], []>} : vector<8x4xbf16>, vector<128x4xbf16>, vector<8x128xf32> -> vector<8x128xf32>
    %100 = arith.addf %99, %19 : vector<8x128xf32>
    %cst_36 = arith.constant dense<0xFF800000> : vector<8xf32>
    %101 = vector.multi_reduction <maximumf>, %100, %cst_36 [1] : vector<8x128xf32> to vector<8xf32>
    %102 = vector.shape_cast %101 : vector<8xf32> to vector<8x1xf32>
    %103 = vector.broadcast %102 : vector<8x1xf32> to vector<8x128xf32>
    %104 = arith.subf %100, %103 : vector<8x128xf32>
    %105 = math.exp %104 : vector<8x128xf32>
    %cst_37 = arith.constant dense<0.000000e+00> : vector<8xf32>
    %106 = vector.multi_reduction <add>, %105, %cst_37 [1] : vector<8x128xf32> to vector<8xf32>
    %107 = vector.shape_cast %106 : vector<8xf32> to vector<8x1xf32>
    %108 = tpu.reciprocal %107 {approx = true} : vector<8x1xf32> -> vector<8x1xf32>
    %109 = vector.broadcast %108 : vector<8x1xf32> to vector<8x128xf32>
    %110 = arith.mulf %105, %109 : vector<8x128xf32>
    %111 = arith.addf %92, %110 : vector<8x128xf32>
    %112 = arith.truncf %110 : vector<8x128xf32> to vector<8x128xbf16>
    %113 = vector.extract_strided_slice %13 {offsets = [0, 16], sizes = [128, 4], strides = [1, 1]} : vector<128x32xbf16> to vector<128x4xbf16>
    %cst_38 = arith.constant dense<0.000000e+00> : vector<8x4xf32>
    %114 = tpu.matmul %112, %113, %cst_38 {dimension_numbers = #tpu.dot_dimension_numbers<[1], [0], [0], [1], [0, 0, 1, 1], [], []>} : vector<8x128xbf16>, vector<128x4xbf16>, vector<8x4xf32> -> vector<8x4xf32>
    %c0_39 = arith.constant 0 : index
    %c16 = arith.constant 16 : index
    %115 = vector.load %arg18[%c0_39, %c16] : memref<8x32xf32, #tpu.memory_space<vmem>>, vector<8x4xf32>
    tpu.vector_store %arg18[%c0_39, %c16], %114 {strides = array<i32>} : memref<8x32xf32, #tpu.memory_space<vmem>>, vector<8x4xf32>,
    %116 = vector.extract_strided_slice %11 {offsets = [0, 20], sizes = [8, 4], strides = [1, 1]} : vector<8x32xbf16> to vector<8x4xbf16>
    %117 = vector.extract_strided_slice %12 {offsets = [0, 20], sizes = [128, 4], strides = [1, 1]} : vector<128x32xbf16> to vector<128x4xbf16>
    %cst_40 = arith.constant dense<0.000000e+00> : vector<8x128xf32>
    %118 = tpu.matmul %116, %117, %cst_40 {dimension_numbers = #tpu.dot_dimension_numbers<[1], [1], [0], [0], [0, 0, 1, 0], [], []>} : vector<8x4xbf16>, vector<128x4xbf16>, vector<8x128xf32> -> vector<8x128xf32>
    %119 = arith.addf %118, %19 : vector<8x128xf32>
    %cst_41 = arith.constant dense<0xFF800000> : vector<8xf32>
    %120 = vector.multi_reduction <maximumf>, %119, %cst_41 [1] : vector<8x128xf32> to vector<8xf32>
    %121 = vector.shape_cast %120 : vector<8xf32> to vector<8x1xf32>
    %122 = vector.broadcast %121 : vector<8x1xf32> to vector<8x128xf32>
    %123 = arith.subf %119, %122 : vector<8x128xf32>
    %124 = math.exp %123 : vector<8x128xf32>
    %cst_42 = arith.constant dense<0.000000e+00> : vector<8xf32>
    %125 = vector.multi_reduction <add>, %124, %cst_42 [1] : vector<8x128xf32> to vector<8xf32>
    %126 = vector.shape_cast %125 : vector<8xf32> to vector<8x1xf32>
    %127 = tpu.reciprocal %126 {approx = true} : vector<8x1xf32> -> vector<8x1xf32>
    %128 = vector.broadcast %127 : vector<8x1xf32> to vector<8x128xf32>
    %129 = arith.mulf %124, %128 : vector<8x128xf32>
    %130 = arith.addf %111, %129 : vector<8x128xf32>
    %131 = arith.truncf %129 : vector<8x128xf32> to vector<8x128xbf16>
    %132 = vector.extract_strided_slice %13 {offsets = [0, 20], sizes = [128, 4], strides = [1, 1]} : vector<128x32xbf16> to vector<128x4xbf16>
    %cst_43 = arith.constant dense<0.000000e+00> : vector<8x4xf32>
    %133 = tpu.matmul %131, %132, %cst_43 {dimension_numbers = #tpu.dot_dimension_numbers<[1], [0], [0], [1], [0, 0, 1, 1], [], []>} : vector<8x128xbf16>, vector<128x4xbf16>, vector<8x4xf32> -> vector<8x4xf32>
    %c0_44 = arith.constant 0 : index
    %c20 = arith.constant 20 : index
    %134 = vector.load %arg18[%c0_44, %c20] : memref<8x32xf32, #tpu.memory_space<vmem>>, vector<8x4xf32>
    tpu.vector_store %arg18[%c0_44, %c20], %133 {strides = array<i32>} : memref<8x32xf32, #tpu.memory_space<vmem>>, vector<8x4xf32>,
    %135 = vector.extract_strided_slice %11 {offsets = [0, 24], sizes = [8, 4], strides = [1, 1]} : vector<8x32xbf16> to vector<8x4xbf16>
    %136 = vector.extract_strided_slice %12 {offsets = [0, 24], sizes = [128, 4], strides = [1, 1]} : vector<128x32xbf16> to vector<128x4xbf16>
    %cst_45 = arith.constant dense<0.000000e+00> : vector<8x128xf32>
    %137 = tpu.matmul %135, %136, %cst_45 {dimension_numbers = #tpu.dot_dimension_numbers<[1], [1], [0], [0], [0, 0, 1, 0], [], []>} : vector<8x4xbf16>, vector<128x4xbf16>, vector<8x128xf32> -> vector<8x128xf32>
    %138 = arith.addf %137, %19 : vector<8x128xf32>
    %cst_46 = arith.constant dense<0xFF800000> : vector<8xf32>
    %139 = vector.multi_reduction <maximumf>, %138, %cst_46 [1] : vector<8x128xf32> to vector<8xf32>
    %140 = vector.shape_cast %139 : vector<8xf32> to vector<8x1xf32>
    %141 = vector.broadcast %140 : vector<8x1xf32> to vector<8x128xf32>
    %142 = arith.subf %138, %141 : vector<8x128xf32>
    %143 = math.exp %142 : vector<8x128xf32>
    %cst_47 = arith.constant dense<0.000000e+00> : vector<8xf32>
    %144 = vector.multi_reduction <add>, %143, %cst_47 [1] : vector<8x128xf32> to vector<8xf32>
    %145 = vector.shape_cast %144 : vector<8xf32> to vector<8x1xf32>
    %146 = tpu.reciprocal %145 {approx = true} : vector<8x1xf32> -> vector<8x1xf32>
    %147 = vector.broadcast %146 : vector<8x1xf32> to vector<8x128xf32>
    %148 = arith.mulf %143, %147 : vector<8x128xf32>
    %149 = arith.addf %130, %148 : vector<8x128xf32>
    %150 = arith.truncf %148 : vector<8x128xf32> to vector<8x128xbf16>
    %151 = vector.extract_strided_slice %13 {offsets = [0, 24], sizes = [128, 4], strides = [1, 1]} : vector<128x32xbf16> to vector<128x4xbf16>
    %cst_48 = arith.constant dense<0.000000e+00> : vector<8x4xf32>
    %152 = tpu.matmul %150, %151, %cst_48 {dimension_numbers = #tpu.dot_dimension_numbers<[1], [0], [0], [1], [0, 0, 1, 1], [], []>} : vector<8x128xbf16>, vector<128x4xbf16>, vector<8x4xf32> -> vector<8x4xf32>
    %c0_49 = arith.constant 0 : index
    %c24 = arith.constant 24 : index
    %153 = vector.load %arg18[%c0_49, %c24] : memref<8x32xf32, #tpu.memory_space<vmem>>, vector<8x4xf32>
    tpu.vector_store %arg18[%c0_49, %c24], %152 {strides = array<i32>} : memref<8x32xf32, #tpu.memory_space<vmem>>, vector<8x4xf32>,
    %154 = vector.extract_strided_slice %11 {offsets = [0, 28], sizes = [8, 4], strides = [1, 1]} : vector<8x32xbf16> to vector<8x4xbf16>
    %155 = vector.extract_strided_slice %12 {offsets = [0, 28], sizes = [128, 4], strides = [1, 1]} : vector<128x32xbf16> to vector<128x4xbf16>
    %cst_50 = arith.constant dense<0.000000e+00> : vector<8x128xf32>
    %156 = tpu.matmul %154, %155, %cst_50 {dimension_numbers = #tpu.dot_dimension_numbers<[1], [1], [0], [0], [0, 0, 1, 0], [], []>} : vector<8x4xbf16>, vector<128x4xbf16>, vector<8x128xf32> -> vector<8x128xf32>
    %157 = arith.addf %156, %19 : vector<8x128xf32>
    %cst_51 = arith.constant dense<0xFF800000> : vector<8xf32>
    %158 = vector.multi_reduction <maximumf>, %157, %cst_51 [1] : vector<8x128xf32> to vector<8xf32>
    %159 = vector.shape_cast %158 : vector<8xf32> to vector<8x1xf32>
    %160 = vector.broadcast %159 : vector<8x1xf32> to vector<8x128xf32>
    %161 = arith.subf %157, %160 : vector<8x128xf32>
    %162 = math.exp %161 : vector<8x128xf32>
    %cst_52 = arith.constant dense<0.000000e+00> : vector<8xf32>
    %163 = vector.multi_reduction <add>, %162, %cst_52 [1] : vector<8x128xf32> to vector<8xf32>
    %164 = vector.shape_cast %163 : vector<8xf32> to vector<8x1xf32>
    %165 = tpu.reciprocal %164 {approx = true} : vector<8x1xf32> -> vector<8x1xf32>
    %166 = vector.broadcast %165 : vector<8x1xf32> to vector<8x128xf32>
    %167 = arith.mulf %162, %166 : vector<8x128xf32>
    %168 = arith.addf %149, %167 : vector<8x128xf32>
    %169 = arith.truncf %167 : vector<8x128xf32> to vector<8x128xbf16>
    %170 = vector.extract_strided_slice %13 {offsets = [0, 28], sizes = [128, 4], strides = [1, 1]} : vector<128x32xbf16> to vector<128x4xbf16>
    %cst_53 = arith.constant dense<0.000000e+00> : vector<8x4xf32>
    %171 = tpu.matmul %169, %170, %cst_53 {dimension_numbers = #tpu.dot_dimension_numbers<[1], [0], [0], [1], [0, 0, 1, 1], [], []>} : vector<8x128xbf16>, vector<128x4xbf16>, vector<8x4xf32> -> vector<8x4xf32>
    %c0_54 = arith.constant 0 : index
    %c28 = arith.constant 28 : index
    %172 = vector.load %arg18[%c0_54, %c28] : memref<8x32xf32, #tpu.memory_space<vmem>>, vector<8x4xf32>
    tpu.vector_store %arg18[%c0_54, %c28], %171 {strides = array<i32>} : memref<8x32xf32, #tpu.memory_space<vmem>>, vector<8x4xf32>,
    %c0_55 = arith.constant 0 : index
    %c0_56 = arith.constant 0 : index
    %173 = vector.load %arg18[%c0_55, %c0_56] : memref<8x32xf32, #tpu.memory_space<vmem>>, vector<8x32xf32>
    %174 = arith.truncf %173 : vector<8x32xf32> to vector<8x32xbf16>
    %c0_57 = arith.constant 0 : index
    %c0_58 = arith.constant 0 : index
    %175 = vector.load %arg10[%c0_57, %c0_58] : memref<32x32xbf16, #tpu.memory_space<vmem>>, vector<32x32xbf16>
    %cst_59 = arith.constant dense<0.000000e+00> : vector<8x32xf32>
    %176 = tpu.matmul %174, %175, %cst_59 {dimension_numbers = #tpu.dot_dimension_numbers<[1], [0], [0], [1], [0, 0, 1, 1], [], []>} : vector<8x32xbf16>, vector<32x32xbf16>, vector<8x32xf32> -> vector<8x32xf32>
    %c0_60 = arith.constant 0 : index
    %c0_61 = arith.constant 0 : index
    %177 = vector.load %arg11[%c0_60, %c0_61] : memref<1x32xf32, #tpu.memory_space<vmem>>, vector<1x32xf32>
    %178 = vector.broadcast %177 : vector<1x32xf32> to vector<8x32xf32>
    %179 = arith.addf %176, %178 : vector<8x32xf32>
    %cst_62 = arith.constant 1.000000e+00 : f32
    %180 = vector.broadcast %cst_62 : f32 to vector<8x128xf32>
    %181 = arith.mulf %168, %180 : vector<8x128xf32>
    %182 = math.log %181 : vector<8x128xf32>
    %c0_63 = arith.constant 0 : index
    %c0_64 = arith.constant 0 : index
    %c0_65 = arith.constant 0 : index
    %183 = vector.load %arg15[%c0_63, %c0_64, %c0_65] : memref<1x8x128xf32, #tpu.memory_space<vmem>>, vector<1x8x128xf32>
    %184 = vector.shape_cast %183 : vector<1x8x128xf32> to vector<8x128xf32>
    %185 = vector.shape_cast %182 : vector<8x128xf32> to vector<1x8x128xf32>
    tpu.vector_store %arg15[%c0_63, %c0_64, %c0_65], %185 {strides = array<i32>} : memref<1x8x128xf32, #tpu.memory_space<vmem>>, vector<1x8x128xf32>,
    %186 = arith.addf %1, %179 : vector<8x32xf32>
    %cst_66 = arith.constant dense<0.000000e+00> : vector<8xf32>
    %187 = vector.multi_reduction <add>, %186, %cst_66 [1] : vector<8x32xf32> to vector<8xf32>
    %188 = vector.shape_cast %187 : vector<8xf32> to vector<8x1xf32>
    %cst_67 = arith.constant 3.200000e+01 : f32
    %189 = vector.broadcast %cst_67 : f32 to vector<8x1xf32>
    %190 = arith.divf %188, %189 : vector<8x1xf32>
    %191 = vector.broadcast %190 : vector<8x1xf32> to vector<8x32xf32>
    %192 = arith.subf %186, %191 : vector<8x32xf32>
    %193 = arith.mulf %192, %192 : vector<8x32xf32>
    %cst_68 = arith.constant dense<0.000000e+00> : vector<8xf32>
    %194 = vector.multi_reduction <add>, %193, %cst_68 [1] : vector<8x32xf32> to vector<8xf32>
    %195 = vector.shape_cast %194 : vector<8xf32> to vector<8x1xf32>
    %cst_69 = arith.constant 3.200000e+01 : f32
    %196 = vector.broadcast %cst_69 : f32 to vector<8x1xf32>
    %197 = arith.divf %195, %196 : vector<8x1xf32>
    %cst_70 = arith.constant 9.99999974E-6 : f32
    %198 = vector.broadcast %cst_70 : f32 to vector<8x1xf32>
    %199 = arith.addf %197, %198 : vector<8x1xf32>
    %200 = math.rsqrt %199 : vector<8x1xf32>
    %201 = vector.broadcast %200 : vector<8x1xf32> to vector<8x32xf32>
    %202 = arith.mulf %192, %201 : vector<8x32xf32>
    %c0_71 = arith.constant 0 : index
    %c0_72 = arith.constant 0 : index
    %203 = vector.load %arg12[%c0_71, %c0_72] : memref<1x32xf32, #tpu.memory_space<vmem>>, vector<1x32xf32>
    %204 = vector.broadcast %203 : vector<1x32xf32> to vector<8x32xf32>
    %205 = arith.mulf %202, %204 : vector<8x32xf32>
    %c0_73 = arith.constant 0 : index
    %c0_74 = arith.constant 0 : index
    %206 = vector.load %arg13[%c0_73, %c0_74] : memref<1x32xf32, #tpu.memory_space<vmem>>, vector<1x32xf32>
    %207 = vector.broadcast %206 : vector<1x32xf32> to vector<8x32xf32>
    %208 = arith.addf %205, %207 : vector<8x32xf32>
    %c0_75 = arith.constant 0 : index
    %c0_76 = arith.constant 0 : index
    %c0_77 = arith.constant 0 : index
    %209 = vector.load %arg14[%c0_75, %c0_76, %c0_77] : memref<1x8x32xf32, #tpu.memory_space<vmem>>, vector<1x8x32xf32>
    %210 = vector.shape_cast %209 : vector<1x8x32xf32> to vector<8x32xf32>
    %211 = vector.shape_cast %208 : vector<8x32xf32> to vector<1x8x32xf32>
    tpu.vector_store %arg14[%c0_75, %c0_76, %c0_77], %211 {strides = array<i32>} : memref<1x8x32xf32, #tpu.memory_space<vmem>>, vector<1x8x32xf32>,
    return
  }
  func.func @transform_0(%arg0: i32, %arg1: i32) -> (i32, i32, i32) {
    %c0_i32 = arith.constant 0 : i32
    %c0_i32_0 = arith.constant 0 : i32
    return %arg0, %arg1, %c0_i32 : i32, i32, i32
  }
  func.func @transform_1(%arg0: i32, %arg1: i32) -> (i32, i32, i32) {
    %c0_i32 = arith.constant 0 : i32
    %c0_i32_0 = arith.constant 0 : i32
    %c0_i32_1 = arith.constant 0 : i32
    return %arg0, %c0_i32, %c0_i32_0 : i32, i32, i32
  }
  func.func @transform_2(%arg0: i32, %arg1: i32) -> (i32, i32) {
    %c0_i32 = arith.constant 0 : i32
    %c0_i32_0 = arith.constant 0 : i32
    %c0_i32_1 = arith.constant 0 : i32
    return %c0_i32, %c0_i32_0 : i32, i32
  }
  func.func @transform_3(%arg0: i32, %arg1: i32) -> (i32, i32) {
    %c0_i32 = arith.constant 0 : i32
    %c0_i32_0 = arith.constant 0 : i32
    %c0_i32_1 = arith.constant 0 : i32
    return %c0_i32, %c0_i32_0 : i32, i32
  }
  func.func @transform_4(%arg0: i32, %arg1: i32) -> (i32, i32) {
    %c0_i32 = arith.constant 0 : i32
    %c0_i32_0 = arith.constant 0 : i32
    %c0_i32_1 = arith.constant 0 : i32
    return %c0_i32, %c0_i32_0 : i32, i32
  }
  func.func @transform_5(%arg0: i32, %arg1: i32) -> (i32, i32) {
    %c0_i32 = arith.constant 0 : i32
    %c0_i32_0 = arith.constant 0 : i32
    %c0_i32_1 = arith.constant 0 : i32
    return %c0_i32, %c0_i32_0 : i32, i32
  }
  func.func @transform_6(%arg0: i32, %arg1: i32) -> (i32, i32) {
    %c0_i32 = arith.constant 0 : i32
    %c0_i32_0 = arith.constant 0 : i32
    %c0_i32_1 = arith.constant 0 : i32
    return %c0_i32, %c0_i32_0 : i32, i32
  }
  func.func @transform_7(%arg0: i32, %arg1: i32) -> (i32, i32) {
    %c0_i32 = arith.constant 0 : i32
    %c0_i32_0 = arith.constant 0 : i32
    %c0_i32_1 = arith.constant 0 : i32
    return %c0_i32, %c0_i32_0 : i32, i32
  }
  func.func @transform_8(%arg0: i32, %arg1: i32) -> (i32, i32) {
    %c0_i32 = arith.constant 0 : i32
    %c0_i32_0 = arith.constant 0 : i32
    %c0_i32_1 = arith.constant 0 : i32
    return %c0_i32, %c0_i32_0 : i32, i32
  }
  func.func @transform_9(%arg0: i32, %arg1: i32) -> (i32, i32) {
    %c0_i32 = arith.constant 0 : i32
    %c0_i32_0 = arith.constant 0 : i32
    %c0_i32_1 = arith.constant 0 : i32
    return %c0_i32, %c0_i32_0 : i32, i32
  }
  func.func @transform_10(%arg0: i32, %arg1: i32) -> (i32, i32) {
    %c0_i32 = arith.constant 0 : i32
    %c0_i32_0 = arith.constant 0 : i32
    %c0_i32_1 = arith.constant 0 : i32
    return %c0_i32, %c0_i32_0 : i32, i32
  }
  func.func @transform_11(%arg0: i32, %arg1: i32) -> (i32, i32) {
    %c0_i32 = arith.constant 0 : i32
    %c0_i32_0 = arith.constant 0 : i32
    %c0_i32_1 = arith.constant 0 : i32
    return %c0_i32, %c0_i32_0 : i32, i32
  }
  func.func @transform_12(%arg0: i32, %arg1: i32) -> (i32, i32, i32) {
    %c0_i32 = arith.constant 0 : i32
    %c0_i32_0 = arith.constant 0 : i32
    return %arg0, %arg1, %c0_i32 : i32, i32, i32
  }
  func.func @transform_13(%arg0: i32, %arg1: i32) -> (i32, i32, i32) {
    %c0_i32 = arith.constant 0 : i32
    %c0_i32_0 = arith.constant 0 : i32
    return %arg0, %arg1, %c0_i32 : i32, i32, i32
  }
}

</mosaic_0001>

<bundles_post_ra>
// kernel: tpu_custom_call.1
= control target key start
LH: loop header
LB: loop body
LE: loop exit
PB: predicated region body
PF: predicated region fallthrough
CT: control target
= control target key end

     0   :  { %s4305_s0 = inlined_call_operand.vmem [shape: f32[2,8,32], index: 0, kind: input, shape index: {}]   ;;  %s4306_s1 = inlined_call_operand.vmem [shape: bf16[2,128,32], index: 1, kind: input, shape index: {}]   ;;  %s4307_s2 = inlined_call_operand.vmem [shape: bf16[32,32], index: 2, kind: input, shape index: {}]   ;;  %s4308_s3 = inlined_call_operand.vmem [shape: bf16[32,32], index: 3, kind: input, shape index: {}]   ;;  %s4309_s4 = inlined_call_operand.vmem [shape: bf16[32,32], index: 4, kind: input, shape index: {}]   ;;  %s4310_s5 = inlined_call_operand.vmem [shape: f32[1,32], index: 5, kind: input, shape index: {}]   ;;  %s4311_s6 = inlined_call_operand.vmem [shape: f32[1,32], index: 6, kind: input, shape index: {}]   ;;  %s4312_s7 = inlined_call_operand.vmem [shape: f32[1,32], index: 7, kind: input, shape index: {}]   ;;  %s4313_s8 = inlined_call_operand.vmem [shape: bf16[32,32], index: 8, kind: input, shape index: {}]   ;;  %s4314_s9 = inlined_call_operand.vmem [shape: f32[1,32], index: 9, kind: input, shape index: {}]   ;;  %s4315_s10 = inlined_call_operand.vmem [shape: f32[1,32], index: 10, kind: input, shape index: {}]   ;;  %s4316_s11 = inlined_call_operand.vmem [shape: f32[1,32], index: 11, kind: input, shape index: {}]   ;;  %s4317_s12 = inlined_call_operand.hbm [shape: f32[2,8,32], index: 12, kind: output, shape index: {0}]   ;;  %s4318_s13 = inlined_call_operand.hbm [shape: f32[2,8,128], index: 13, kind: output, shape index: {1}]  }
   0x1   :  { %4323 = sst [smem:[#allocation13_spill]] %s4305_s0 }
   0x2   :  { %4324 = sst [smem:[#allocation14_spill]] %s4306_s1 }
   0x3   :  { %4325 = sst [smem:[#allocation15_spill]] %s4307_s2 }
   0x4   :  { %19 = vsyncpa [#allocation6], 0 }
   0x5   :  { %21 = vsyncpa [#allocation6 + $0x1], 0 }
   0x6   :  { %22 = vsyncpa [#allocation8], 0 }
   0x7   :  { %24 = vsyncpa [#allocation8 + $0x1], 0  ;;  %s3456_s25 = smov 0   ;;  %s3458_s26 = smov 0  }
   0x8   :  { %s3460_s27 = smov 0   ;;  %s3462_s28 = smov 0  }
   0x9   :  { %s3464_s29 = smov 0   ;;  %s3466_s30 = smov 0  }
   0xa LB: > { %4326 = sst [smem:[#allocation11_spill]] %s3361_s29  ;;  %s2494_s14 = sadd.s32 4294967295, %s3365_s30   ;;  %s3365_s30 = sphi %s3466_s30, %s30_s30   ;;  %s3361_s29 = sphi %s3464_s29, %s4336_s29   ;;  %s3357_s28 = sphi %s3462_s28, %s4335_s28   ;;  %s3353_s27 = sphi %s3460_s27, %s4339_s27   ;;  %s3349_s26 = sphi %s3458_s26, %s4338_s26   ;;  %s3345_s25 = sphi %s3456_s25, %s4337_s25  }
   0xb   : > { %s2495_s15 = sadd.s32 4294967294, %s3365_s30   ;;  %s42_s16 = sadd.s32 1, %s3361_s29 }
   0xc   : > { %s315_s17 = sadd.s32 1, %s3353_s27  ;;  %p44_p0 = scmp.ge.s32.totalorder %s42_s16, 2 }
   0xd   : > { %p325_p1 = scmp.ne.s32.totalorder %s3353_s27, %s3349_s26  ;;  %p326_p2 = scmp.eq.s32.totalorder %s2494_s14, 1 }
   0xe   : > { %p331_p3 = scmp.ne.s32.totalorder %s3349_s26, %s3345_s25  ;;  %s4341_s16 = smov (%p44_p0, %s42_s16), 0 }
   0xf   : > { %4327 = sst [smem:[#allocation12_spill]] %s4341_s16  ;;  %p3496_p4 = por %p326_p2, %p325_p1 }
  0x10   : > { %p332_p5 = scmp.eq.s32.totalorder %s2495_s15, 1  ;;  %s310_s19 = ssub.s32 %s3361_s29, %s4341_s16 }
  0x11   : > { %p2498_p6 = scmp.ge.s32.totalorder %s3365_s30, 1  ;;  %p313_p7 = scmp.eq.s32.totalorder %s310_s19, 0 }
  0x12   : > { %p3503_p8 = por %p332_p5, %p331_p3  ;;  %p426_p9 = scmp.lt.s32.totalorder %s3365_s30, 3 }
  0x13   : > { %s3509_s21 = scalar_select %p313_p7, %s3353_s27, %s315_s17  }
  0x14   : > { %p427_p10 = pnand %p2498_p6, %p426_p9 }
  0x15   : > { %v3186_v0 = vld [vmem:[%s4308_s3] sm:$0xff] (!%p427_p10)   ;;  %p482_p11 = scmp.lt.s32.totalorder (!%p427_p10), %s3357_s28, 1  ;;  %v3187_v1 = vld [vmem:[%s4308_s3 + $0x8] sm:$0xff] (!%p427_p10)   ;;  %vm579_vm0 = vcmask (!%p427_p10), 261120   ;;  %s4330_s1 = sld [smem:[#allocation14_spill]] (!%p427_p10)  ;;  %v3367_v6 = vmov (!%p427_p10), 0.0  }
  0x16   : > { %430 = sbr.rel (%p427_p10) target bundleno = 5878 (0x16f6), region = 68  ;;  %2729 = vmatprep.subr.bf16.mxu0 (!%p427_p10), %v3186_v0  ;;  %3105 = vmatprep.subr.bf16.mxu1 (!%p427_p10), %v3186_v0  ;;  %s4331_s2 = sld [smem:[#allocation15_spill]] (!%p427_p10)  ;;  %vm3368_vm1 = vmmov (!%p427_p10), 0   ;;  %v3198_v15 = vld [vmem:[%s4309_s4] sm:$0xff] (!%p427_p10)   ;;  %v3199_v16 = vld [vmem:[%s4309_s4 + $0x8] sm:$0xff] (!%p427_p10)   ;;  %vm942_vm2 = vcmask (!%p427_p10), 31744  }
  0x17   : > { %2730 = vmatpush3.bf16.msra.mxu0 (!%p427_p10), %v3186_v0  ;;  %3107 = vmatpush3.bf16.msra.mxu1 (!%p427_p10), %v3186_v0  ;;  %s4332_s0 = sld [smem:[#allocation13_spill]] (!%p427_p10)  ;;  %v2504_v18 = vld [vmem:[%s4311_s6] ss:$0 sm:$0xff] (!%p427_p10)  ;;  %s3369_s16 = smov (!%p427_p10), 124   ;;  %vm1243_vm4 = vcmask (!%p427_p10), 64544   ;;  %vm1409_vm5 = vcmask (!%p427_p10), 97344  }
  0x18   : > { %2731 = vmatprep.subr.bf16.mxu0 (!%p427_p10), %v3187_v1  ;;  %3106 = vmatprep.subr.bf16.mxu1 (!%p427_p10), %v3187_v1  ;;  %s3371_s24 = smov (!%p427_p10), 120   ;;  %s3372_s14 = smov (!%p427_p10), 116   ;;  %vm1575_vm6 = vcmask (!%p427_p10), 130144   ;;  %vm1741_vm7 = vcmask (!%p427_p10), 162944   ;;  %vm1907_vm8 = vcmask (!%p427_p10), 195744   ;;  %vm2073_vm9 = vcmask (!%p427_p10), 228544  }
  0x19   : > { %s3377_s22 = smov (!%p427_p10), 4   ;;  %vm2239_vm10 = vcmask (!%p427_p10), 261344  }
  0x1b   : > { %2732 = vmatpush3.bf16.msra.mxu0 (!%p427_p10), %v3187_v1  ;;  %3108 = vmatpush3.bf16.msra.mxu1 (!%p427_p10), %v3187_v1 }
  0x1c   : > { %v3196_v2 = vld [vmem:[%s4331_s2] sm:$0xff] (!%p427_p10)   ;;  %2769 = vmatprep.subr.bf16.mxu0 (!%p427_p10), %v3367_v6  ;;  %v3197_v7 = vld [vmem:[%s4331_s2 + $0x8] sm:$0xff] (!%p427_p10)   ;;  %2749 = vmatprep.subr.bf16.mxu1 (!%p427_p10), %v3198_v15 }
  0x1d   : > { %s3519_s15 = scalar_select %p482_p11, %s3357_s28, 1 }
  0x1f   : > { %s2558_s17 = sshll.u32 %s3519_s15, 6  ;;  %s2501_s29 = sshll.u32 %s3519_s15, 3 }
  0x20   : > { %s493_s23 = scalar_lea.vmem %s4330_s1, %s2558_s17  ;;  %s3546_s19 = scalar_lea.vmem %s4332_s0, %s2501_s29 }
  0x21   : > { %v3188_v3 = vld [vmem:[%s493_s23] sm:$0xff]   ;;  %v3189_v4 = vld [vmem:[%s493_s23 + $0x8] sm:$0xff]   ;;  %v3190_v5 = vld [vmem:[%s493_s23 + $0x10] sm:$0xff]   ;;  %s3373_s29 = smov 112   ;;  %s3375_s17 = smov 104  }
  0x22   : > { %2733 = vmatprep.mubr.msk.bf16.mxu0 %vm579_vm0, %v3188_v3  ;;  %v3194_v8 = vld [vmem:[%s493_s23 + $0x30] sm:$0xff]   ;;  %v3195_v9 = vld [vmem:[%s493_s23 + $0x38] sm:$0xff]   ;;  %v3192_v11 = vld [vmem:[%s493_s23 + $0x20] sm:$0xff]   ;;  %s3376_s15 = smov 100   ;;  %s3384_s0 = smov [#allocation7]  }
  0x23   : > { %2734 = vmatmul.mubr.msk.bf16.vlgmr.msra.gmra.mrb[0].mxu0 %vm579_vm0, %v3189_v4  ;;  %v3191_v10 = vld [vmem:[%s493_s23 + $0x18] sm:$0xff]   ;;  %2745 = vmatprep.mubr.msk.bf16.mxu1 %vm579_vm0, %v3194_v8  ;;  %v3193_v12 = vld [vmem:[%s493_s23 + $0x28] sm:$0xff]   ;;  %v495_v13 = vld [vmem:[%s3546_s19] sm:$0xff]  ;;  %s3378_s23 = smov 12   ;;  %s3259_s1 = sshll.u32 %s3384_s0, 4  ;;  %s3260_s1 = int_to_ptr.vmem [resolvable:$false] %s3259_s1 }
  0x24   : > { %2737 = vmatprep.mubr.msk.bf16.mxu0 %vm579_vm0, %v3190_v5  ;;  %2770 = vmatpush3.bf16.msra.mxu0 %v3196_v2  ;;  %v853_v14 = vpack.c.bf16 %v495_v13, %v495_v13  ;;  %s3261_s2 = scalar_lea.vmem %s3260_s1, 256 }
  0x25   : > { %2771 = vmatprep.subr.bf16.mxu0 %v3367_v6  ;;  %2746 = vmatmul.mubr.msk.bf16.vlgmr.msra.gmra.mrb[0].mxu1 %vm579_vm0, %v3195_v9 }
  0x26   : > { %2753 = vmatprep.mubr.msk.bf16.mxu1 %vm579_vm0, %v3188_v3  ;;  %2750 = vmatpush3.bf16.msra.mxu1 %v3198_v15 }
  0x27   : > { %2751 = vmatprep.subr.bf16.mxu1 %v3199_v16 }
  0x28   : > { %2772 = vmatpush3.bf16.msra.mxu0 %v3197_v7 }
  0x29   : > { %2797 = vmatprep.subr.bf16.mxu0 %v3367_v6 }
  0x2a   : > { %2752 = vmatpush3.bf16.msra.mxu1 %v3199_v16 }
  0x2b   : > { %2738 = vmatmul.mubr.msk.bf16.gmra.mrb[4].mxu0 %vm579_vm0, %v3191_v10  ;;  %2777 = vmatprep.subr.bf16.mxu1 %v3367_v6 }
  0x2c   : > { %2741 = vmatprep.mubr.msk.bf16.mxu0 %vm579_vm0, %v3192_v11 }
  0x2d   : > { %2754 = vmatmul.mubr.msk.bf16.vlgmr.msra.gmra.mrb[4].mxu1 %vm579_vm0, %v3189_v4 }
  0x2e   : > { %2757 = vmatprep.mubr.msk.bf16.mxu1 %vm579_vm0, %v3190_v5 }
  0x33   : > { %2742 = vmatmul.mubr.msk.bf16.gmra.mrb[8].mxu0 %vm579_vm0, %v3193_v12 }
  0x34   : > { %2773 = vmatprep.mubr.msk.bf16.mxu0 %vm3368_vm1, %v3367_v6 }
  0x35   : > { %2758 = vmatmul.mubr.msk.bf16.gmra.mrb[8].mxu1 %vm579_vm0, %v3191_v10 }
  0x36   : > { %2761 = vmatprep.mubr.msk.bf16.mxu1 %vm579_vm0, %v3192_v11 }
  0x3b   : > { %2774 = vmatmul.mubr.msk.bf16.vlgmr.msra.gmra.mrb[12].mxu0 %vm579_vm0, %v853_v14 }
  0x3c   : > { %2813 = vmatprep.mubr.msk.bf16.mxu0 %vm3368_vm1, %v3367_v6 }
  0x3d   : > { %2762 = vmatmul.mubr.msk.bf16.gmra.mrb[12].mxu1 %vm579_vm0, %v3193_v12 }
  0x3e   : > { %2765 = vmatprep.mubr.msk.bf16.mxu1 %vm579_vm0, %v3194_v8 }
  0x45   : > { %2766 = vmatmul.mubr.msk.bf16.gmra.mrb[16].mxu1 %vm579_vm0, %v3195_v9  ;;  %v2534_v9 = vld [vmem:[%s4310_s5] ss:$0 sm:$0xff] }
  0x46   : > { %2793 = vmatprep.mubr.msk.bf16.mxu1 %vm3368_vm1, %v3367_v6 }
  0xf6   : > { %v2735_v17 = vpop.f32.mrb[0].mxu0 }
  0xf7   : > { %v638_v19 = vpop.f32.mrb[1].mxu0  ;;  %v647_v21 = vadd.f32 %v2735_v17, %v2504_v18 }
  0xf8   : > { %v2736_v20 = vpop.f32.mrb[2].mxu0  ;;  %v639_v24 = vadd.f32 %v2504_v18, %v638_v19  ;;  %v2747_v27 = vpop.f32.mrb[0].mxu1 }
  0xf9   : > { %v650_v22 = vadd.f32 %v2736_v20, %v2504_v18  ;;  %v641_v23 = vpop.f32.mrb[3].mxu0  ;;  %v695_v29 = vadd.f32 %v2747_v27, %v2504_v18  ;;  %v686_v30 = vpop.f32.mrb[1].mxu1 }
  0xfa   : > { %v642_v25 = vadd.f32 %v2504_v18, %v641_v23  ;;  %v687_v31 = vadd.f32 %v2504_v18, %v686_v30  ;;  %v2748_v32 = vpop.f32.mrb[2].mxu1 }
  0xfb   : > { %v702_v26 = vpack.c.bf16 %v650_v22, %v647_v21  ;;  %v698_v34 = vadd.f32 %v2748_v32, %v2504_v18  ;;  %v689_v35 = vpop.f32.mrb[3].mxu1 }
  0xfc   : > { %v701_v28 = vpack.c.bf16 %v642_v25, %v639_v24  ;;  %v690_v38 = vadd.f32 %v2504_v18, %v689_v35 }
  0xfd   : > { %710 = vst.msk [vmem:[#allocation2 + $0x8] sm:$0xff] %vm579_vm0, %v702_v26  ;;  %v708_v41 = vpack.c.bf16 %v698_v34, %v695_v29 }
  0xfe   : > { %709 = vst.msk [vmem:[#allocation2] sm:$0xff] %vm579_vm0, %v701_v28  ;;  %v2739_v33 = vpop.f32.mrb[4].mxu0  ;;  %v707_v44 = vpack.c.bf16 %v690_v38, %v687_v31 }
  0xff   : > { %v663_v36 = vadd.f32 %v2739_v33, %v2504_v18  ;;  %v654_v37 = vpop.f32.mrb[5].mxu0  ;;  %716 = vst.msk [vmem:[#allocation2 + $0x38] sm:$0xff] %vm579_vm0, %v708_v41 }
 0x100   : > { %v655_v39 = vadd.f32 %v2504_v18, %v654_v37  ;;  %v2740_v40 = vpop.f32.mrb[6].mxu0  ;;  %715 = vst.msk [vmem:[#allocation2 + $0x30] sm:$0xff] %vm579_vm0, %v707_v44  ;;  %v2755_v19 = vpop.f32.mrb[4].mxu1 }
 0x101   : > { %v666_v42 = vadd.f32 %v2740_v40, %v2504_v18  ;;  %v657_v43 = vpop.f32.mrb[7].mxu0  ;;  %v774_v21 = vpop.f32.mrb[5].mxu1 }
 0x102   : > { %v658_v45 = vadd.f32 %v2504_v18, %v657_v43  ;;  %v2756_v23 = vpop.f32.mrb[6].mxu1 }
 0x103   : > { %v704_v46 = vpack.c.bf16 %v666_v42, %v663_v36  ;;  %v777_v25 = vpop.f32.mrb[7].mxu1 }
 0x104   : > { %v703_v47 = vpack.c.bf16 %v658_v45, %v655_v39  ;;  %v3587_v55 = vld [vmem:[#allocation2 + $0x8] sm:$0xff] }
 0x105   : > { %712 = vst.msk [vmem:[#allocation2 + $0x18] sm:$0xff] %vm579_vm0, %v704_v46  ;;  %v3579_v48 = vld [vmem:[#allocation2] sm:$0xff]  ;;  %v950_v62 = vsel %vm942_vm2, %v3587_v55, 0 }
 0x106   : > { %711 = vst.msk [vmem:[#allocation2 + $0x10] sm:$0xff] %vm579_vm0, %v703_v47  ;;  %1073 = vrot.lane.b32.xlu1 %v3579_v48, %s3369_s16  ;;  %v947_v49 = vsel %vm942_vm2, %v3579_v48, 0  ;;  %v2743_v50 = vpop.f32.mrb[8].mxu0  ;;  %v3622_v12 = vld [vmem:[#allocation2 + $0x38] sm:$0xff] }
 0x107   : > { %2778 = vmatpush3.bf16.xpose.msra.mxu1 %v947_v49  ;;  %v679_v51 = vadd.f32 %v2743_v50, %v2504_v18  ;;  %v670_v52 = vpop.f32.mrb[9].mxu0  ;;  %v3613_v8 = vld [vmem:[#allocation2 + $0x30] sm:$0xff]  ;;  %v968_v17 = vsel %vm942_vm2, %v3622_v12, 0 }
 0x108   : > { %2779 = vmatprep.subr.bf16.mxu1 %v3367_v6  ;;  %v671_v53 = vadd.f32 %v2504_v18, %v670_v52  ;;  %v2744_v54 = vpop.f32.mrb[10].mxu0  ;;  %v965_v16 = vsel %vm942_vm2, %v3613_v8, 0  ;;  %v2759_v29 = vpop.f32.mrb[8].mxu1 }
 0x109   : > { %v682_v56 = vadd.f32 %v2744_v54, %v2504_v18  ;;  %v673_v57 = vpop.f32.mrb[11].mxu0  ;;  %v790_v31 = vpop.f32.mrb[9].mxu1 }
 0x10a   : > { %1075 = vrot.lane.b32.xlu1 %v3587_v55, %s3369_s16  ;;  %v674_v58 = vadd.f32 %v2504_v18, %v673_v57  ;;  %v2523_v18 = vld [vmem:[%s4312_s7] ss:$0 sm:$0xff]  ;;  %v2760_v33 = vpop.f32.mrb[10].mxu1 }
 0x10b   : > { %v706_v59 = vpack.c.bf16 %v682_v56, %v679_v51  ;;  %v783_v20 = vadd.f32 %v2755_v19, %v2523_v18  ;;  %v775_v22 = vadd.f32 %v2523_v18, %v774_v21  ;;  %v786_v24 = vadd.f32 %v2756_v23, %v2523_v18  ;;  %v793_v35 = vpop.f32.mrb[11].mxu1 }
 0x10c   : > { %v705_v60 = vpack.c.bf16 %v674_v58, %v671_v53  ;;  %v3591_v61 = vld [vmem:[#allocation2 + $0x18] sm:$0xff]  ;;  %v778_v26 = vadd.f32 %v2523_v18, %v777_v25  ;;  %v799_v30 = vadd.f32 %v2759_v29, %v2523_v18  ;;  %v791_v32 = vadd.f32 %v2523_v18, %v790_v31 }
 0x10d   : > { %714 = vst.msk [vmem:[#allocation2 + $0x28] sm:$0xff] %vm579_vm0, %v706_v59  ;;  %v3600_v3 = vld [vmem:[#allocation2 + $0x10] sm:$0xff]  ;;  %v956_v10 = vsel %vm942_vm2, %v3591_v61, 0  ;;  %v838_v27 = vpack.c.bf16 %v786_v24, %v783_v20  ;;  %v802_v34 = vadd.f32 %v2760_v33, %v2523_v18  ;;  %v794_v36 = vadd.f32 %v2523_v18, %v793_v35 }
 0x10e   : > { %713 = vst.msk [vmem:[#allocation2 + $0x20] sm:$0xff] %vm579_vm0, %v705_v60  ;;  %1079 = vrot.lane.b32.xlu1 %v3591_v61, %s3369_s16  ;;  %v915_v63 = vpop.f32.mrb[12].mxu0  ;;  %v953_v5 = vsel %vm942_vm2, %v3600_v3, 0  ;;  %v837_v28 = vpack.c.bf16 %v778_v26, %v775_v22  ;;  %v938_v23 = vlaneseq  ;;  %v3370_v25 = vmov -1e+30  }
 0x10f   : > { %2780 = vmatpush3.bf16.xpose.msra.mxu1 %v950_v62  ;;  %v2775_v0 = vpop.f32.mrb[13].mxu0  ;;  %v916_v11 = vadd.f32 %v2534_v9, %v915_v63  ;;  %846 = vst.msk [vmem:[#allocation3 + $0x8] sm:$0xff] %vm579_vm0, %v838_v27  ;;  %v840_v37 = vpack.c.bf16 %v802_v34, %v799_v30  ;;  %v839_v38 = vpack.c.bf16 %v794_v36, %v791_v32 }
 0x110   : > { %2781 = vmatprep.subr.bf16.mxu1 %v3367_v6  ;;  %v918_v1 = vpop.f32.mrb[14].mxu0  ;;  %845 = vst.msk [vmem:[#allocation3] sm:$0xff] %vm579_vm0, %v837_v28  ;;  %v2763_v40 = vpop.f32.mrb[12].mxu1  ;;  %v939_v24 = vand.u32 127, %v938_v23 }
 0x111   : > { %v2776_v2 = vpop.f32.mrb[15].mxu0  ;;  %v3627_v13 = vpack.c.bf16 %v916_v11, %v916_v11  ;;  %848 = vst.msk [vmem:[#allocation3 + $0x18] sm:$0xff] %vm579_vm0, %v840_v37  ;;  %847 = vst.msk [vmem:[#allocation3 + $0x10] sm:$0xff] %vm579_vm0, %v839_v38  ;;  %v815_v42 = vadd.f32 %v2763_v40, %v2523_v18  ;;  %v806_v43 = vpop.f32.mrb[13].mxu1 }
 0x112   : > { %v807_v44 = vadd.f32 %v2523_v18, %v806_v43  ;;  %v2764_v45 = vpop.f32.mrb[14].mxu1  ;;  %vm940_vm3 = vcmp.lt.s32.totalorder %v939_v24, 8 }
 0x113   : > { %v818_v46 = vadd.f32 %v2764_v45, %v2523_v18  ;;  %v809_v47 = vpop.f32.mrb[15].mxu1  ;;  %v3700_v26 = vsel %vm940_vm3, 0.0, %v3370_v25 }
 0x114   : > { %v3608_v7 = vld [vmem:[#allocation2 + $0x28] sm:$0xff]  ;;  %v810_v49 = vadd.f32 %v2523_v18, %v809_v47 }
 0x115   : > { %v3602_v4 = vld [vmem:[#allocation2 + $0x20] sm:$0xff]  ;;  %v962_v15 = vsel %vm942_vm2, %v3608_v7, 0  ;;  %v842_v50 = vpack.c.bf16 %v818_v46, %v815_v42 }
 0x116   : > { %1081 = vrot.lane.b32.xlu1 %v3602_v4, %s3369_s16  ;;  %v959_v14 = vsel %vm942_vm2, %v3602_v4, 0  ;;  %v3660_v41 = vld [vmem:[#allocation3 + $0x8] sm:$0xff]  ;;  %v841_v51 = vpack.c.bf16 %v810_v49, %v807_v44 }
 0x117   : > { %2782 = vmatpush3.bf16.xpose.msra.mxu1 %v953_v5  ;;  %v3652_v39 = vld [vmem:[#allocation3] sm:$0xff]  ;;  %850 = vst.msk [vmem:[#allocation3 + $0x28] sm:$0xff] %vm579_vm0, %v842_v50 }
 0x118   : > { %2783 = vmatprep.subr.bf16.mxu1 %v3367_v6  ;;  %2798 = vmatpush3.bf16.msra.mxu0 %v3652_v39  ;;  %v3666_v52 = vld [vmem:[#allocation3 + $0x18] sm:$0xff]  ;;  %v3669_v53 = vld [vmem:[#allocation3 + $0x10] sm:$0xff]  ;;  %849 = vst.msk [vmem:[#allocation3 + $0x20] sm:$0xff] %vm579_vm0, %v841_v51  ;;  %v2767_v54 = vpop.f32.mrb[16].mxu1 }
 0x119   : > { %2799 = vmatprep.subr.bf16.mxu0 %v3367_v6  ;;  %v831_v56 = vadd.f32 %v2767_v54, %v2523_v18  ;;  %v822_v57 = vpop.f32.mrb[17].mxu1 }
 0x11a   : > { %1083 = vrot.lane.b32.xlu1 %v3608_v7, %s3369_s16  ;;  %v823_v58 = vadd.f32 %v2523_v18, %v822_v57  ;;  %v2768_v59 = vpop.f32.mrb[18].mxu1 }
 0x11b   : > { %v834_v60 = vadd.f32 %v2768_v59, %v2523_v18  ;;  %v825_v62 = vpop.f32.mrb[19].mxu1 }
 0x11c   : > { %2800 = vmatpush3.bf16.msra.mxu0 %v3660_v41  ;;  %v826_v63 = vadd.f32 %v2523_v18, %v825_v62 }
 0x11d   : > { %2801 = vmatprep.subr.bf16.mxu0 %v3367_v6  ;;  %v844_v0 = vpack.c.bf16 %v834_v60, %v831_v56 }
 0x11e   : > { %1085 = vrot.lane.b32.xlu1 %v3613_v8, %s3369_s16  ;;  %v843_v1 = vpack.c.bf16 %v826_v63, %v823_v58  ;;  %v3684_v5 = vld [vmem:[#allocation3 + $0x28] sm:$0xff] }
 0x11f   : > { %2784 = vmatpush3.bf16.xpose.msra.mxu1 %v956_v10  ;;  %852 = vst.msk [vmem:[#allocation3 + $0x38] sm:$0xff] %vm579_vm0, %v844_v0  ;;  %v3679_v2 = vld [vmem:[#allocation3 + $0x20] sm:$0xff] }
 0x120   : > { %2785 = vmatprep.subr.bf16.mxu1 %v3367_v6  ;;  %2802 = vmatpush3.bf16.msra.mxu0 %v3669_v53  ;;  %851 = vst.msk [vmem:[#allocation3 + $0x30] sm:$0xff] %vm579_vm0, %v843_v1 }
 0x121   : > { %2803 = vmatprep.subr.bf16.mxu0 %v3367_v6 }
 0x122   : > { %1087 = vrot.lane.b32.xlu1 %v3622_v12, %s3369_s16 }
 0x124   : > { %2804 = vmatpush3.bf16.msra.mxu0 %v3666_v52 }
 0x125   : > { %2805 = vmatprep.subr.bf16.mxu0 %v3367_v6 }
 0x126   : > { %1063 = vrot.lane.b32.xlu1 %v3627_v13, %s3369_s16  ;;  %v3692_v10 = vld [vmem:[#allocation3 + $0x38] sm:$0xff] }
 0x127   : > { %2786 = vmatpush3.bf16.xpose.msra.mxu1 %v959_v14  ;;  %v3688_v9 = vld [vmem:[#allocation3 + $0x30] sm:$0xff] }
 0x128   : > { %2787 = vmatprep.subr.bf16.mxu1 %v3367_v6  ;;  %2806 = vmatpush3.bf16.msra.mxu0 %v3679_v2 }
 0x129   : > { %2807 = vmatprep.subr.bf16.mxu0 %v3367_v6 }
 0x12a   : > { %1175 = vrot.lane.b32.xlu1 %v3652_v39, %s3369_s16 }
 0x12c   : > { %2808 = vmatpush3.bf16.msra.mxu0 %v3684_v5 }
 0x12d   : > { %2809 = vmatprep.subr.bf16.mxu0 %v3367_v6 }
 0x12e   : > { %1177 = vrot.lane.b32.xlu1 %v3660_v41, %s3369_s16 }
 0x12f   : > { %2788 = vmatpush3.bf16.xpose.msra.mxu1 %v962_v15 }
 0x130   : > { %2789 = vmatprep.subr.bf16.mxu1 %v3367_v6  ;;  %2810 = vmatpush3.bf16.msra.mxu0 %v3688_v9 }
 0x131   : > { %2811 = vmatprep.subr.bf16.mxu0 %v3367_v6 }
 0x132   : > { %1181 = vrot.lane.b32.xlu1 %v3666_v52, %s3369_s16 }
 0x134   : > { %2812 = vmatpush3.bf16.msra.mxu0 %v3692_v10 }
 0x135   : > { %2817 = vmatprep.subr.bf16.mxu0 %v3367_v6 }
 0x136   : > { %1189 = vrot.lane.b32.xlu1 %v3692_v10, %s3369_s16 }
 0x137   : > { %2790 = vmatpush3.bf16.xpose.msra.mxu1 %v965_v16 }
 0x138   : > { %2791 = vmatprep.subr.bf16.mxu1 %v3367_v6 }
 0x13f   : > { %2792 = vmatpush3.bf16.xpose.msra.mxu1 %v968_v17 }
 0x140   : > { %2837 = vmatprep.subr.bf16.mxu1 %v3367_v6 }
 0x146   : > { %2794 = vmatmul.mubr.msk.bf16.vlgmr.msra.gmra.mrb[20].mxu1 %vm942_vm2, %v3627_v13 }
 0x147   : > { %2853 = vmatprep.mubr.msk.bf16.mxu1 %vm3368_vm1, %v3367_v6 }
 0x178   : > { %v1074_v11 = vpop.permute.xlu1 %1073 }
 0x179   : > { %v1093_v42 = vsel %vm942_vm2, %v1074_v11, 0 }
 0x17c   : > { %v1076_v14 = vpop.permute.xlu1 %1075 }
 0x17d   : > { %v1096_v43 = vsel %vm942_vm2, %v1076_v14, 0 }
 0x180   : > { %v1080_v15 = vpop.permute.xlu1 %1079 }
 0x181   : > { %v1102_v46 = vsel %vm942_vm2, %v1080_v15, 0 }
 0x188   : > { %v1082_v16 = vpop.permute.xlu1 %1081 }
 0x189   : > { %v1105_v47 = vsel %vm942_vm2, %v1082_v16, 0 }
 0x18c   : > { %v1084_v17 = vpop.permute.xlu1 %1083 }
 0x18d   : > { %v1108_v49 = vsel %vm942_vm2, %v1084_v17, 0 }
 0x190   : > { %v1086_v18 = vpop.permute.xlu1 %1085 }
 0x191   : > { %v1111_v50 = vsel %vm942_vm2, %v1086_v18, 0 }
 0x194   : > { %v1088_v19 = vpop.permute.xlu1 %1087 }
 0x195   : > { %v1114_v51 = vsel %vm942_vm2, %v1088_v19, 0 }
 0x198   : > { %v1064_v20 = vpop.permute.xlu1 %1063 }
 0x19c   : > { %v1176_v21 = vpop.permute.xlu1 %1175 }
 0x19d   : > { %2838 = vmatpush3.bf16.msra.mxu1 %v1176_v21 }
 0x19e   : > { %2839 = vmatprep.subr.bf16.mxu1 %v3367_v6 }
 0x1a0   : > { %v1178_v22 = vpop.permute.xlu1 %1177 }
 0x1a1   : > { %2840 = vmatpush3.bf16.msra.mxu1 %v1178_v22 }
 0x1a2   : > { %2841 = vmatprep.subr.bf16.mxu1 %v3367_v6 }
 0x1a4   : > { %v1182_v16 = vpop.permute.xlu1 %1181 }
 0x1a8   : > { %v1190_v22 = vpop.permute.xlu1 %1189 }
 0x219   : > { %v1004_v27 = vpop.f32.mrb[20].mxu1 }
 0x21a   : > { %v1005_v28 = vadd.f32 %v1004_v27, %v3700_v26  ;;  %v2795_v29 = vpop.f32.mrb[21].mxu1 }
 0x21b   : > { %v1007_v30 = vpop.f32.mrb[22].mxu1 }
 0x21c   : > { %1010 = vmax.xlane.f32.xlu0 %v1005_v28  ;;  %v2796_v31 = vpop.f32.mrb[23].mxu1 }
 0x2a9   : > { %v1011_v32 = vpop.xlane.xlu0 %1010 }
 0x2aa   : > { %v1012_v33 = vsub.f32 %v1005_v28, %v1011_v32 }
 0x2ac   : > { %v1013_v34 = vmul.f32 1.442695, %v1012_v33 }
 0x2ae   : > { %3202 = vpow2.f32 %v1013_v34 }
 0x2b8   : > { %v3203_v35 = vpop.eup %3202 }
 0x2b9   : > { %1015 = vadd.xlane.f32.xlu0 %v3203_v35 }
 0x2cf   : > { %1077 = vrot.lane.b32.xlu0 %v3600_v3, %s3369_s16 }
 0x346   : > { %v1016_v36 = vpop.xlane.xlu0 %1015 }
 0x347   : > { %3204 = vrcp.f32 %v1016_v36 }
 0x34a   : > { %v1078_v44 = vpop.permute.xlu0 %1077 }
 0x34b   : > { %v1099_v45 = vsel %vm942_vm2, %v1078_v44, 0 }
 0x351   : > { %v3205_v37 = vpop.eup %3204 }
 0x352   : > { %v3705_v38 = vmul.f32 %v3205_v37, %v3203_v35 }
 0x354   : > { %v1020_v40 = vpack.c.bf16 %v3705_v38, %v3705_v38 }
 0x356   : > { %2814 = vmatmul.mubr.bf16.vlgmr.msra.gmra.mrb[16].mxu0 %v1020_v40 }
 0x357   : > { %2818 = vmatpush3.bf16.xpose.msra.mxu0 %v1093_v42  ;;  %2833 = vmatprep.mubr.msk.bf16.mxu0 %vm3368_vm1, %v3367_v6 }
 0x358   : > { %2819 = vmatprep.subr.bf16.mxu0 %v3367_v6 }
 0x35f   : > { %2820 = vmatpush3.bf16.xpose.msra.mxu0 %v1096_v43 }
 0x360   : > { %2821 = vmatprep.subr.bf16.mxu0 %v3367_v6 }
 0x367   : > { %2822 = vmatpush3.bf16.xpose.msra.mxu0 %v1099_v45 }
 0x368   : > { %2823 = vmatprep.subr.bf16.mxu0 %v3367_v6 }
 0x36f   : > { %2824 = vmatpush3.bf16.xpose.msra.mxu0 %v1102_v46 }
 0x370   : > { %2825 = vmatprep.subr.bf16.mxu0 %v3367_v6 }
 0x377   : > { %2826 = vmatpush3.bf16.xpose.msra.mxu0 %v1105_v47 }
 0x378   : > { %2827 = vmatprep.subr.bf16.mxu0 %v3367_v6 }
 0x37f   : > { %2828 = vmatpush3.bf16.xpose.msra.mxu0 %v1108_v49 }
 0x380   : > { %2829 = vmatprep.subr.bf16.mxu0 %v3367_v6 }
 0x387   : > { %2830 = vmatpush3.bf16.xpose.msra.mxu0 %v1111_v50 }
 0x388   : > { %2831 = vmatprep.subr.bf16.mxu0 %v3367_v6 }
 0x38f   : > { %2832 = vmatpush3.bf16.xpose.msra.mxu0 %v1114_v51 }
 0x390   : > { %2877 = vmatprep.subr.bf16.mxu0 %v3367_v6 }
 0x396   : > { %2834 = vmatmul.mubr.msk.bf16.vlgmr.msra.gmra.mrb[20].mxu0 %vm942_vm2, %v1064_v20 }
 0x397   : > { %2893 = vmatprep.mubr.msk.bf16.mxu0 %vm3368_vm1, %v3367_v6 }
 0x429   : > { %v1055_v54 = vpop.f32.mrb[16].mxu0 }
 0x42a   : > { %1061 = vst.msk [vmem:[#allocation4] sm:$0xff] %vm942_vm2, %v1055_v54  ;;  %v2815_v56 = vpop.f32.mrb[17].mxu0 }
 0x42b   : > { %v1058_v57 = vpop.f32.mrb[18].mxu0 }
 0x42c   : > { %v2816_v58 = vpop.f32.mrb[19].mxu0 }
 0x469   : > { %v1150_v59 = vpop.f32.mrb[20].mxu0 }
 0x46a   : > { %v1151_v60 = vadd.f32 %v1150_v59, %v3700_v26  ;;  %v2835_v62 = vpop.f32.mrb[21].mxu0 }
 0x46b   : > { %v1153_v63 = vpop.f32.mrb[22].mxu0 }
 0x46c   : > { %1156 = vmax.xlane.f32.xlu0 %v1151_v60  ;;  %v2836_v0 = vpop.f32.mrb[23].mxu0 }
 0x482   : > { %1179 = vrot.lane.b32.xlu0 %v3669_v53, %s3369_s16 }
 0x486   : > { %1183 = vrot.lane.b32.xlu0 %v3679_v2, %s3369_s16 }
 0x48a   : > { %1185 = vrot.lane.b32.xlu0 %v3684_v5, %s3369_s16 }
 0x48e   : > { %1187 = vrot.lane.b32.xlu0 %v3688_v9, %s3369_s16  ;;  %s3374_s16 = smov 108  }
 0x492   : > { %1247 = vrot.lane.b32.xlu0 %v3579_v48, %s3371_s24 }
 0x496   : > { %1251 = vrot.lane.b32.xlu0 %v3600_v3, %s3371_s24 }
 0x49a   : > { %1255 = vrot.lane.b32.xlu0 %v3602_v4, %s3371_s24 }
 0x49e   : > { %1259 = vrot.lane.b32.xlu0 %v3613_v8, %s3371_s24 }
 0x4a2   : > { %1245 = vrot.lane.b32.xlu0 %v3627_v13, %s3371_s24 }
 0x4a6   : > { %1341 = vrot.lane.b32.xlu0 %v3652_v39, %s3371_s24 }
 0x4aa   : > { %1343 = vrot.lane.b32.xlu0 %v3660_v41, %s3371_s24 }
 0x4ae   : > { %1347 = vrot.lane.b32.xlu0 %v3666_v52, %s3371_s24 }
 0x4f9   : > { %v1157_v1 = vpop.xlane.xlu0 %1156 }
 0x4fa   : > { %v1158_v11 = vsub.f32 %v1151_v60, %v1157_v1 }
 0x4fc   : > { %v1159_v14 = vmul.f32 1.442695, %v1158_v11 }
 0x4fd   : > { %v1180_v15 = vpop.permute.xlu0 %1179 }
 0x4fe   : > { %3206 = vpow2.f32 %v1159_v14  ;;  %2842 = vmatpush3.bf16.msra.mxu1 %v1180_v15 }
 0x4ff   : > { %2843 = vmatprep.subr.bf16.mxu1 %v3367_v6 }
 0x501   : > { %v1184_v17 = vpop.permute.xlu0 %1183 }
 0x502   : > { %2844 = vmatpush3.bf16.msra.mxu1 %v1182_v16 }
 0x503   : > { %2845 = vmatprep.subr.bf16.mxu1 %v3367_v6 }
 0x505   : > { %v1186_v18 = vpop.permute.xlu0 %1185 }
 0x506   : > { %2846 = vmatpush3.bf16.msra.mxu1 %v1184_v17 }
 0x507   : > { %2847 = vmatprep.subr.bf16.mxu1 %v3367_v6 }
 0x508   : > { %v3207_v19 = vpop.eup %3206 }
 0x509   : > { %1161 = vadd.xlane.f32.xlu1 %v3207_v19  ;;  %v1188_v20 = vpop.permute.xlu0 %1187 }
 0x50a   : > { %2848 = vmatpush3.bf16.msra.mxu1 %v1186_v18 }
 0x50b   : > { %2849 = vmatprep.subr.bf16.mxu1 %v3367_v6 }
 0x50d   : > { %v1248_v21 = vpop.permute.xlu0 %1247 }
 0x50e   : > { %2850 = vmatpush3.bf16.msra.mxu1 %v1188_v20  ;;  %v1267_v34 = vsel %vm942_vm2, %v1248_v21, 0 }
 0x50f   : > { %2851 = vmatprep.subr.bf16.mxu1 %v3367_v6 }
 0x511   : > { %v1252_v23 = vpop.permute.xlu0 %1251 }
 0x512   : > { %2852 = vmatpush3.bf16.msra.mxu1 %v1190_v22  ;;  %v1273_v37 = vsel %vm942_vm2, %v1252_v23, 0 }
 0x513   : > { %2857 = vmatprep.subr.bf16.mxu1 %v3367_v6 }
 0x515   : > { %v1256_v24 = vpop.permute.xlu0 %1255 }
 0x516   : > { %v1279_v43 = vsel %vm942_vm2, %v1256_v24, 0 }
 0x519   : > { %v1260_v25 = vpop.permute.xlu0 %1259 }
 0x51a   : > { %1249 = vrot.lane.b32.xlu1 %v3587_v55, %s3371_s24  ;;  %v1285_v46 = vsel %vm942_vm2, %v1260_v25, 0 }
 0x51d   : > { %v1246_v27 = vpop.permute.xlu0 %1245 }
 0x51e   : > { %1253 = vrot.lane.b32.xlu1 %v3591_v61, %s3371_s24 }
 0x521   : > { %v1342_v28 = vpop.permute.xlu0 %1341 }
 0x522   : > { %1257 = vrot.lane.b32.xlu1 %v3608_v7, %s3371_s24  ;;  %2878 = vmatpush3.bf16.msra.mxu0 %v1342_v28 }
 0x523   : > { %2879 = vmatprep.subr.bf16.mxu0 %v3367_v6 }
 0x525   : > { %v1344_v29 = vpop.permute.xlu0 %1343 }
 0x526   : > { %1261 = vrot.lane.b32.xlu1 %v3622_v12, %s3371_s24  ;;  %2880 = vmatpush3.bf16.msra.mxu0 %v1344_v29 }
 0x527   : > { %2881 = vmatprep.subr.bf16.mxu0 %v3367_v6 }
 0x529   : > { %v1348_v14 = vpop.permute.xlu0 %1347 }
 0x596   : > { %v1162_v30 = vpop.xlane.xlu1 %1161 }
 0x597   : > { %3208 = vrcp.f32 %v1162_v30 }
 0x59a   : > { %v1250_v35 = vpop.permute.xlu1 %1249 }
 0x59b   : > { %v1270_v36 = vsel %vm942_vm2, %v1250_v35, 0 }
 0x59e   : > { %v1254_v40 = vpop.permute.xlu1 %1253 }
 0x59f   : > { %v1276_v42 = vsel %vm942_vm2, %v1254_v40, 0 }
 0x5a1   : > { %v3209_v31 = vpop.eup %3208 }
 0x5a2   : > { %v3772_v32 = vmul.f32 %v3209_v31, %v3207_v19  ;;  %v1258_v44 = vpop.permute.xlu1 %1257 }
 0x5a3   : > { %v1282_v45 = vsel %vm942_vm2, %v1258_v44, 0 }
 0x5a4   : > { %v1166_v33 = vpack.c.bf16 %v3772_v32, %v3772_v32  ;;  %v1165_v30 = vadd.f32 %v3772_v32, %v3705_v38 }
 0x5a6   : > { %2854 = vmatmul.mubr.bf16.vlgmr.msra.gmra.mrb[24].mxu1 %v1166_v33  ;;  %v1262_v47 = vpop.permute.xlu1 %1261 }
 0x5a7   : > { %2858 = vmatpush3.bf16.xpose.msra.mxu1 %v1267_v34  ;;  %2873 = vmatprep.mubr.msk.bf16.mxu1 %vm3368_vm1, %v3367_v6  ;;  %v1288_v49 = vsel %vm942_vm2, %v1262_v47, 0 }
 0x5a8   : > { %2859 = vmatprep.subr.bf16.mxu1 %v3367_v6 }
 0x5af   : > { %2860 = vmatpush3.bf16.xpose.msra.mxu1 %v1270_v36 }
 0x5b0   : > { %2861 = vmatprep.subr.bf16.mxu1 %v3367_v6 }
 0x5b7   : > { %2862 = vmatpush3.bf16.xpose.msra.mxu1 %v1273_v37 }
 0x5b8   : > { %2863 = vmatprep.subr.bf16.mxu1 %v3367_v6 }
 0x5bf   : > { %2864 = vmatpush3.bf16.xpose.msra.mxu1 %v1276_v42 }
 0x5c0   : > { %2865 = vmatprep.subr.bf16.mxu1 %v3367_v6 }
 0x5c7   : > { %2866 = vmatpush3.bf16.xpose.msra.mxu1 %v1279_v43 }
 0x5c8   : > { %2867 = vmatprep.subr.bf16.mxu1 %v3367_v6 }
 0x5cf   : > { %2868 = vmatpush3.bf16.xpose.msra.mxu1 %v1282_v45 }
 0x5d0   : > { %2869 = vmatprep.subr.bf16.mxu1 %v3367_v6 }
 0x5d7   : > { %2870 = vmatpush3.bf16.xpose.msra.mxu1 %v1285_v46 }
 0x5d8   : > { %2871 = vmatprep.subr.bf16.mxu1 %v3367_v6 }
 0x5df   : > { %2872 = vmatpush3.bf16.xpose.msra.mxu1 %v1288_v49 }
 0x5e0   : > { %2917 = vmatprep.subr.bf16.mxu1 %v3367_v6 }
 0x5e6   : > { %2874 = vmatmul.mubr.msk.bf16.vlgmr.msra.gmra.mrb[28].mxu1 %vm942_vm2, %v1246_v27 }
 0x5e7   : > { %2933 = vmatprep.mubr.msk.bf16.mxu1 %vm3368_vm1, %v3367_v6 }
 0x679   : > { %v3797_v50 = vpop.f32.mrb[24].mxu1 }
 0x67a   : > { %v2855_v51 = vpop.f32.mrb[25].mxu1 }
 0x67b   : > { %v1236_v54 = vpop.f32.mrb[26].mxu1 }
 0x67c   : > { %v2856_v56 = vpop.f32.mrb[27].mxu1 }
 0x6b9   : > { %v1324_v57 = vpop.f32.mrb[28].mxu1 }
 0x6ba   : > { %v1325_v58 = vadd.f32 %v1324_v57, %v3700_v26  ;;  %v2875_v59 = vpop.f32.mrb[29].mxu1 }
 0x6bb   : > { %v1327_v60 = vpop.f32.mrb[30].mxu1 }
 0x6bc   : > { %1330 = vmax.xlane.f32.xlu1 %v1325_v58  ;;  %v2876_v62 = vpop.f32.mrb[31].mxu1 }
 0x6cd   : > { %1345 = vrot.lane.b32.xlu1 %v3669_v53, %s3371_s24 }
 0x6d1   : > { %1349 = vrot.lane.b32.xlu1 %v3679_v2, %s3371_s24 }
 0x6d5   : > { %1351 = vrot.lane.b32.xlu1 %v3684_v5, %s3371_s24 }
 0x6d9   : > { %1353 = vrot.lane.b32.xlu1 %v3688_v9, %s3371_s24 }
 0x6dd   : > { %1413 = vrot.lane.b32.xlu1 %v3579_v48, %s3372_s14 }
 0x6e1   : > { %1417 = vrot.lane.b32.xlu1 %v3600_v3, %s3372_s14 }
 0x6e5   : > { %1421 = vrot.lane.b32.xlu1 %v3602_v4, %s3372_s14 }
 0x6e9   : > { %1425 = vrot.lane.b32.xlu1 %v3613_v8, %s3372_s14 }
 0x6ed   : > { %1411 = vrot.lane.b32.xlu1 %v3627_v13, %s3372_s14 }
 0x6f1   : > { %1507 = vrot.lane.b32.xlu1 %v3652_v39, %s3372_s14 }
 0x6f5   : > { %1509 = vrot.lane.b32.xlu1 %v3660_v41, %s3372_s14 }
 0x6f9   : > { %1513 = vrot.lane.b32.xlu1 %v3666_v52, %s3372_s14 }
 0x6fd   : > { %1521 = vrot.lane.b32.xlu1 %v3692_v10, %s3372_s14 }
 0x749   : > { %v1331_v63 = vpop.xlane.xlu1 %1330 }
 0x74a   : > { %v1332_v0 = vsub.f32 %v1325_v58, %v1331_v63 }
 0x74c   : > { %v1333_v1 = vmul.f32 1.442695, %v1332_v0 }
 0x74d   : > { %v1346_v11 = vpop.permute.xlu1 %1345 }
 0x74e   : > { %3210 = vpow2.f32 %v1333_v1  ;;  %2882 = vmatpush3.bf16.msra.mxu0 %v1346_v11 }
 0x74f   : > { %2883 = vmatprep.subr.bf16.mxu0 %v3367_v6 }
 0x751   : > { %v1350_v15 = vpop.permute.xlu1 %1349 }
 0x752   : > { %2884 = vmatpush3.bf16.msra.mxu0 %v1348_v14 }
 0x753   : > { %2885 = vmatprep.subr.bf16.mxu0 %v3367_v6 }
 0x755   : > { %v1352_v16 = vpop.permute.xlu1 %1351 }
 0x756   : > { %2886 = vmatpush3.bf16.msra.mxu0 %v1350_v15 }
 0x757   : > { %2887 = vmatprep.subr.bf16.mxu0 %v3367_v6 }
 0x758   : > { %v3211_v17 = vpop.eup %3210 }
 0x759   : > { %1335 = vadd.xlane.f32.xlu0 %v3211_v17  ;;  %v1354_v18 = vpop.permute.xlu1 %1353 }
 0x75a   : > { %2888 = vmatpush3.bf16.msra.mxu0 %v1352_v16 }
 0x75b   : > { %2889 = vmatprep.subr.bf16.mxu0 %v3367_v6 }
 0x75d   : > { %v1414_v19 = vpop.permute.xlu1 %1413 }
 0x75e   : > { %2890 = vmatpush3.bf16.msra.mxu0 %v1354_v18  ;;  %v1433_v35 = vsel %vm942_vm2, %v1414_v19, 0 }
 0x75f   : > { %2891 = vmatprep.subr.bf16.mxu0 %v3367_v6 }
 0x761   : > { %v1418_v20 = vpop.permute.xlu1 %1417 }
 0x762   : > { %v1439_v38 = vsel %vm942_vm2, %v1418_v20, 0 }
 0x765   : > { %v1422_v21 = vpop.permute.xlu1 %1421 }
 0x766   : > { %v1445_v42 = vsel %vm942_vm2, %v1422_v21, 0 }
 0x769   : > { %v1426_v22 = vpop.permute.xlu1 %1425 }
 0x76a   : > { %v1451_v45 = vsel %vm942_vm2, %v1426_v22, 0 }
 0x76d   : > { %v1412_v23 = vpop.permute.xlu1 %1411 }
 0x76f   : > { %1355 = vrot.lane.b32.xlu0 %v3692_v10, %s3371_s24  ;;  %s3379_s24 = smov 20  }
 0x771   : > { %v1508_v24 = vpop.permute.xlu1 %1507 }
 0x772   : > { %2918 = vmatpush3.bf16.msra.mxu1 %v1508_v24 }
 0x773   : > { %1415 = vrot.lane.b32.xlu0 %v3587_v55, %s3372_s14  ;;  %2919 = vmatprep.subr.bf16.mxu1 %v3367_v6 }
 0x775   : > { %v1510_v25 = vpop.permute.xlu1 %1509 }
 0x776   : > { %2920 = vmatpush3.bf16.msra.mxu1 %v1510_v25 }
 0x777   : > { %1419 = vrot.lane.b32.xlu0 %v3591_v61, %s3372_s14  ;;  %2921 = vmatprep.subr.bf16.mxu1 %v3367_v6 }
 0x779   : > { %v1514_v11 = vpop.permute.xlu1 %1513 }
 0x77b   : > { %1423 = vrot.lane.b32.xlu0 %v3608_v7, %s3372_s14 }
 0x77d   : > { %v1522_v19 = vpop.permute.xlu1 %1521 }
 0x77f   : > { %1427 = vrot.lane.b32.xlu0 %v3622_v12, %s3372_s14 }
 0x7e6   : > { %v1336_v27 = vpop.xlane.xlu0 %1335 }
 0x7e7   : > { %3212 = vrcp.f32 %v1336_v27 }
 0x7ea   : > { %v1356_v28 = vpop.permute.xlu0 %1355 }
 0x7eb   : > { %2892 = vmatpush3.bf16.msra.mxu0 %v1356_v28 }
 0x7ec   : > { %2897 = vmatprep.subr.bf16.mxu0 %v3367_v6 }
 0x7ee   : > { %v1416_v36 = vpop.permute.xlu0 %1415 }
 0x7ef   : > { %v1436_v37 = vsel %vm942_vm2, %v1416_v36, 0 }
 0x7f1   : > { %v3213_v29 = vpop.eup %3212 }
 0x7f2   : > { %v1338_v31 = vmul.f32 %v3213_v29, %v3211_v17  ;;  %v1420_v32 = vpop.permute.xlu0 %1419 }
 0x7f3   : > { %v1442_v40 = vsel %vm942_vm2, %v1420_v32, 0 }
 0x7f4   : > { %v3846_v33 = vadd.f32 %v1338_v31, %v1165_v30  ;;  %v1340_v34 = vpack.c.bf16 %v1338_v31, %v1338_v31 }
 0x7f6   : > { %2894 = vmatmul.mubr.bf16.vlgmr.msra.gmra.mrb[24].mxu0 %v1340_v34  ;;  %v1424_v43 = vpop.permute.xlu0 %1423 }
 0x7f7   : > { %2898 = vmatpush3.bf16.xpose.msra.mxu0 %v1433_v35  ;;  %2913 = vmatprep.mubr.msk.bf16.mxu0 %vm3368_vm1, %v3367_v6  ;;  %v1448_v44 = vsel %vm942_vm2, %v1424_v43, 0 }
 0x7f8   : > { %2899 = vmatprep.subr.bf16.mxu0 %v3367_v6 }
 0x7fa   : > { %v1428_v46 = vpop.permute.xlu0 %1427 }
 0x7fb   : > { %v1454_v47 = vsel %vm942_vm2, %v1428_v46, 0 }
 0x7ff   : > { %2900 = vmatpush3.bf16.xpose.msra.mxu0 %v1436_v37 }
 0x800   : > { %2901 = vmatprep.subr.bf16.mxu0 %v3367_v6 }
 0x807   : > { %2902 = vmatpush3.bf16.xpose.msra.mxu0 %v1439_v38 }
 0x808   : > { %2903 = vmatprep.subr.bf16.mxu0 %v3367_v6 }
 0x80f   : > { %2904 = vmatpush3.bf16.xpose.msra.mxu0 %v1442_v40 }
 0x810   : > { %2905 = vmatprep.subr.bf16.mxu0 %v3367_v6 }
 0x817   : > { %2906 = vmatpush3.bf16.xpose.msra.mxu0 %v1445_v42 }
 0x818   : > { %2907 = vmatprep.subr.bf16.mxu0 %v3367_v6 }
 0x81f   : > { %2908 = vmatpush3.bf16.xpose.msra.mxu0 %v1448_v44 }
 0x820   : > { %2909 = vmatprep.subr.bf16.mxu0 %v3367_v6 }
 0x827   : > { %2910 = vmatpush3.bf16.xpose.msra.mxu0 %v1451_v45 }
 0x828   : > { %2911 = vmatprep.subr.bf16.mxu0 %v3367_v6 }
 0x82f   : > { %2912 = vmatpush3.bf16.xpose.msra.mxu0 %v1454_v47 }
 0x830   : > { %2957 = vmatprep.subr.bf16.mxu0 %v3367_v6 }
 0x836   : > { %2914 = vmatmul.mubr.msk.bf16.vlgmr.msra.gmra.mrb[28].mxu0 %vm942_vm2, %v1412_v23 }
 0x837   : > { %2973 = vmatprep.mubr.msk.bf16.mxu0 %vm3368_vm1, %v3367_v6 }
 0x8c9   : > { %v3869_v49 = vpop.f32.mrb[24].mxu0 }
 0x8ca   : > { %v2895_v51 = vpop.f32.mrb[25].mxu0 }
 0x8cb   : > { %v1402_v54 = vpop.f32.mrb[26].mxu0 }
 0x8cc   : > { %v2896_v56 = vpop.f32.mrb[27].mxu0 }
 0x909   : > { %v1490_v57 = vpop.f32.mrb[28].mxu0 }
 0x90a   : > { %v1491_v58 = vadd.f32 %v1490_v57, %v3700_v26  ;;  %v2915_v59 = vpop.f32.mrb[29].mxu0  ;;  %v3947_v57 = vld [vmem:[#allocation2] sm:$0xff] }
 0x90b   : > { %v1493_v60 = vpop.f32.mrb[30].mxu0 }
 0x90c   : > { %1496 = vmax.xlane.f32.xlu0 %v1491_v58  ;;  %v2916_v62 = vpop.f32.mrb[31].mxu0 }
 0x922   : > { %1511 = vrot.lane.b32.xlu0 %v3669_v53, %s3372_s14 }
 0x926   : > { %1515 = vrot.lane.b32.xlu0 %v3679_v2, %s3372_s14 }
 0x92a   : > { %1517 = vrot.lane.b32.xlu0 %v3684_v5, %s3372_s14 }
 0x92e   : > { %1519 = vrot.lane.b32.xlu0 %v3688_v9, %s3372_s14  ;;  %s3380_s14 = smov 8  }
 0x932   : > { %1579 = vrot.lane.b32.xlu0 %v3579_v48, %s3373_s29 }
 0x936   : > { %1583 = vrot.lane.b32.xlu0 %v3600_v3, %s3373_s29 }
 0x93a   : > { %1587 = vrot.lane.b32.xlu0 %v3602_v4, %s3373_s29 }
 0x93e   : > { %1591 = vrot.lane.b32.xlu0 %v3613_v8, %s3373_s29 }
 0x942   : > { %1577 = vrot.lane.b32.xlu0 %v3627_v13, %s3373_s29 }
 0x946   : > { %1673 = vrot.lane.b32.xlu0 %v3652_v39, %s3373_s29 }
 0x94a   : > { %1675 = vrot.lane.b32.xlu0 %v3660_v41, %s3373_s29 }
 0x94e   : > { %1679 = vrot.lane.b32.xlu0 %v3666_v52, %s3373_s29 }
 0x999   : > { %v1497_v48 = vpop.xlane.xlu0 %1496 }
 0x99a   : > { %v1498_v63 = vsub.f32 %v1491_v58, %v1497_v48 }
 0x99c   : > { %v1499_v0 = vmul.f32 1.442695, %v1498_v63 }
 0x99d   : > { %v1512_v1 = vpop.permute.xlu0 %1511 }
 0x99e   : > { %3214 = vpow2.f32 %v1499_v0  ;;  %2922 = vmatpush3.bf16.msra.mxu1 %v1512_v1 }
 0x99f   : > { %2923 = vmatprep.subr.bf16.mxu1 %v3367_v6 }
 0x9a1   : > { %v1516_v14 = vpop.permute.xlu0 %1515 }
 0x9a2   : > { %2924 = vmatpush3.bf16.msra.mxu1 %v1514_v11  ;;  %v3974_v11 = vld [vmem:[#allocation2 + $0x8] sm:$0xff] }
 0x9a3   : > { %2925 = vmatprep.subr.bf16.mxu1 %v3367_v6 }
 0x9a5   : > { %v1518_v15 = vpop.permute.xlu0 %1517 }
 0x9a6   : > { %2926 = vmatpush3.bf16.msra.mxu1 %v1516_v14 }
 0x9a7   : > { %2927 = vmatprep.subr.bf16.mxu1 %v3367_v6 }
 0x9a8   : > { %v3215_v16 = vpop.eup %3214 }
 0x9a9   : > { %1501 = vadd.xlane.f32.xlu1 %v3215_v16  ;;  %v1520_v17 = vpop.permute.xlu0 %1519 }
 0x9aa   : > { %2928 = vmatpush3.bf16.msra.mxu1 %v1518_v15  ;;  %v3979_v15 = vld [vmem:[#allocation2 + $0x18] sm:$0xff] }
 0x9ab   : > { %2929 = vmatprep.subr.bf16.mxu1 %v3367_v6 }
 0x9ad   : > { %v1580_v18 = vpop.permute.xlu0 %1579 }
 0x9ae   : > { %2930 = vmatpush3.bf16.msra.mxu1 %v1520_v17 }
 0x9af   : > { %2931 = vmatprep.subr.bf16.mxu1 %v3367_v6 }
 0x9b1   : > { %v1584_v20 = vpop.permute.xlu0 %1583 }
 0x9b2   : > { %2932 = vmatpush3.bf16.msra.mxu1 %v1522_v19  ;;  %v1605_v31 = vsel %vm942_vm2, %v1584_v20, 0 }
 0x9b3   : > { %2937 = vmatprep.subr.bf16.mxu1 %v3367_v6 }
 0x9b5   : > { %v1588_v21 = vpop.permute.xlu0 %1587 }
 0x9b6   : > { %v1611_v35 = vsel %vm942_vm2, %v1588_v21, 0 }
 0x9b9   : > { %v1592_v22 = vpop.permute.xlu0 %1591 }
 0x9ba   : > { %1581 = vrot.lane.b32.xlu1 %v3587_v55, %s3373_s29  ;;  %v1617_v38 = vsel %vm942_vm2, %v1592_v22, 0 }
 0x9bd   : > { %v1578_v23 = vpop.permute.xlu0 %1577 }
 0x9be   : > { %1585 = vrot.lane.b32.xlu1 %v3591_v61, %s3373_s29 }
 0x9c1   : > { %v1674_v24 = vpop.permute.xlu0 %1673 }
 0x9c2   : > { %1589 = vrot.lane.b32.xlu1 %v3608_v7, %s3373_s29  ;;  %2958 = vmatpush3.bf16.msra.mxu0 %v1674_v24  ;;  %v1599_v7 = vsel %vm942_vm2, %v1580_v18, 0 }
 0x9c3   : > { %2959 = vmatprep.subr.bf16.mxu0 %v3367_v6 }
 0x9c5   : > { %v1676_v25 = vpop.permute.xlu0 %1675 }
 0x9c6   : > { %1593 = vrot.lane.b32.xlu1 %v3622_v12, %s3373_s29  ;;  %2960 = vmatpush3.bf16.msra.mxu0 %v1676_v25 }
 0x9c7   : > { %2961 = vmatprep.subr.bf16.mxu0 %v3367_v6 }
 0xa36   : > { %v1502_v27 = vpop.xlane.xlu1 %1501 }
 0xa37   : > { %3216 = vrcp.f32 %v1502_v27 }
 0xa3a   : > { %v1582_v12 = vpop.permute.xlu1 %1581 }
 0xa3b   : > { %v1602_v30 = vsel %vm942_vm2, %v1582_v12, 0 }
 0xa41   : > { %v3217_v55 = vpop.eup %3216 }
 0xa42   : > { %v1504_v28 = vmul.f32 %v3217_v55, %v3215_v16  ;;  %v3984_v16 = vld [vmem:[#allocation2 + $0x28] sm:$0xff] }
 0xa44   : > { %v3913_v61 = vadd.f32 %v1504_v28, %v3846_v33  ;;  %v1506_v29 = vpack.c.bf16 %v1504_v28, %v1504_v28  ;;  %v1586_v33 = vpop.permute.xlu1 %1585 }
 0xa45   : > { %v1608_v34 = vsel %vm942_vm2, %v1586_v33, 0 }
 0xa46   : > { %2934 = vmatmul.mubr.bf16.vlgmr.msra.gmra.mrb[32].mxu1 %v1506_v29 }
 0xa47   : > { %2938 = vmatpush3.bf16.xpose.msra.mxu1 %v1599_v7  ;;  %2953 = vmatprep.mubr.msk.bf16.mxu1 %vm3368_vm1, %v3367_v6 }
 0xa48   : > { %2939 = vmatprep.subr.bf16.mxu1 %v3367_v6  ;;  %v1590_v36 = vpop.permute.xlu1 %1589 }
 0xa49   : > { %v1614_v37 = vsel %vm942_vm2, %v1590_v36, 0 }
 0xa4c   : > { %v1594_v32 = vpop.permute.xlu1 %1593 }
 0xa4d   : > { %v1620_v40 = vsel %vm942_vm2, %v1594_v32, 0 }
 0xa4f   : > { %2940 = vmatpush3.bf16.xpose.msra.mxu1 %v1602_v30 }
 0xa50   : > { %2941 = vmatprep.subr.bf16.mxu1 %v3367_v6 }
 0xa57   : > { %2942 = vmatpush3.bf16.xpose.msra.mxu1 %v1605_v31 }
 0xa58   : > { %2943 = vmatprep.subr.bf16.mxu1 %v3367_v6 }
 0xa5f   : > { %2944 = vmatpush3.bf16.xpose.msra.mxu1 %v1608_v34 }
 0xa60   : > { %2945 = vmatprep.subr.bf16.mxu1 %v3367_v6 }
 0xa67   : > { %2946 = vmatpush3.bf16.xpose.msra.mxu1 %v1611_v35 }
 0xa68   : > { %2947 = vmatprep.subr.bf16.mxu1 %v3367_v6 }
 0xa6f   : > { %2948 = vmatpush3.bf16.xpose.msra.mxu1 %v1614_v37 }
 0xa70   : > { %2949 = vmatprep.subr.bf16.mxu1 %v3367_v6 }
 0xa77   : > { %2950 = vmatpush3.bf16.xpose.msra.mxu1 %v1617_v38 }
 0xa78   : > { %2951 = vmatprep.subr.bf16.mxu1 %v3367_v6 }
 0xa7f   : > { %2952 = vmatpush3.bf16.xpose.msra.mxu1 %v1620_v40 }
 0xa80   : > { %2997 = vmatprep.subr.bf16.mxu1 %v3367_v6 }
 0xa86   : > { %2954 = vmatmul.mubr.msk.bf16.vlgmr.msra.gmra.mrb[36].mxu1 %vm942_vm2, %v1578_v23 }
 0xa87   : > { %3013 = vmatprep.mubr.msk.bf16.mxu1 %vm3368_vm1, %v3367_v6 }
 0xb19   : > { %v3936_v42 = vpop.f32.mrb[32].mxu1 }
 0xb1a   : > { %v2935_v43 = vpop.f32.mrb[33].mxu1 }
 0xb1b   : > { %v1568_v44 = vpop.f32.mrb[34].mxu1 }
 0xb1c   : > { %v2936_v45 = vpop.f32.mrb[35].mxu1  ;;  %v4020_v44 = vld [vmem:[#allocation3 + $0x10] sm:$0xff] }
 0xb1d   : > { %v4032_v45 = vld [vmem:[#allocation2 + $0x10] sm:$0xff] }
 0xb59   : > { %v1656_v46 = vpop.f32.mrb[36].mxu1 }
 0xb5a   : > { %v1657_v47 = vadd.f32 %v1656_v46, %v3700_v26  ;;  %v2955_v51 = vpop.f32.mrb[37].mxu1  ;;  %v4036_v46 = vld [vmem:[#allocation2 + $0x20] sm:$0xff] }
 0xb5b   : > { %v1659_v54 = vpop.f32.mrb[38].mxu1 }
 0xb5c   : > { %1662 = vmax.xlane.f32.xlu1 %v1657_v47  ;;  %v2956_v56 = vpop.f32.mrb[39].mxu1 }
 0xb6d   : > { %1677 = vrot.lane.b32.xlu1 %v3669_v53, %s3373_s29 }
 0xb71   : > { %1681 = vrot.lane.b32.xlu1 %v3679_v2, %s3373_s29 }
 0xb75   : > { %1683 = vrot.lane.b32.xlu1 %v3684_v5, %s3373_s29 }
 0xb79   : > { %1685 = vrot.lane.b32.xlu1 %v3688_v9, %s3373_s29 }
 0xb7d   : > { %1745 = vrot.lane.b32.xlu1 %v3947_v57, %s3374_s16 }
 0xb81   : > { %1749 = vrot.lane.b32.xlu1 %v3600_v3, %s3374_s16 }
 0xb85   : > { %1753 = vrot.lane.b32.xlu1 %v3602_v4, %s3374_s16 }
 0xb89   : > { %1757 = vrot.lane.b32.xlu1 %v3613_v8, %s3374_s16  ;;  %v1680_v8 = vpop.permute.xlu0 %1679 }
 0xb8d   : > { %1743 = vrot.lane.b32.xlu1 %v3627_v13, %s3374_s16 }
 0xb91   : > { %1839 = vrot.lane.b32.xlu1 %v3652_v39, %s3374_s16 }
 0xb95   : > { %1841 = vrot.lane.b32.xlu1 %v3660_v41, %s3374_s16 }
 0xb99   : > { %1845 = vrot.lane.b32.xlu1 %v3666_v52, %s3374_s16 }
 0xb9d   : > { %1853 = vrot.lane.b32.xlu1 %v3692_v10, %s3374_s16 }
 0xbe9   : > { %v1663_v3 = vpop.xlane.xlu1 %1662 }
 0xbea   : > { %v1664_v4 = vsub.f32 %v1657_v47, %v1663_v3  ;;  %v4054_v47 = vld [vmem:[#allocation3 + $0x18] sm:$0xff] }
 0xbec   : > { %v1665_v53 = vmul.f32 1.442695, %v1664_v4 }
 0xbed   : > { %v1678_v58 = vpop.permute.xlu1 %1677 }
 0xbee   : > { %3218 = vpow2.f32 %v1665_v53  ;;  %2962 = vmatpush3.bf16.msra.mxu0 %v1678_v58 }
 0xbef   : > { %2963 = vmatprep.subr.bf16.mxu0 %v3367_v6 }
 0xbf1   : > { %v1682_v59 = vpop.permute.xlu1 %1681 }
 0xbf2   : > { %2964 = vmatpush3.bf16.msra.mxu0 %v1680_v8 }
 0xbf3   : > { %2965 = vmatprep.subr.bf16.mxu0 %v3367_v6 }
 0xbf5   : > { %v1684_v39 = vpop.permute.xlu1 %1683 }
 0xbf6   : > { %2966 = vmatpush3.bf16.msra.mxu0 %v1682_v59 }
 0xbf7   : > { %2967 = vmatprep.subr.bf16.mxu0 %v3367_v6 }
 0xbf8   : > { %v3219_v41 = vpop.eup %3218 }
 0xbf9   : > { %1667 = vadd.xlane.f32.xlu0 %v3219_v41  ;;  %v1686_v52 = vpop.permute.xlu1 %1685 }
 0xbfa   : > { %2968 = vmatpush3.bf16.msra.mxu0 %v1684_v39 }
 0xbfb   : > { %2969 = vmatprep.subr.bf16.mxu0 %v3367_v6 }
 0xbfd   : > { %v1746_v60 = vpop.permute.xlu1 %1745 }
 0xbfe   : > { %2970 = vmatpush3.bf16.msra.mxu0 %v1686_v52  ;;  %v1765_v23 = vsel %vm942_vm2, %v1746_v60, 0 }
 0xbff   : > { %2971 = vmatprep.subr.bf16.mxu0 %v3367_v6 }
 0xc01   : > { %v1750_v62 = vpop.permute.xlu1 %1749 }
 0xc02   : > { %v1771_v27 = vsel %vm942_vm2, %v1750_v62, 0 }
 0xc05   : > { %v1754_v48 = vpop.permute.xlu1 %1753 }
 0xc09   : > { %v1758_v63 = vpop.permute.xlu1 %1757 }
 0xc0a   : > { %v1783_v12 = vsel %vm942_vm2, %v1758_v63, 0 }
 0xc0d   : > { %v1744_v0 = vpop.permute.xlu1 %1743 }
 0xc0f   : > { %1687 = vrot.lane.b32.xlu0 %v3692_v10, %s3373_s29  ;;  %v3988_v10 = vld [vmem:[#allocation2 + $0x38] sm:$0xff]  ;;  %s3381_s29 = smov 16  }
 0xc11   : > { %v1840_v1 = vpop.permute.xlu1 %1839 }
 0xc12   : > { %2998 = vmatpush3.bf16.msra.mxu1 %v1840_v1 }
 0xc13   : > { %1747 = vrot.lane.b32.xlu0 %v3974_v11, %s3374_s16  ;;  %2999 = vmatprep.subr.bf16.mxu1 %v3367_v6 }
 0xc15   : > { %v1842_v14 = vpop.permute.xlu1 %1841 }
 0xc16   : > { %3000 = vmatpush3.bf16.msra.mxu1 %v1842_v14 }
 0xc17   : > { %1751 = vrot.lane.b32.xlu0 %v3979_v15, %s3374_s16  ;;  %3001 = vmatprep.subr.bf16.mxu1 %v3367_v6 }
 0xc19   : > { %v1846_v4 = vpop.permute.xlu1 %1845 }
 0xc1b   : > { %1755 = vrot.lane.b32.xlu0 %v3984_v16, %s3374_s16 }
 0xc1f   : > { %1759 = vrot.lane.b32.xlu0 %v3988_v10, %s3374_s16 }
 0xc86   : > { %v1668_v17 = vpop.xlane.xlu0 %1667 }
 0xc87   : > { %3220 = vrcp.f32 %v1668_v17 }
 0xc8a   : > { %v1688_v18 = vpop.permute.xlu0 %1687 }
 0xc8b   : > { %2972 = vmatpush3.bf16.msra.mxu0 %v1688_v18 }
 0xc8c   : > { %2977 = vmatprep.subr.bf16.mxu0 %v3367_v6 }
 0xc8e   : > { %v1748_v24 = vpop.permute.xlu0 %1747 }
 0xc8f   : > { %v1768_v25 = vsel %vm942_vm2, %v1748_v24, 0 }
 0xc91   : > { %v3221_v19 = vpop.eup %3220 }
 0xc92   : > { %v1670_v20 = vmul.f32 %v3221_v19, %v3219_v41  ;;  %v1752_v55 = vpop.permute.xlu0 %1751  ;;  %v1854_v41 = vpop.permute.xlu1 %1853 }
 0xc93   : > { %v1774_v28 = vsel %vm942_vm2, %v1752_v55, 0 }
 0xc94   : > { %v3994_v21 = vadd.f32 %v1670_v20, %v3913_v61  ;;  %v1672_v22 = vpack.c.bf16 %v1670_v20, %v1670_v20  ;;  %v1777_v61 = vsel %vm942_vm2, %v1754_v48, 0 }
 0xc96   : > { %2974 = vmatmul.mubr.bf16.vlgmr.msra.gmra.mrb[32].mxu0 %v1672_v22  ;;  %v1756_v29 = vpop.permute.xlu0 %1755 }
 0xc97   : > { %2978 = vmatpush3.bf16.xpose.msra.mxu0 %v1765_v23  ;;  %2993 = vmatprep.mubr.msk.bf16.mxu0 %vm3368_vm1, %v3367_v6  ;;  %v1780_v7 = vsel %vm942_vm2, %v1756_v29, 0 }
 0xc98   : > { %2979 = vmatprep.subr.bf16.mxu0 %v3367_v6 }
 0xc9a   : > { %v1760_v30 = vpop.permute.xlu0 %1759 }
 0xc9b   : > { %v1786_v31 = vsel %vm942_vm2, %v1760_v30, 0 }
 0xc9f   : > { %2980 = vmatpush3.bf16.xpose.msra.mxu0 %v1768_v25 }
 0xca0   : > { %2981 = vmatprep.subr.bf16.mxu0 %v3367_v6 }
 0xca7   : > { %2982 = vmatpush3.bf16.xpose.msra.mxu0 %v1771_v27 }
 0xca8   : > { %2983 = vmatprep.subr.bf16.mxu0 %v3367_v6 }
 0xcaf   : > { %2984 = vmatpush3.bf16.xpose.msra.mxu0 %v1774_v28 }
 0xcb0   : > { %2985 = vmatprep.subr.bf16.mxu0 %v3367_v6 }
 0xcb7   : > { %2986 = vmatpush3.bf16.xpose.msra.mxu0 %v1777_v61 }
 0xcb8   : > { %2987 = vmatprep.subr.bf16.mxu0 %v3367_v6 }
 0xcbf   : > { %2988 = vmatpush3.bf16.xpose.msra.mxu0 %v1780_v7 }
 0xcc0   : > { %2989 = vmatprep.subr.bf16.mxu0 %v3367_v6 }
 0xcc7   : > { %2990 = vmatpush3.bf16.xpose.msra.mxu0 %v1783_v12 }
 0xcc8   : > { %2991 = vmatprep.subr.bf16.mxu0 %v3367_v6 }
 0xccf   : > { %2992 = vmatpush3.bf16.xpose.msra.mxu0 %v1786_v31 }
 0xcd0   : > { %3037 = vmatprep.subr.bf16.mxu0 %v3367_v6 }
 0xcd6   : > { %2994 = vmatmul.mubr.msk.bf16.vlgmr.msra.gmra.mrb[36].mxu0 %vm942_vm2, %v1744_v0 }
 0xcd7   : > { %3053 = vmatprep.mubr.msk.bf16.mxu0 %vm3368_vm1, %v3367_v6 }
 0xd69   : > { %v4017_v33 = vpop.f32.mrb[32].mxu0 }
 0xd6a   : > { %v2975_v34 = vpop.f32.mrb[33].mxu0 }
 0xd6b   : > { %v1734_v35 = vpop.f32.mrb[34].mxu0 }
 0xd6c   : > { %v2976_v36 = vpop.f32.mrb[35].mxu0 }
 0xda9   : > { %v1822_v37 = vpop.f32.mrb[36].mxu0 }
 0xdaa   : > { %v1823_v38 = vadd.f32 %v1822_v37, %v3700_v26  ;;  %v2995_v32 = vpop.f32.mrb[37].mxu0 }
 0xdab   : > { %v1825_v40 = vpop.f32.mrb[38].mxu0 }
 0xdac   : > { %1828 = vmax.xlane.f32.xlu0 %v1823_v38  ;;  %v2996_v43 = vpop.f32.mrb[39].mxu0  ;;  %v4103_v40 = vld [vmem:[#allocation3 + $0x20] sm:$0xff] }
 0xdad   : > { %v3251_v43 = vld [vmem:[#allocation3 + $0x28] sm:$0xff] }
 0xdc2   : > { %1843 = vrot.lane.b32.xlu0 %v4020_v44, %s3374_s16 }
 0xdc6   : > { %1847 = vrot.lane.b32.xlu0 %v3679_v2, %s3374_s16  ;;  %v4040_v2 = vld [vmem:[#allocation2 + $0x30] sm:$0xff] }
 0xdca   : > { %1849 = vrot.lane.b32.xlu0 %v3684_v5, %s3374_s16  ;;  %v4046_v5 = vld [vmem:[#allocation3] sm:$0xff] }
 0xdce   : > { %1851 = vrot.lane.b32.xlu0 %v3688_v9, %s3374_s16  ;;  %v4050_v9 = vld [vmem:[#allocation3 + $0x8] sm:$0xff]  ;;  %s3382_s16 = smov 24  }
 0xdd2   : > { %1911 = vrot.lane.b32.xlu0 %v3947_v57, %s3375_s17 }
 0xdd6   : > { %1915 = vrot.lane.b32.xlu0 %v4032_v45, %s3375_s17 }
 0xdda   : > { %1919 = vrot.lane.b32.xlu0 %v4036_v46, %s3375_s17 }
 0xdde   : > { %1923 = vrot.lane.b32.xlu0 %v4040_v2, %s3375_s17 }
 0xde2   : > { %1909 = vrot.lane.b32.xlu0 %v3627_v13, %s3375_s17 }
 0xde6   : > { %2005 = vrot.lane.b32.xlu0 %v4046_v5, %s3375_s17 }
 0xdea   : > { %2007 = vrot.lane.b32.xlu0 %v4050_v9, %s3375_s17 }
 0xdee   : > { %2011 = vrot.lane.b32.xlu0 %v4054_v47, %s3375_s17 }
 0xe39   : > { %v1829_v51 = vpop.xlane.xlu0 %1828 }
 0xe3a   : > { %v1830_v54 = vsub.f32 %v1823_v38, %v1829_v51  ;;  %v4108_v51 = vld [vmem:[#allocation3 + $0x30] sm:$0xff] }
 0xe3c   : > { %v1831_v56 = vmul.f32 1.442695, %v1830_v54 }
 0xe3d   : > { %v1844_v3 = vpop.permute.xlu0 %1843 }
 0xe3e   : > { %3222 = vpow2.f32 %v1831_v56  ;;  %3002 = vmatpush3.bf16.msra.mxu1 %v1844_v3 }
 0xe3f   : > { %3003 = vmatprep.subr.bf16.mxu1 %v3367_v6 }
 0xe41   : > { %v1848_v53 = vpop.permute.xlu0 %1847 }
 0xe42   : > { %3004 = vmatpush3.bf16.msra.mxu1 %v1846_v4 }
 0xe43   : > { %3005 = vmatprep.subr.bf16.mxu1 %v3367_v6 }
 0xe45   : > { %v1850_v58 = vpop.permute.xlu0 %1849 }
 0xe46   : > { %3006 = vmatpush3.bf16.msra.mxu1 %v1848_v53 }
 0xe47   : > { %3007 = vmatprep.subr.bf16.mxu1 %v3367_v6 }
 0xe48   : > { %v3223_v8 = vpop.eup %3222 }
 0xe49   : > { %1833 = vadd.xlane.f32.xlu1 %v3223_v8  ;;  %v1852_v59 = vpop.permute.xlu0 %1851 }
 0xe4a   : > { %3008 = vmatpush3.bf16.msra.mxu1 %v1850_v58 }
 0xe4b   : > { %3009 = vmatprep.subr.bf16.mxu1 %v3367_v6 }
 0xe4d   : > { %v1912_v39 = vpop.permute.xlu0 %1911 }
 0xe4e   : > { %3010 = vmatpush3.bf16.msra.mxu1 %v1852_v59  ;;  %v1931_v20 = vsel %vm942_vm2, %v1912_v39, 0  ;;  %v4132_v59 = vld [vmem:[#allocation3 + $0x38] sm:$0xff] }
 0xe4f   : > { %3011 = vmatprep.subr.bf16.mxu1 %v3367_v6 }
 0xe51   : > { %v1916_v52 = vpop.permute.xlu0 %1915 }
 0xe52   : > { %3012 = vmatpush3.bf16.msra.mxu1 %v1854_v41  ;;  %v1937_v24 = vsel %vm942_vm2, %v1916_v52, 0 }
 0xe53   : > { %3017 = vmatprep.subr.bf16.mxu1 %v3367_v6 }
 0xe55   : > { %v1920_v60 = vpop.permute.xlu0 %1919 }
 0xe56   : > { %v1943_v27 = vsel %vm942_vm2, %v1920_v60, 0 }
 0xe59   : > { %v1924_v62 = vpop.permute.xlu0 %1923 }
 0xe5a   : > { %1913 = vrot.lane.b32.xlu1 %v3974_v11, %s3375_s17  ;;  %v1949_v61 = vsel %vm942_vm2, %v1924_v62, 0 }
 0xe5d   : > { %v1910_v48 = vpop.permute.xlu0 %1909 }
 0xe5e   : > { %1917 = vrot.lane.b32.xlu1 %v3979_v15, %s3375_s17 }
 0xe61   : > { %v2006_v63 = vpop.permute.xlu0 %2005 }
 0xe62   : > { %1921 = vrot.lane.b32.xlu1 %v3984_v16, %s3375_s17  ;;  %3038 = vmatpush3.bf16.msra.mxu0 %v2006_v63 }
 0xe63   : > { %3039 = vmatprep.subr.bf16.mxu0 %v3367_v6 }
 0xe65   : > { %v2008_v0 = vpop.permute.xlu0 %2007 }
 0xe66   : > { %1925 = vrot.lane.b32.xlu1 %v3988_v10, %s3375_s17  ;;  %3040 = vmatpush3.bf16.msra.mxu0 %v2008_v0 }
 0xe67   : > { %3041 = vmatprep.subr.bf16.mxu0 %v3367_v6 }
 0xed6   : > { %v1834_v1 = vpop.xlane.xlu1 %1833 }
 0xed7   : > { %3224 = vrcp.f32 %v1834_v1 }
 0xeda   : > { %v1914_v22 = vpop.permute.xlu1 %1913 }
 0xedb   : > { %v1934_v23 = vsel %vm942_vm2, %v1914_v22, 0 }
 0xee1   : > { %v3225_v14 = vpop.eup %3224 }
 0xee2   : > { %v1836_v17 = vmul.f32 %v3225_v14, %v3223_v8 }
 0xee4   : > { %v4075_v18 = vadd.f32 %v1836_v17, %v3994_v21  ;;  %v1838_v19 = vpack.c.bf16 %v1836_v17, %v1836_v17  ;;  %v1918_v21 = vpop.permute.xlu1 %1917 }
 0xee5   : > { %v1940_v25 = vsel %vm942_vm2, %v1918_v21, 0 }
 0xee6   : > { %3014 = vmatmul.mubr.bf16.vlgmr.msra.gmra.mrb[40].mxu1 %v1838_v19 }
 0xee7   : > { %3018 = vmatpush3.bf16.xpose.msra.mxu1 %v1931_v20  ;;  %3033 = vmatprep.mubr.msk.bf16.mxu1 %vm3368_vm1, %v3367_v6 }
 0xee8   : > { %3019 = vmatprep.subr.bf16.mxu1 %v3367_v6  ;;  %v1922_v55 = vpop.permute.xlu1 %1921 }
 0xee9   : > { %v1946_v28 = vsel %vm942_vm2, %v1922_v55, 0 }
 0xeec   : > { %v1926_v29 = vpop.permute.xlu1 %1925 }
 0xeed   : > { %v1952_v7 = vsel %vm942_vm2, %v1926_v29, 0 }
 0xeef   : > { %3020 = vmatpush3.bf16.xpose.msra.mxu1 %v1934_v23 }
 0xef0   : > { %3021 = vmatprep.subr.bf16.mxu1 %v3367_v6 }
 0xef7   : > { %3022 = vmatpush3.bf16.xpose.msra.mxu1 %v1937_v24 }
 0xef8   : > { %3023 = vmatprep.subr.bf16.mxu1 %v3367_v6 }
 0xeff   : > { %3024 = vmatpush3.bf16.xpose.msra.mxu1 %v1940_v25 }
 0xf00   : > { %3025 = vmatprep.subr.bf16.mxu1 %v3367_v6 }
 0xf07   : > { %3026 = vmatpush3.bf16.xpose.msra.mxu1 %v1943_v27 }
 0xf08   : > { %3027 = vmatprep.subr.bf16.mxu1 %v3367_v6 }
 0xf0f   : > { %3028 = vmatpush3.bf16.xpose.msra.mxu1 %v1946_v28 }
 0xf10   : > { %3029 = vmatprep.subr.bf16.mxu1 %v3367_v6 }
 0xf17   : > { %3030 = vmatpush3.bf16.xpose.msra.mxu1 %v1949_v61 }
 0xf18   : > { %3031 = vmatprep.subr.bf16.mxu1 %v3367_v6 }
 0xf1f   : > { %3032 = vmatpush3.bf16.xpose.msra.mxu1 %v1952_v7 }
 0xf20   : > { %3077 = vmatprep.subr.bf16.mxu1 %v3367_v6 }
 0xf26   : > { %3034 = vmatmul.mubr.msk.bf16.vlgmr.msra.gmra.mrb[44].mxu1 %vm942_vm2, %v1910_v48 }
 0xf27   : > { %3093 = vmatprep.mubr.msk.bf16.mxu1 %vm3368_vm1, %v3367_v6 }
 0xfb9   : > { %v4098_v12 = vpop.f32.mrb[40].mxu1 }
 0xfba   : > { %v3015_v30 = vpop.f32.mrb[41].mxu1 }
 0xfbb   : > { %v1900_v31 = vpop.f32.mrb[42].mxu1 }
 0xfbc   : > { %v3016_v34 = vpop.f32.mrb[43].mxu1 }
 0xff9   : > { %v1988_v35 = vpop.f32.mrb[44].mxu1 }
 0xffa   : > { %v1989_v36 = vadd.f32 %v1988_v35, %v3700_v26  ;;  %v3035_v37 = vpop.f32.mrb[45].mxu1 }
 0xffb   : > { %v1991_v38 = vpop.f32.mrb[46].mxu1 }
 0xffc   : > { %1994 = vmax.xlane.f32.xlu1 %v1989_v36  ;;  %v3036_v32 = vpop.f32.mrb[47].mxu1 }
0x100d   : > { %2009 = vrot.lane.b32.xlu1 %v4020_v44, %s3375_s17 }
0x1011   : > { %2013 = vrot.lane.b32.xlu1 %v4103_v40, %s3375_s17 }
0x1015   : > { %2015 = vrot.lane.b32.xlu1 %v3251_v43, %s3375_s17 }
0x1019   : > { %2017 = vrot.lane.b32.xlu1 %v4108_v51, %s3375_s17 }
0x101d   : > { %2077 = vrot.lane.b32.xlu1 %v3947_v57, %s3376_s15 }
0x1021   : > { %2081 = vrot.lane.b32.xlu1 %v4032_v45, %s3376_s15 }
0x1025   : > { %2085 = vrot.lane.b32.xlu1 %v4036_v46, %s3376_s15  ;;  %v2012_v46 = vpop.permute.xlu0 %2011 }
0x1029   : > { %2089 = vrot.lane.b32.xlu1 %v4040_v2, %s3376_s15 }
0x102d   : > { %2075 = vrot.lane.b32.xlu1 %v3627_v13, %s3376_s15 }
0x1031   : > { %2171 = vrot.lane.b32.xlu1 %v4046_v5, %s3376_s15 }
0x1035   : > { %2175 = vrot.lane.b32.xlu1 %v4020_v44, %s3376_s15 }
0x1039   : > { %2181 = vrot.lane.b32.xlu1 %v3251_v43, %s3376_s15 }
0x1089   : > { %v1995_v57 = vpop.xlane.xlu1 %1994 }
0x108a   : > { %v1996_v54 = vsub.f32 %v1989_v36, %v1995_v57 }
0x108c   : > { %v1997_v45 = vmul.f32 1.442695, %v1996_v54 }
0x108d   : > { %v2010_v56 = vpop.permute.xlu1 %2009 }
0x108e   : > { %3226 = vpow2.f32 %v1997_v45  ;;  %3042 = vmatpush3.bf16.msra.mxu0 %v2010_v56 }
0x108f   : > { %3043 = vmatprep.subr.bf16.mxu0 %v3367_v6 }
0x1091   : > { %v2014_v2 = vpop.permute.xlu1 %2013 }
0x1092   : > { %3044 = vmatpush3.bf16.msra.mxu0 %v2012_v46  ;;  %v3200_v46 = vld [vmem:[%s4313_s8] sm:$0xff]  }
0x1093   : > { %3045 = vmatprep.subr.bf16.mxu0 %v3367_v6 }
0x1095   : > { %v2016_v13 = vpop.permute.xlu1 %2015 }
0x1096   : > { %3046 = vmatpush3.bf16.msra.mxu0 %v2014_v2  ;;  %v3201_v2 = vld [vmem:[%s4313_s8 + $0x8] sm:$0xff]  }
0x1097   : > { %3047 = vmatprep.subr.bf16.mxu0 %v3367_v6 }
0x1098   : > { %v3227_v44 = vpop.eup %3226 }
0x1099   : > { %1999 = vadd.xlane.f32.xlu0 %v3227_v44  ;;  %v2018_v5 = vpop.permute.xlu1 %2017 }
0x109a   : > { %3048 = vmatpush3.bf16.msra.mxu0 %v2016_v13 }
0x109b   : > { %3049 = vmatprep.subr.bf16.mxu0 %v3367_v6 }
0x109d   : > { %v2078_v3 = vpop.permute.xlu1 %2077 }
0x109e   : > { %3050 = vmatpush3.bf16.msra.mxu0 %v2018_v5 }
0x109f   : > { %3051 = vmatprep.subr.bf16.mxu0 %v3367_v6 }
0x10a1   : > { %v2082_v4 = vpop.permute.xlu1 %2081 }
0x10a2   : > { %v2103_v63 = vsel %vm942_vm2, %v2082_v4, 0 }
0x10a5   : > { %v2086_v53 = vpop.permute.xlu1 %2085 }
0x10a6   : > { %v2109_v14 = vsel %vm942_vm2, %v2086_v53, 0 }
0x10a9   : > { %v2090_v58 = vpop.permute.xlu1 %2089 }
0x10aa   : > { %v2115_v19 = vsel %vm942_vm2, %v2090_v58, 0 }
0x10ad   : > { %v2076_v8 = vpop.permute.xlu1 %2075 }
0x10af   : > { %2019 = vrot.lane.b32.xlu0 %v4132_v59, %s3375_s17  ;;  %s4194_s17 = sand.u32 1, %s3349_s26  }
0x10b1   : > { %v2172_v39 = vpop.permute.xlu1 %2171 }
0x10b2   : > { %3078 = vmatpush3.bf16.msra.mxu1 %v2172_v39 }
0x10b3   : > { %2079 = vrot.lane.b32.xlu0 %v3974_v11, %s3376_s15  ;;  %3079 = vmatprep.subr.bf16.mxu1 %v3367_v6 }
0x10b7   : > { %2083 = vrot.lane.b32.xlu0 %v3979_v15, %s3376_s15  ;;  %v2097_v15 = vsel %vm942_vm2, %v2078_v3, 0 }
0x10bb   : > { %2087 = vrot.lane.b32.xlu0 %v3984_v16, %s3376_s15 }
0x10bf   : > { %2091 = vrot.lane.b32.xlu0 %v3988_v10, %s3376_s15 }
0x1126   : > { %v2000_v41 = vpop.xlane.xlu0 %1999 }
0x1127   : > { %3228 = vrcp.f32 %v2000_v41 }
0x112a   : > { %v2020_v52 = vpop.permute.xlu0 %2019 }
0x112b   : > { %3052 = vmatpush3.bf16.msra.mxu0 %v2020_v52  ;;  %v3254_v52 = vld [vmem:[%s3546_s19] sm:$0xff] }
0x112c   : > { %3057 = vmatprep.subr.bf16.mxu0 %v3367_v6 }
0x112e   : > { %v2080_v16 = vpop.permute.xlu0 %2079 }
0x112f   : > { %v2100_v10 = vsel %vm942_vm2, %v2080_v16, 0 }
0x1131   : > { %v3229_v60 = vpop.eup %3228 }
0x1132   : > { %v2002_v62 = vmul.f32 %v3229_v60, %v3227_v44  ;;  %v2084_v0 = vpop.permute.xlu0 %2083 }
0x1133   : > { %v2106_v1 = vsel %vm942_vm2, %v2084_v0, 0 }
0x1134   : > { %v2004_v11 = vpack.c.bf16 %v2002_v62, %v2002_v62  ;;  %v4147_v48 = vadd.f32 %v2002_v62, %v4075_v18 }
0x1136   : > { %3054 = vmatmul.mubr.bf16.vlgmr.msra.gmra.mrb[40].mxu0 %v2004_v11  ;;  %v2088_v17 = vpop.permute.xlu0 %2087 }
0x1137   : > { %3058 = vmatpush3.bf16.xpose.msra.mxu0 %v2097_v15  ;;  %3073 = vmatprep.mubr.msk.bf16.mxu0 %vm3368_vm1, %v3367_v6  ;;  %v2112_v18 = vsel %vm942_vm2, %v2088_v17, 0 }
0x1138   : > { %3059 = vmatprep.subr.bf16.mxu0 %v3367_v6 }
0x113a   : > { %v2092_v20 = vpop.permute.xlu0 %2091 }
0x113b   : > { %v2118_v22 = vsel %vm942_vm2, %v2092_v20, 0 }
0x113f   : > { %3060 = vmatpush3.bf16.xpose.msra.mxu0 %v2100_v10 }
0x1140   : > { %3061 = vmatprep.subr.bf16.mxu0 %v3367_v6 }
0x1147   : > { %3062 = vmatpush3.bf16.xpose.msra.mxu0 %v2103_v63 }
0x1148   : > { %3063 = vmatprep.subr.bf16.mxu0 %v3367_v6 }
0x114f   : > { %3064 = vmatpush3.bf16.xpose.msra.mxu0 %v2106_v1 }
0x1150   : > { %3065 = vmatprep.subr.bf16.mxu0 %v3367_v6 }
0x1157   : > { %3066 = vmatpush3.bf16.xpose.msra.mxu0 %v2109_v14 }
0x1158   : > { %3067 = vmatprep.subr.bf16.mxu0 %v3367_v6 }
0x115f   : > { %3068 = vmatpush3.bf16.xpose.msra.mxu0 %v2112_v18 }
0x1160   : > { %3069 = vmatprep.subr.bf16.mxu0 %v3367_v6 }
0x1167   : > { %3070 = vmatpush3.bf16.xpose.msra.mxu0 %v2115_v19 }
0x1168   : > { %3071 = vmatprep.subr.bf16.mxu0 %v3367_v6 }
0x116f   : > { %3072 = vmatpush3.bf16.xpose.msra.mxu0 %v2118_v22 }
0x1176   : > { %3074 = vmatmul.mubr.msk.bf16.vlgmr.msra.gmra.mrb[44].mxu0 %vm942_vm2, %v2076_v8  ;;  %v2546_v8 = vld [vmem:[%s4314_s9] ss:$0 sm:$0xff] }
0x1209   : > { %v2063_v23 = vpop.f32.mrb[40].mxu0 }
0x120a   : > { %v3055_v24 = vpop.f32.mrb[41].mxu0 }
0x120b   : > { %v2066_v21 = vpop.f32.mrb[42].mxu0 }
0x120c   : > { %v3056_v25 = vpop.f32.mrb[43].mxu0 }
0x1249   : > { %v2154_v27 = vpop.f32.mrb[44].mxu0 }
0x124a   : > { %v2155_v55 = vadd.f32 %v2154_v27, %v3700_v26  ;;  %v3075_v28 = vpop.f32.mrb[45].mxu0 }
0x124b   : > { %v2157_v61 = vpop.f32.mrb[46].mxu0 }
0x124c   : > { %2160 = vmax.xlane.f32.xlu0 %v2155_v55  ;;  %v3076_v29 = vpop.f32.mrb[47].mxu0 }
0x1262   : > { %2173 = vrot.lane.b32.xlu0 %v4050_v9, %s3376_s15 }
0x1266   : > { %2177 = vrot.lane.b32.xlu0 %v4054_v47, %s3376_s15  ;;  %v2176_v47 = vpop.permute.xlu1 %2175 }
0x126a   : > { %2179 = vrot.lane.b32.xlu0 %v4103_v40, %s3376_s15  ;;  %v2182_v34 = vpop.permute.xlu1 %2181 }
0x126e   : > { %2183 = vrot.lane.b32.xlu0 %v4108_v51, %s3376_s15 }
0x1272   : > { %1240 = vrot.lane.b32.xlu0 %v3797_v50, %s3377_s22 }
0x1276   : > { %1572 = vrot.lane.b32.xlu0 %v3936_v42, %s3378_s23 }
0x127a   : > { %1904 = vrot.lane.b32.xlu0 %v4098_v12, %s3379_s24  ;;  %s2350_s24 = scalar_lea.sflag [#allocation8], %s4194_s17 }
0x12d9   : > { %v2161_v26 = vpop.xlane.xlu0 %2160 }
0x12da   : > { %v2162_v9 = vsub.f32 %v2155_v55, %v2161_v26 }
0x12dc   : > { %v2163_v7 = vmul.f32 1.442695, %v2162_v9 }
0x12dd   : > { %v2174_v30 = vpop.permute.xlu0 %2173 }
0x12de   : > { %3230 = vpow2.f32 %v2163_v7  ;;  %3080 = vmatpush3.bf16.msra.mxu1 %v2174_v30 }
0x12df   : > { %3081 = vmatprep.subr.bf16.mxu1 %v3367_v6 }
0x12e1   : > { %v2178_v31 = vpop.permute.xlu0 %2177 }
0x12e2   : > { %3082 = vmatpush3.bf16.msra.mxu1 %v2176_v47 }
0x12e3   : > { %3083 = vmatprep.subr.bf16.mxu1 %v3367_v6 }
0x12e5   : > { %v2180_v50 = vpop.permute.xlu0 %2179 }
0x12e6   : > { %3084 = vmatpush3.bf16.msra.mxu1 %v2178_v31 }
0x12e7   : > { %3085 = vmatprep.subr.bf16.mxu1 %v3367_v6 }
0x12e8   : > { %v3231_v42 = vpop.eup %3230 }
0x12e9   : > { %2165 = vadd.xlane.f32.xlu1 %v3231_v42  ;;  %v2184_v12 = vpop.permute.xlu0 %2183 }
0x12ea   : > { %3086 = vmatpush3.bf16.msra.mxu1 %v2180_v50 }
0x12eb   : > { %3087 = vmatprep.subr.bf16.mxu1 %v3367_v6 }
0x12ed   : > { %v1241_v35 = vpop.permute.xlu0 %1240 }
0x12ee   : > { %1244 = vst.msk [vmem:[#allocation4] sm:$0xff] %vm1243_vm4, %v1241_v35  ;;  %3088 = vmatpush3.bf16.msra.mxu1 %v2182_v34 }
0x12ef   : > { %3089 = vmatprep.subr.bf16.mxu1 %v3367_v6 }
0x12f1   : > { %v1573_v38 = vpop.permute.xlu0 %1572 }
0x12f2   : > { %3090 = vmatpush3.bf16.msra.mxu1 %v2184_v12 }
0x12f3   : > { %3091 = vmatprep.subr.bf16.mxu1 %v3367_v6 }
0x12f5   : > { %v1905_v43 = vpop.permute.xlu0 %1904 }
0x12fa   : > { %2185 = vrot.lane.b32.xlu1 %v4132_v59, %s3376_s15  ;;  %s4321_s15 = sshll.u32 %s4194_s17, 3 }
0x12fb   : > { %s4199_s22 = scalar_lea.vmem [#allocation7], %s4321_s15 }
0x12fc   : > { %s2378_s19 = sshll.u32 %s4199_s22, 4  ;;  %s2379_s19 = int_to_ptr.vmem [resolvable:$true] %s2378_s19 }
0x12fd   : > { %s3255_s15 = scalar_lea.vmem %s2379_s19, 128  ;;  %p3262_p1 = scmp.lt.s32.totalorder %s2379_s19, %s3260_s1 }
0x12fe   : > { %1406 = vrot.lane.b32.xlu1 %v3869_v49, %s3380_s14  ;;  %s4322_s14 = sshll.u32 %s3357_s28, 7  ;;  %p3256_p12 = scmp.ne.s32.totalorder %s2379_s19, %s3255_s15 }
0x12ff   : > { %s4222_s23 = scalar_lea.hbm %s4318_s13, %s4322_s14  ;;  %p3263_p2 = scmp.lt.s32.totalorder %s3261_s2, %s3255_s15 }
0x1300   : > { %p3257_p13 = pnand %p3256_p12, %p3496_p4 }
0x1301   : > { %p3264_p3 = por %p3263_p2, %p3262_p1 }
0x1302   : > { %1738 = vrot.lane.b32.xlu1 %v4017_v33, %s3381_s29  ;;  %p3258_p0 = pneg %p3257_p13 }
0x1304   : > { %p3265_p5 = pnand %p3264_p3, %p3258_p0 }
0x1306   : > { %2070 = vrot.lane.b32.xlu1 %v2063_v23, %s3382_s16  ;;  %s3383_s16 = smov 28  }
0x1376   : > { %v2166_v36 = vpop.xlane.xlu1 %2165 }
0x1377   : > { %3232 = vrcp.f32 %v2166_v36 }
0x137a   : > { %v2186_v37 = vpop.permute.xlu1 %2185 }
0x137b   : > { %3092 = vmatpush3.bf16.msra.mxu1 %v2186_v37 }
0x137c   : > { %3097 = vmatprep.subr.bf16.mxu1 %v3367_v6 }
0x137e   : > { %v1407_v32 = vpop.permute.xlu1 %1406 }
0x137f   : > { %1410 = vst.msk [vmem:[#allocation4] sm:$0xff] %vm1409_vm5, %v1407_v32 }
0x1380   : > { %1576 = vst.msk [vmem:[#allocation4] sm:$0xff] %vm1575_vm6, %v1573_v38 }
0x1381   : > { %v3233_v49 = vpop.eup %3232 }
0x1382   : > { %v1739_v40 = vpop.permute.xlu1 %1738  ;;  %v2168_v33 = vmul.f32 %v3233_v49, %v3231_v42 }
0x1383   : > { %1742 = vst.msk [vmem:[#allocation4] sm:$0xff] %vm1741_vm7, %v1739_v40 }
0x1384   : > { %1908 = vst.msk [vmem:[#allocation4] sm:$0xff] %vm1907_vm8, %v1905_v43  ;;  %v2170_v51 = vpack.c.bf16 %v2168_v33, %v2168_v33  ;;  %v2169_v57 = vadd.f32 %v2168_v33, %v4147_v48 }
0x1386   : > { %v2071_v54 = vpop.permute.xlu1 %2070  ;;  %3094 = vmatmul.mubr.bf16.vlgmr.msra.gmra.mrb[48].mxu1 %v2170_v51  ;;  %3234 = vlog2.f32 %v2169_v57 }
0x1387   : > { %2074 = vst.msk [vmem:[#allocation4] sm:$0xff] %vm2073_vm9, %v2071_v54  ;;  %3101 = vmatprep.mubr.msk.bf16.mxu1 %vm3368_vm1, %v3367_v6  ;;  %3098 = vmatpush3.bf16.msra.mxu1 %v3200_v46 }
0x1388   : > { %3099 = vmatprep.subr.bf16.mxu1 %v3367_v6 }
0x138b   : > { %3100 = vmatpush3.bf16.msra.mxu1 %v3201_v2 }
0x1390   : > { %v3235_v45 = vpop.eup %3234 }
0x1391   : > { %v2310_v56 = vmul.f32 0.6931472, %v3235_v45 }
0x1393   : > { %2311 = vst [vmem:[%s4199_s22] sm:$0xff] %v2310_v56 }
0x1459   : > { %v2229_v13 = vpop.f32.mrb[48].mxu1 }
0x145a   : > { %2236 = vrot.lane.b32.xlu0 %v2229_v13, %s3383_s16  ;;  %v3095_v44 = vpop.f32.mrb[49].mxu1 }
0x145b   : > { %v2232_v5 = vpop.f32.mrb[50].mxu1 }
0x145c   : > { %v3096_v3 = vpop.f32.mrb[51].mxu1 }
0x14cc   : > { %v2237_v4 = vpop.permute.xlu0 %2236 }
0x14cd   : > { %2240 = vst.msk [vmem:[#allocation4] sm:$0xff] %vm2239_vm10, %v2237_v4 }
0x14d4   : > { %v2241_v53 = vld [vmem:[#allocation4] sm:$0xff] }
0x14d5   : > { %v2242_v58 = vpack.c.bf16 %v2241_v53, %v2241_v53 }
0x14d7   : > { %3102 = vmatmul.mubr.msk.bf16.vlgmr.msra.gmra.mrb[52].mxu1 %vm579_vm0, %v2242_v58 }
0x15aa   : > { %v2303_v6 = vpop.f32.mrb[52].mxu1 }
0x15ab   : > { %v2304_v59 = vadd.f32 %v2546_v8, %v2303_v6  ;;  %v3103_v39 = vpop.f32.mrb[53].mxu1 }
0x15ac   : > { %v2306_v41 = vpop.f32.mrb[54].mxu1 }
0x15ad   : > { %v2312_v60 = vadd.f32 %v3254_v52, %v2304_v59  ;;  %v3104_v62 = vpop.f32.mrb[55].mxu1 }
0x15af   : > { %v2313_v11 = vsel %vm579_vm0, %v2312_v60, 0.0 }
0x15b0   : > { %2314 = vadd.xlane.f32.xlu1 %v2313_v11 }
0x163d   : > { %v2315_v48 = vpop.xlane.xlu1 %2314 }
0x163e   : > { %v2317_v15 = vmul.f32 0.03125, %v2315_v48 }
0x1640   : > { %v2318_v16 = vsub.f32 %v2312_v60, %v2317_v15 }
0x1642   : > { %v2319_v10 = vmul.f32 %v2318_v16, %v2318_v16 }
0x1644   : > { %v2320_v63 = vsel %vm579_vm0, %v2319_v10, 0.0 }
0x1645   : > { %2321 = vadd.xlane.f32.xlu0 %v2320_v63 }
0x1646   : > { %3268 = shalt.err (!%p3265_p5)
}
0x1647   : > { %s3269_s22 = scalar_lea.hbm %s4222_s23, 128  ;;  %s3273_s0 = scalar_lea.hbm %s4318_s13, 256 }
0x1648   : > { %p3270_p6 = scmp.ne.s32.totalorder %s4222_s23, %s3269_s22  ;;  %p3274_p10 = scmp.lt.u32.totalorder %s4222_s23, %s4318_s13 }
0x1649   : > { %p3275_p11 = scmp.lt.u32.totalorder %s3273_s0, %s3269_s22  ;;  %p3277_p13 = scmp.lt.u32.totalorder %s3269_s22, %s4222_s23 }
0x164a   : > { %p3271_p7 = pnand %p3270_p6, %p3496_p4 }
0x164b   : > { %p3276_p12 = por %p3275_p11, %p3274_p10 }
0x164c   : > { %p3272_p9 = pneg %p3271_p7 }
0x164d   : > { %p3278_p0 = por %p3277_p13, %p3276_p12 }
0x164f   : > { %p3279_p1 = pnand %p3278_p0, %p3272_p9 }
0x1651   : > { %3282 = shalt.err (!%p3279_p1)
}
0x1652   : > { %3110 = dma.vmem_to_hbm [thread:$0]  (%p3496_p4), %s2379_s19, 128, %s4222_s23, %s2350_s24   ;;  %v2550_v18 = vld [vmem:[%s4315_s10] ss:$0 sm:$0xff] }
0x1653   : > { %v2551_v20 = vld [vmem:[%s4316_s11] ss:$0 sm:$0xff]  ;;  %s4333_s29 = sshll.u32 %s4194_s17, 3  ;;  %s4334_s23 = sshll.u32 %s3357_s28, 7 }
0x1654   : > { %s474_s16 = scalar_lea.vmem [#allocation5], %s4333_s29  ;;  %s4256_s1 = scalar_lea.hbm %s4317_s12, %s4334_s23 }
0x1655   : > { %s2364_s0 = sshll.u32 %s474_s16, 4  ;;  %s2345_s2 = scalar_lea.sflag [#allocation6], %s4194_s17  ;;  %s4258_s0 = int_to_ptr.vmem [resolvable:$true] %s2364_s0 }
0x1656   : > { %s3283_s15 = scalar_lea.vmem %s4258_s0, 128  ;;  %s3385_s14 = smov [#allocation5]  }
0x1657   : > { %p3284_p2 = scmp.ne.s32.totalorder %s4258_s0, %s3283_s15  ;;  %s3287_s28 = sshll.u32 %s3385_s14, 4  ;;  %s3288_s28 = int_to_ptr.vmem [resolvable:$false] %s3287_s28 }
0x1658   : > { %s3289_s22 = scalar_lea.vmem %s3288_s28, 256  ;;  %p3290_p6 = scmp.lt.s32.totalorder %s4258_s0, %s3288_s28 }
0x1659   : > { %p3285_p3 = pnand %p3284_p2, %p3496_p4  ;;  %p3291_p7 = scmp.lt.s32.totalorder %s3289_s22, %s3283_s15 }
0x165b   : > { %p3286_p5 = pneg %p3285_p3  ;;  %p3292_p9 = por %p3291_p7, %p3290_p6 }
0x165d   : > { %p3293_p10 = pnand %p3292_p9, %p3286_p5 }
0x16d2   : > { %v2322_v0 = vpop.xlane.xlu0 %2321 }
0x16d3   : > { %v2323_v1 = vmul.f32 0.03125, %v2322_v0 }
0x16d5   : > { %v2324_v14 = vadd.f32 1e-05, %v2323_v1 }
0x16d7   : > { %3236 = vrsqrt.f32 %v2324_v14 }
0x16e1   : > { %v3237_v17 = vpop.eup %3236 }
0x16e2   : > { %v2326_v19 = vmul.f32 %v3237_v17, %v2318_v16 }
0x16e4   : > { %v2334_v22 = vmul.f32 %v2550_v18, %v2326_v19 }
0x16e6   : > { %v2342_v23 = vadd.f32 %v2551_v20, %v2334_v22 }
0x16e8   : > { %2343 = vst.msk [vmem:[%s474_s16] sm:$0xff] %vm579_vm0, %v2342_v23 }
0x16e9   : > { %3296 = shalt.err (!%p3293_p10)
}
0x16ea   : > { %s3297_s17 = scalar_lea.hbm %s4256_s1, 128  ;;  %s3301_s23 = scalar_lea.hbm %s4317_s12, 256 }
0x16eb   : > { %p3298_p11 = scmp.ne.s32.totalorder %s4256_s1, %s3297_s17  ;;  %p3302_p0 = scmp.lt.u32.totalorder %s4256_s1, %s4317_s12 }
0x16ec   : > { %p3303_p1 = scmp.lt.u32.totalorder %s3301_s23, %s3297_s17  ;;  %p3305_p3 = scmp.lt.u32.totalorder %s3297_s17, %s4256_s1 }
0x16ed   : > { %p3299_p12 = pnand %p3298_p11, %p3496_p4 }
0x16ee   : > { %p3304_p2 = por %p3303_p1, %p3302_p0 }
0x16ef   : > { %p3300_p13 = pneg %p3299_p12 }
0x16f0   : > { %p3306_p5 = por %p3305_p3, %p3304_p2 }
0x16f2   : > { %p3307_p6 = pnand %p3306_p5, %p3300_p13 }
0x16f4   : > { %3310 = shalt.err (!%p3307_p6)
}
0x16f5   : > { %3109 = dma.vmem_to_hbm [thread:$0]  (%p3496_p4), %s4258_s0, 128, %s4256_s1, %s2345_s2  }
0x16f6 PF: > { %p3120_p7 = scmp.ge.s32.totalorder %s3365_s30, 2  ;;  %s2390_s15 = sand.u32 1, %s3345_s25  }
0x16f7   : > { %s2391_s14 = scalar_lea.sflag [#allocation6], %s2390_s15 }
0x16f8   : > { %p3114_p9 = pnand %p3120_p7, %p3503_p8 }
0x16fa   : > { %3336 = dma.done.wait (!%p3114_p9), %s2391_s14, 128  }
0x16fb   : > { %3338 = vsyncadd (!%p3114_p9), %s2391_s14, 4294967168  ;;  %s2400_s28 = scalar_lea.sflag [#allocation8], %s2390_s15 }
0x16fc   : > { %3340 = dma.done.wait (!%p3114_p9), %s2400_s28, 128  }
0x16fd   : > { %3342 = vsyncadd (!%p3114_p9), %s2400_s28, 4294967168  ;;  %s30_s30 = sadd.s32 1, %s3365_s30   ;;  %s4335_s28 = sld [smem:[#allocation11_spill]] }
0x16fe   : > { %p27_p10 = scmp.ge.s32.totalorder %s30_s30, 4   ;;  %s4336_s29 = sld [smem:[#allocation12_spill]] }
0x16ff   : > { %s4337_s25 = smov %s3349_s26  ;;  %s4338_s26 = smov %s3353_s27 }
0x1700   : > { %s4339_s27 = smov %s3509_s21  ;;  %29 = sbr.rel (!%p27_p10) target bundleno = 10 (0xa), region = 127 }
0x1707   :  { %2405 = vsyncpa [#allocation6], 1 }
0x1708   :  { %2407 = vsyncpa [#allocation6 + $0x1], 1 }
0x1709   :  { %2408 = vsyncpa [#allocation8], 1 }
0x170a   :  { %2410 = vsyncpa [#allocation8 + $0x1], 1 }

// kernel: tpu_custom_call.1
= control target key start
LH: loop header
LB: loop body
LE: loop exit
PB: predicated region body
PF: predicated region fallthrough
CT: control target
= control target key end

     0   :  { %s4305_s0 = inlined_call_operand.vmem [shape: f32[2,8,32], index: 0, kind: input, shape index: {}]   ;;  %s4306_s1 = inlined_call_operand.vmem [shape: bf16[2,128,32], index: 1, kind: input, shape index: {}]   ;;  %s4307_s2 = inlined_call_operand.vmem [shape: bf16[32,32], index: 2, kind: input, shape index: {}]   ;;  %s4308_s3 = inlined_call_operand.vmem [shape: bf16[32,32], index: 3, kind: input, shape index: {}]   ;;  %s4309_s4 = inlined_call_operand.vmem [shape: bf16[32,32], index: 4, kind: input, shape index: {}]   ;;  %s4310_s5 = inlined_call_operand.vmem [shape: f32[1,32], index: 5, kind: input, shape index: {}]   ;;  %s4311_s6 = inlined_call_operand.vmem [shape: f32[1,32], index: 6, kind: input, shape index: {}]   ;;  %s4312_s7 = inlined_call_operand.vmem [shape: f32[1,32], index: 7, kind: input, shape index: {}]   ;;  %s4313_s8 = inlined_call_operand.vmem [shape: bf16[32,32], index: 8, kind: input, shape index: {}]   ;;  %s4314_s9 = inlined_call_operand.vmem [shape: f32[1,32], index: 9, kind: input, shape index: {}]   ;;  %s4315_s10 = inlined_call_operand.vmem [shape: f32[1,32], index: 10, kind: input, shape index: {}]   ;;  %s4316_s11 = inlined_call_operand.vmem [shape: f32[1,32], index: 11, kind: input, shape index: {}]   ;;  %s4317_s12 = inlined_call_operand.hbm [shape: f32[2,8,32], index: 12, kind: output, shape index: {0}]   ;;  %s4318_s13 = inlined_call_operand.hbm [shape: f32[2,8,128], index: 13, kind: output, shape index: {1}]  }
   0x1   :  { %4323 = sst [smem:[#allocation13_spill]] %s4305_s0 }
   0x2   :  { %4324 = sst [smem:[#allocation14_spill]] %s4306_s1 }
   0x3   :  { %4325 = sst [smem:[#allocation15_spill]] %s4307_s2 }
   0x4   :  { %19 = vsyncpa [#allocation6], 0 }
   0x5   :  { %21 = vsyncpa [#allocation6 + $0x1], 0 }
   0x6   :  { %22 = vsyncpa [#allocation8], 0 }
   0x7   :  { %24 = vsyncpa [#allocation8 + $0x1], 0  ;;  %s3456_s25 = smov 0   ;;  %s3458_s26 = smov 0  }
   0x8   :  { %s3460_s27 = smov 0   ;;  %s3462_s28 = smov 0  }
   0x9   :  { %s3464_s29 = smov 0   ;;  %s3466_s30 = smov 0  }
   0xa LB: > { %4326 = sst [smem:[#allocation11_spill]] %s3361_s29  ;;  %s2494_s14 = sadd.s32 4294967295, %s3365_s30   ;;  %s3365_s30 = sphi %s3466_s30, %s30_s30   ;;  %s3361_s29 = sphi %s3464_s29, %s4336_s29   ;;  %s3357_s28 = sphi %s3462_s28, %s4335_s28   ;;  %s3353_s27 = sphi %s3460_s27, %s4339_s27   ;;  %s3349_s26 = sphi %s3458_s26, %s4338_s26   ;;  %s3345_s25 = sphi %s3456_s25, %s4337_s25  }
   0xb   : > { %s2495_s15 = sadd.s32 4294967294, %s3365_s30   ;;  %s42_s16 = sadd.s32 1, %s3361_s29 }
   0xc   : > { %s315_s17 = sadd.s32 1, %s3353_s27  ;;  %p44_p0 = scmp.ge.s32.totalorder %s42_s16, 2 }
   0xd   : > { %p325_p1 = scmp.ne.s32.totalorder %s3353_s27, %s3349_s26  ;;  %p326_p2 = scmp.eq.s32.totalorder %s2494_s14, 1 }
   0xe   : > { %p331_p3 = scmp.ne.s32.totalorder %s3349_s26, %s3345_s25  ;;  %s4341_s16 = smov (%p44_p0, %s42_s16), 0 }
   0xf   : > { %4327 = sst [smem:[#allocation12_spill]] %s4341_s16  ;;  %p3496_p4 = por %p326_p2, %p325_p1 }
  0x10   : > { %p332_p5 = scmp.eq.s32.totalorder %s2495_s15, 1  ;;  %s310_s19 = ssub.s32 %s3361_s29, %s4341_s16 }
  0x11   : > { %p2498_p6 = scmp.ge.s32.totalorder %s3365_s30, 1  ;;  %p313_p7 = scmp.eq.s32.totalorder %s310_s19, 0 }
  0x12   : > { %p3503_p8 = por %p332_p5, %p331_p3  ;;  %p426_p9 = scmp.lt.s32.totalorder %s3365_s30, 3 }
  0x13   : > { %s3509_s21 = scalar_select %p313_p7, %s3353_s27, %s315_s17  }
  0x14   : > { %p427_p10 = pnand %p2498_p6, %p426_p9 }
  0x15   : > { %v3186_v0 = vld [vmem:[%s4308_s3] sm:$0xff] (!%p427_p10)   ;;  %p482_p11 = scmp.lt.s32.totalorder (!%p427_p10), %s3357_s28, 1  ;;  %v3187_v1 = vld [vmem:[%s4308_s3 + $0x8] sm:$0xff] (!%p427_p10)   ;;  %vm579_vm0 = vcmask (!%p427_p10), 261120   ;;  %s4330_s1 = sld [smem:[#allocation14_spill]] (!%p427_p10)  ;;  %v3367_v6 = vmov (!%p427_p10), 0.0  }
  0x16   : > { %430 = sbr.rel (%p427_p10) target bundleno = 5878 (0x16f6), region = 68  ;;  %2729 = vmatprep.subr.bf16.mxu0 (!%p427_p10), %v3186_v0  ;;  %3105 = vmatprep.subr.bf16.mxu1 (!%p427_p10), %v3186_v0  ;;  %s4331_s2 = sld [smem:[#allocation15_spill]] (!%p427_p10)  ;;  %vm3368_vm1 = vmmov (!%p427_p10), 0   ;;  %v3198_v15 = vld [vmem:[%s4309_s4] sm:$0xff] (!%p427_p10)   ;;  %v3199_v16 = vld [vmem:[%s4309_s4 + $0x8] sm:$0xff] (!%p427_p10)   ;;  %vm942_vm2 = vcmask (!%p427_p10), 31744  }
  0x17   : > { %2730 = vmatpush3.bf16.msra.mxu0 (!%p427_p10), %v3186_v0  ;;  %3107 = vmatpush3.bf16.msra.mxu1 (!%p427_p10), %v3186_v0  ;;  %s4332_s0 = sld [smem:[#allocation13_spill]] (!%p427_p10)  ;;  %v2504_v18 = vld [vmem:[%s4311_s6] ss:$0 sm:$0xff] (!%p427_p10)  ;;  %s3369_s16 = smov (!%p427_p10), 124   ;;  %vm1243_vm4 = vcmask (!%p427_p10), 64544   ;;  %vm1409_vm5 = vcmask (!%p427_p10), 97344  }
  0x18   : > { %2731 = vmatprep.subr.bf16.mxu0 (!%p427_p10), %v3187_v1  ;;  %3106 = vmatprep.subr.bf16.mxu1 (!%p427_p10), %v3187_v1  ;;  %s3371_s24 = smov (!%p427_p10), 120   ;;  %s3372_s14 = smov (!%p427_p10), 116   ;;  %vm1575_vm6 = vcmask (!%p427_p10), 130144   ;;  %vm1741_vm7 = vcmask (!%p427_p10), 162944   ;;  %vm1907_vm8 = vcmask (!%p427_p10), 195744   ;;  %vm2073_vm9 = vcmask (!%p427_p10), 228544  }
  0x19   : > { %s3377_s22 = smov (!%p427_p10), 4   ;;  %vm2239_vm10 = vcmask (!%p427_p10), 261344  }
  0x1b   : > { %2732 = vmatpush3.bf16.msra.mxu0 (!%p427_p10), %v3187_v1  ;;  %3108 = vmatpush3.bf16.msra.mxu1 (!%p427_p10), %v3187_v1 }
  0x1c   : > { %v3196_v2 = vld [vmem:[%s4331_s2] sm:$0xff] (!%p427_p10)   ;;  %2769 = vmatprep.subr.bf16.mxu0 (!%p427_p10), %v3367_v6  ;;  %v3197_v7 = vld [vmem:[%s4331_s2 + $0x8] sm:$0xff] (!%p427_p10)   ;;  %2749 = vmatprep.subr.bf16.mxu1 (!%p427_p10), %v3198_v15 }
  0x1d   : > { %s3519_s15 = scalar_select %p482_p11, %s3357_s28, 1 }
  0x1f   : > { %s2558_s17 = sshll.u32 %s3519_s15, 6  ;;  %s2501_s29 = sshll.u32 %s3519_s15, 3 }
  0x20   : > { %s493_s23 = scalar_lea.vmem %s4330_s1, %s2558_s17  ;;  %s3546_s19 = scalar_lea.vmem %s4332_s0, %s2501_s29 }
  0x21   : > { %v3188_v3 = vld [vmem:[%s493_s23] sm:$0xff]   ;;  %v3189_v4 = vld [vmem:[%s493_s23 + $0x8] sm:$0xff]   ;;  %v3190_v5 = vld [vmem:[%s493_s23 + $0x10] sm:$0xff]   ;;  %s3373_s29 = smov 112   ;;  %s3375_s17 = smov 104  }
  0x22   : > { %2733 = vmatprep.mubr.msk.bf16.mxu0 %vm579_vm0, %v3188_v3  ;;  %v3194_v8 = vld [vmem:[%s493_s23 + $0x30] sm:$0xff]   ;;  %v3195_v9 = vld [vmem:[%s493_s23 + $0x38] sm:$0xff]   ;;  %v3192_v11 = vld [vmem:[%s493_s23 + $0x20] sm:$0xff]   ;;  %s3376_s15 = smov 100   ;;  %s3384_s0 = smov [#allocation7]  }
  0x23   : > { %2734 = vmatmul.mubr.msk.bf16.vlgmr.msra.gmra.mrb[0].mxu0 %vm579_vm0, %v3189_v4  ;;  %v3191_v10 = vld [vmem:[%s493_s23 + $0x18] sm:$0xff]   ;;  %2745 = vmatprep.mubr.msk.bf16.mxu1 %vm579_vm0, %v3194_v8  ;;  %v3193_v12 = vld [vmem:[%s493_s23 + $0x28] sm:$0xff]   ;;  %v495_v13 = vld [vmem:[%s3546_s19] sm:$0xff]  ;;  %s3378_s23 = smov 12   ;;  %s3259_s1 = sshll.u32 %s3384_s0, 4  ;;  %s3260_s1 = int_to_ptr.vmem [resolvable:$false] %s3259_s1 }
  0x24   : > { %2737 = vmatprep.mubr.msk.bf16.mxu0 %vm579_vm0, %v3190_v5  ;;  %2770 = vmatpush3.bf16.msra.mxu0 %v3196_v2  ;;  %v853_v14 = vpack.c.bf16 %v495_v13, %v495_v13  ;;  %s3261_s2 = scalar_lea.vmem %s3260_s1, 256 }
  0x25   : > { %2771 = vmatprep.subr.bf16.mxu0 %v3367_v6  ;;  %2746 = vmatmul.mubr.msk.bf16.vlgmr.msra.gmra.mrb[0].mxu1 %vm579_vm0, %v3195_v9 }
  0x26   : > { %2753 = vmatprep.mubr.msk.bf16.mxu1 %vm579_vm0, %v3188_v3  ;;  %2750 = vmatpush3.bf16.msra.mxu1 %v3198_v15 }
  0x27   : > { %2751 = vmatprep.subr.bf16.mxu1 %v3199_v16 }
  0x28   : > { %2772 = vmatpush3.bf16.msra.mxu0 %v3197_v7 }
  0x29   : > { %2797 = vmatprep.subr.bf16.mxu0 %v3367_v6 }
  0x2a   : > { %2752 = vmatpush3.bf16.msra.mxu1 %v3199_v16 }
  0x2b   : > { %2738 = vmatmul.mubr.msk.bf16.gmra.mrb[4].mxu0 %vm579_vm0, %v3191_v10  ;;  %2777 = vmatprep.subr.bf16.mxu1 %v3367_v6 }
  0x2c   : > { %2741 = vmatprep.mubr.msk.bf16.mxu0 %vm579_vm0, %v3192_v11 }
  0x2d   : > { %2754 = vmatmul.mubr.msk.bf16.vlgmr.msra.gmra.mrb[4].mxu1 %vm579_vm0, %v3189_v4 }
  0x2e   : > { %2757 = vmatprep.mubr.msk.bf16.mxu1 %vm579_vm0, %v3190_v5 }
  0x33   : > { %2742 = vmatmul.mubr.msk.bf16.gmra.mrb[8].mxu0 %vm579_vm0, %v3193_v12 }
  0x34   : > { %2773 = vmatprep.mubr.msk.bf16.mxu0 %vm3368_vm1, %v3367_v6 }
  0x35   : > { %2758 = vmatmul.mubr.msk.bf16.gmra.mrb[8].mxu1 %vm579_vm0, %v3191_v10 }
  0x36   : > { %2761 = vmatprep.mubr.msk.bf16.mxu1 %vm579_vm0, %v3192_v11 }
  0x3b   : > { %2774 = vmatmul.mubr.msk.bf16.vlgmr.msra.gmra.mrb[12].mxu0 %vm579_vm0, %v853_v14 }
  0x3c   : > { %2813 = vmatprep.mubr.msk.bf16.mxu0 %vm3368_vm1, %v3367_v6 }
  0x3d   : > { %2762 = vmatmul.mubr.msk.bf16.gmra.mrb[12].mxu1 %vm579_vm0, %v3193_v12 }
  0x3e   : > { %2765 = vmatprep.mubr.msk.bf16.mxu1 %vm579_vm0, %v3194_v8 }
  0x45   : > { %2766 = vmatmul.mubr.msk.bf16.gmra.mrb[16].mxu1 %vm579_vm0, %v3195_v9  ;;  %v2534_v9 = vld [vmem:[%s4310_s5] ss:$0 sm:$0xff] }
  0x46   : > { %2793 = vmatprep.mubr.msk.bf16.mxu1 %vm3368_vm1, %v3367_v6 }
  0xf6   : > { %v2735_v17 = vpop.f32.mrb[0].mxu0 }
  0xf7   : > { %v638_v19 = vpop.f32.mrb[1].mxu0  ;;  %v647_v21 = vadd.f32 %v2735_v17, %v2504_v18 }
  0xf8   : > { %v2736_v20 = vpop.f32.mrb[2].mxu0  ;;  %v639_v24 = vadd.f32 %v2504_v18, %v638_v19  ;;  %v2747_v27 = vpop.f32.mrb[0].mxu1 }
  0xf9   : > { %v650_v22 = vadd.f32 %v2736_v20, %v2504_v18  ;;  %v641_v23 = vpop.f32.mrb[3].mxu0  ;;  %v695_v29 = vadd.f32 %v2747_v27, %v2504_v18  ;;  %v686_v30 = vpop.f32.mrb[1].mxu1 }
  0xfa   : > { %v642_v25 = vadd.f32 %v2504_v18, %v641_v23  ;;  %v687_v31 = vadd.f32 %v2504_v18, %v686_v30  ;;  %v2748_v32 = vpop.f32.mrb[2].mxu1 }
  0xfb   : > { %v702_v26 = vpack.c.bf16 %v650_v22, %v647_v21  ;;  %v698_v34 = vadd.f32 %v2748_v32, %v2504_v18  ;;  %v689_v35 = vpop.f32.mrb[3].mxu1 }
  0xfc   : > { %v701_v28 = vpack.c.bf16 %v642_v25, %v639_v24  ;;  %v690_v38 = vadd.f32 %v2504_v18, %v689_v35 }
  0xfd   : > { %710 = vst.msk [vmem:[#allocation2 + $0x8] sm:$0xff] %vm579_vm0, %v702_v26  ;;  %v708_v41 = vpack.c.bf16 %v698_v34, %v695_v29 }
  0xfe   : > { %709 = vst.msk [vmem:[#allocation2] sm:$0xff] %vm579_vm0, %v701_v28  ;;  %v2739_v33 = vpop.f32.mrb[4].mxu0  ;;  %v707_v44 = vpack.c.bf16 %v690_v38, %v687_v31 }
  0xff   : > { %v663_v36 = vadd.f32 %v2739_v33, %v2504_v18  ;;  %v654_v37 = vpop.f32.mrb[5].mxu0  ;;  %716 = vst.msk [vmem:[#allocation2 + $0x38] sm:$0xff] %vm579_vm0, %v708_v41 }
 0x100   : > { %v655_v39 = vadd.f32 %v2504_v18, %v654_v37  ;;  %v2740_v40 = vpop.f32.mrb[6].mxu0  ;;  %715 = vst.msk [vmem:[#allocation2 + $0x30] sm:$0xff] %vm579_vm0, %v707_v44  ;;  %v2755_v19 = vpop.f32.mrb[4].mxu1 }
 0x101   : > { %v666_v42 = vadd.f32 %v2740_v40, %v2504_v18  ;;  %v657_v43 = vpop.f32.mrb[7].mxu0  ;;  %v774_v21 = vpop.f32.mrb[5].mxu1 }
 0x102   : > { %v658_v45 = vadd.f32 %v2504_v18, %v657_v43  ;;  %v2756_v23 = vpop.f32.mrb[6].mxu1 }
 0x103   : > { %v704_v46 = vpack.c.bf16 %v666_v42, %v663_v36  ;;  %v777_v25 = vpop.f32.mrb[7].mxu1 }
 0x104   : > { %v703_v47 = vpack.c.bf16 %v658_v45, %v655_v39  ;;  %v3587_v55 = vld [vmem:[#allocation2 + $0x8] sm:$0xff] }
 0x105   : > { %712 = vst.msk [vmem:[#allocation2 + $0x18] sm:$0xff] %vm579_vm0, %v704_v46  ;;  %v3579_v48 = vld [vmem:[#allocation2] sm:$0xff]  ;;  %v950_v62 = vsel %vm942_vm2, %v3587_v55, 0 }
 0x106   : > { %711 = vst.msk [vmem:[#allocation2 + $0x10] sm:$0xff] %vm579_vm0, %v703_v47  ;;  %1073 = vrot.lane.b32.xlu1 %v3579_v48, %s3369_s16  ;;  %v947_v49 = vsel %vm942_vm2, %v3579_v48, 0  ;;  %v2743_v50 = vpop.f32.mrb[8].mxu0  ;;  %v3622_v12 = vld [vmem:[#allocation2 + $0x38] sm:$0xff] }
 0x107   : > { %2778 = vmatpush3.bf16.xpose.msra.mxu1 %v947_v49  ;;  %v679_v51 = vadd.f32 %v2743_v50, %v2504_v18  ;;  %v670_v52 = vpop.f32.mrb[9].mxu0  ;;  %v3613_v8 = vld [vmem:[#allocation2 + $0x30] sm:$0xff]  ;;  %v968_v17 = vsel %vm942_vm2, %v3622_v12, 0 }
 0x108   : > { %2779 = vmatprep.subr.bf16.mxu1 %v3367_v6  ;;  %v671_v53 = vadd.f32 %v2504_v18, %v670_v52  ;;  %v2744_v54 = vpop.f32.mrb[10].mxu0  ;;  %v965_v16 = vsel %vm942_vm2, %v3613_v8, 0  ;;  %v2759_v29 = vpop.f32.mrb[8].mxu1 }
 0x109   : > { %v682_v56 = vadd.f32 %v2744_v54, %v2504_v18  ;;  %v673_v57 = vpop.f32.mrb[11].mxu0  ;;  %v790_v31 = vpop.f32.mrb[9].mxu1 }
 0x10a   : > { %1075 = vrot.lane.b32.xlu1 %v3587_v55, %s3369_s16  ;;  %v674_v58 = vadd.f32 %v2504_v18, %v673_v57  ;;  %v2523_v18 = vld [vmem:[%s4312_s7] ss:$0 sm:$0xff]  ;;  %v2760_v33 = vpop.f32.mrb[10].mxu1 }
 0x10b   : > { %v706_v59 = vpack.c.bf16 %v682_v56, %v679_v51  ;;  %v783_v20 = vadd.f32 %v2755_v19, %v2523_v18  ;;  %v775_v22 = vadd.f32 %v2523_v18, %v774_v21  ;;  %v786_v24 = vadd.f32 %v2756_v23, %v2523_v18  ;;  %v793_v35 = vpop.f32.mrb[11].mxu1 }
 0x10c   : > { %v705_v60 = vpack.c.bf16 %v674_v58, %v671_v53  ;;  %v3591_v61 = vld [vmem:[#allocation2 + $0x18] sm:$0xff]  ;;  %v778_v26 = vadd.f32 %v2523_v18, %v777_v25  ;;  %v799_v30 = vadd.f32 %v2759_v29, %v2523_v18  ;;  %v791_v32 = vadd.f32 %v2523_v18, %v790_v31 }
 0x10d   : > { %714 = vst.msk [vmem:[#allocation2 + $0x28] sm:$0xff] %vm579_vm0, %v706_v59  ;;  %v3600_v3 = vld [vmem:[#allocation2 + $0x10] sm:$0xff]  ;;  %v956_v10 = vsel %vm942_vm2, %v3591_v61, 0  ;;  %v838_v27 = vpack.c.bf16 %v786_v24, %v783_v20  ;;  %v802_v34 = vadd.f32 %v2760_v33, %v2523_v18  ;;  %v794_v36 = vadd.f32 %v2523_v18, %v793_v35 }
 0x10e   : > { %713 = vst.msk [vmem:[#allocation2 + $0x20] sm:$0xff] %vm579_vm0, %v705_v60  ;;  %1079 = vrot.lane.b32.xlu1 %v3591_v61, %s3369_s16  ;;  %v915_v63 = vpop.f32.mrb[12].mxu0  ;;  %v953_v5 = vsel %vm942_vm2, %v3600_v3, 0  ;;  %v837_v28 = vpack.c.bf16 %v778_v26, %v775_v22  ;;  %v938_v23 = vlaneseq  ;;  %v3370_v25 = vmov -1e+30  }
 0x10f   : > { %2780 = vmatpush3.bf16.xpose.msra.mxu1 %v950_v62  ;;  %v2775_v0 = vpop.f32.mrb[13].mxu0  ;;  %v916_v11 = vadd.f32 %v2534_v9, %v915_v63  ;;  %846 = vst.msk [vmem:[#allocation3 + $0x8] sm:$0xff] %vm579_vm0, %v838_v27  ;;  %v840_v37 = vpack.c.bf16 %v802_v34, %v799_v30  ;;  %v839_v38 = vpack.c.bf16 %v794_v36, %v791_v32 }
 0x110   : > { %2781 = vmatprep.subr.bf16.mxu1 %v3367_v6  ;;  %v918_v1 = vpop.f32.mrb[14].mxu0  ;;  %845 = vst.msk [vmem:[#allocation3] sm:$0xff] %vm579_vm0, %v837_v28  ;;  %v2763_v40 = vpop.f32.mrb[12].mxu1  ;;  %v939_v24 = vand.u32 127, %v938_v23 }
 0x111   : > { %v2776_v2 = vpop.f32.mrb[15].mxu0  ;;  %v3627_v13 = vpack.c.bf16 %v916_v11, %v916_v11  ;;  %848 = vst.msk [vmem:[#allocation3 + $0x18] sm:$0xff] %vm579_vm0, %v840_v37  ;;  %847 = vst.msk [vmem:[#allocation3 + $0x10] sm:$0xff] %vm579_vm0, %v839_v38  ;;  %v815_v42 = vadd.f32 %v2763_v40, %v2523_v18  ;;  %v806_v43 = vpop.f32.mrb[13].mxu1 }
 0x112   : > { %v807_v44 = vadd.f32 %v2523_v18, %v806_v43  ;;  %v2764_v45 = vpop.f32.mrb[14].mxu1  ;;  %vm940_vm3 = vcmp.lt.s32.totalorder %v939_v24, 8 }
 0x113   : > { %v818_v46 = vadd.f32 %v2764_v45, %v2523_v18  ;;  %v809_v47 = vpop.f32.mrb[15].mxu1  ;;  %v3700_v26 = vsel %vm940_vm3, 0.0, %v3370_v25 }
 0x114   : > { %v3608_v7 = vld [vmem:[#allocation2 + $0x28] sm:$0xff]  ;;  %v810_v49 = vadd.f32 %v2523_v18, %v809_v47 }
 0x115   : > { %v3602_v4 = vld [vmem:[#allocation2 + $0x20] sm:$0xff]  ;;  %v962_v15 = vsel %vm942_vm2, %v3608_v7, 0  ;;  %v842_v50 = vpack.c.bf16 %v818_v46, %v815_v42 }
 0x116   : > { %1081 = vrot.lane.b32.xlu1 %v3602_v4, %s3369_s16  ;;  %v959_v14 = vsel %vm942_vm2, %v3602_v4, 0  ;;  %v3660_v41 = vld [vmem:[#allocation3 + $0x8] sm:$0xff]  ;;  %v841_v51 = vpack.c.bf16 %v810_v49, %v807_v44 }
 0x117   : > { %2782 = vmatpush3.bf16.xpose.msra.mxu1 %v953_v5  ;;  %v3652_v39 = vld [vmem:[#allocation3] sm:$0xff]  ;;  %850 = vst.msk [vmem:[#allocation3 + $0x28] sm:$0xff] %vm579_vm0, %v842_v50 }
 0x118   : > { %2783 = vmatprep.subr.bf16.mxu1 %v3367_v6  ;;  %2798 = vmatpush3.bf16.msra.mxu0 %v3652_v39  ;;  %v3666_v52 = vld [vmem:[#allocation3 + $0x18] sm:$0xff]  ;;  %v3669_v53 = vld [vmem:[#allocation3 + $0x10] sm:$0xff]  ;;  %849 = vst.msk [vmem:[#allocation3 + $0x20] sm:$0xff] %vm579_vm0, %v841_v51  ;;  %v2767_v54 = vpop.f32.mrb[16].mxu1 }
 0x119   : > { %2799 = vmatprep.subr.bf16.mxu0 %v3367_v6  ;;  %v831_v56 = vadd.f32 %v2767_v54, %v2523_v18  ;;  %v822_v57 = vpop.f32.mrb[17].mxu1 }
 0x11a   : > { %1083 = vrot.lane.b32.xlu1 %v3608_v7, %s3369_s16  ;;  %v823_v58 = vadd.f32 %v2523_v18, %v822_v57  ;;  %v2768_v59 = vpop.f32.mrb[18].mxu1 }
 0x11b   : > { %v834_v60 = vadd.f32 %v2768_v59, %v2523_v18  ;;  %v825_v62 = vpop.f32.mrb[19].mxu1 }
 0x11c   : > { %2800 = vmatpush3.bf16.msra.mxu0 %v3660_v41  ;;  %v826_v63 = vadd.f32 %v2523_v18, %v825_v62 }
 0x11d   : > { %2801 = vmatprep.subr.bf16.mxu0 %v3367_v6  ;;  %v844_v0 = vpack.c.bf16 %v834_v60, %v831_v56 }
 0x11e   : > { %1085 = vrot.lane.b32.xlu1 %v3613_v8, %s3369_s16  ;;  %v843_v1 = vpack.c.bf16 %v826_v63, %v823_v58  ;;  %v3684_v5 = vld [vmem:[#allocation3 + $0x28] sm:$0xff] }
 0x11f   : > { %2784 = vmatpush3.bf16.xpose.msra.mxu1 %v956_v10  ;;  %852 = vst.msk [vmem:[#allocation3 + $0x38] sm:$0xff] %vm579_vm0, %v844_v0  ;;  %v3679_v2 = vld [vmem:[#allocation3 + $0x20] sm:$0xff] }
 0x120   : > { %2785 = vmatprep.subr.bf16.mxu1 %v3367_v6  ;;  %2802 = vmatpush3.bf16.msra.mxu0 %v3669_v53  ;;  %851 = vst.msk [vmem:[#allocation3 + $0x30] sm:$0xff] %vm579_vm0, %v843_v1 }
 0x121   : > { %2803 = vmatprep.subr.bf16.mxu0 %v3367_v6 }
 0x122   : > { %1087 = vrot.lane.b32.xlu1 %v3622_v12, %s3369_s16 }
 0x124   : > { %2804 = vmatpush3.bf16.msra.mxu0 %v3666_v52 }
 0x125   : > { %2805 = vmatprep.subr.bf16.mxu0 %v3367_v6 }
 0x126   : > { %1063 = vrot.lane.b32.xlu1 %v3627_v13, %s3369_s16  ;;  %v3692_v10 = vld [vmem:[#allocation3 + $0x38] sm:$0xff] }
 0x127   : > { %2786 = vmatpush3.bf16.xpose.msra.mxu1 %v959_v14  ;;  %v3688_v9 = vld [vmem:[#allocation3 + $0x30] sm:$0xff] }
 0x128   : > { %2787 = vmatprep.subr.bf16.mxu1 %v3367_v6  ;;  %2806 = vmatpush3.bf16.msra.mxu0 %v3679_v2 }
 0x129   : > { %2807 = vmatprep.subr.bf16.mxu0 %v3367_v6 }
 0x12a   : > { %1175 = vrot.lane.b32.xlu1 %v3652_v39, %s3369_s16 }
 0x12c   : > { %2808 = vmatpush3.bf16.msra.mxu0 %v3684_v5 }
 0x12d   : > { %2809 = vmatprep.subr.bf16.mxu0 %v3367_v6 }
 0x12e   : > { %1177 = vrot.lane.b32.xlu1 %v3660_v41, %s3369_s16 }
 0x12f   : > { %2788 = vmatpush3.bf16.xpose.msra.mxu1 %v962_v15 }
 0x130   : > { %2789 = vmatprep.subr.bf16.mxu1 %v3367_v6  ;;  %2810 = vmatpush3.bf16.msra.mxu0 %v3688_v9 }
 0x131   : > { %2811 = vmatprep.subr.bf16.mxu0 %v3367_v6 }
 0x132   : > { %1181 = vrot.lane.b32.xlu1 %v3666_v52, %s3369_s16 }
 0x134   : > { %2812 = vmatpush3.bf16.msra.mxu0 %v3692_v10 }
 0x135   : > { %2817 = vmatprep.subr.bf16.mxu0 %v3367_v6 }
 0x136   : > { %1189 = vrot.lane.b32.xlu1 %v3692_v10, %s3369_s16 }
 0x137   : > { %2790 = vmatpush3.bf16.xpose.msra.mxu1 %v965_v16 }
 0x138   : > { %2791 = vmatprep.subr.bf16.mxu1 %v3367_v6 }
 0x13f   : > { %2792 = vmatpush3.bf16.xpose.msra.mxu1 %v968_v17 }
 0x140   : > { %2837 = vmatprep.subr.bf16.mxu1 %v3367_v6 }
 0x146   : > { %2794 = vmatmul.mubr.msk.bf16.vlgmr.msra.gmra.mrb[20].mxu1 %vm942_vm2, %v3627_v13 }
 0x147   : > { %2853 = vmatprep.mubr.msk.bf16.mxu1 %vm3368_vm1, %v3367_v6 }
 0x178   : > { %v1074_v11 = vpop.permute.xlu1 %1073 }
 0x179   : > { %v1093_v42 = vsel %vm942_vm2, %v1074_v11, 0 }
 0x17c   : > { %v1076_v14 = vpop.permute.xlu1 %1075 }
 0x17d   : > { %v1096_v43 = vsel %vm942_vm2, %v1076_v14, 0 }
 0x180   : > { %v1080_v15 = vpop.permute.xlu1 %1079 }
 0x181   : > { %v1102_v46 = vsel %vm942_vm2, %v1080_v15, 0 }
 0x188   : > { %v1082_v16 = vpop.permute.xlu1 %1081 }
 0x189   : > { %v1105_v47 = vsel %vm942_vm2, %v1082_v16, 0 }
 0x18c   : > { %v1084_v17 = vpop.permute.xlu1 %1083 }
 0x18d   : > { %v1108_v49 = vsel %vm942_vm2, %v1084_v17, 0 }
 0x190   : > { %v1086_v18 = vpop.permute.xlu1 %1085 }
 0x191   : > { %v1111_v50 = vsel %vm942_vm2, %v1086_v18, 0 }
 0x194   : > { %v1088_v19 = vpop.permute.xlu1 %1087 }
 0x195   : > { %v1114_v51 = vsel %vm942_vm2, %v1088_v19, 0 }
 0x198   : > { %v1064_v20 = vpop.permute.xlu1 %1063 }
 0x19c   : > { %v1176_v21 = vpop.permute.xlu1 %1175 }
 0x19d   : > { %2838 = vmatpush3.bf16.msra.mxu1 %v1176_v21 }
 0x19e   : > { %2839 = vmatprep.subr.bf16.mxu1 %v3367_v6 }
 0x1a0   : > { %v1178_v22 = vpop.permute.xlu1 %1177 }
 0x1a1   : > { %2840 = vmatpush3.bf16.msra.mxu1 %v1178_v22 }
 0x1a2   : > { %2841 = vmatprep.subr.bf16.mxu1 %v3367_v6 }
 0x1a4   : > { %v1182_v16 = vpop.permute.xlu1 %1181 }
 0x1a8   : > { %v1190_v22 = vpop.permute.xlu1 %1189 }
 0x219   : > { %v1004_v27 = vpop.f32.mrb[20].mxu1 }
 0x21a   : > { %v1005_v28 = vadd.f32 %v1004_v27, %v3700_v26  ;;  %v2795_v29 = vpop.f32.mrb[21].mxu1 }
 0x21b   : > { %v1007_v30 = vpop.f32.mrb[22].mxu1 }
 0x21c   : > { %1010 = vmax.xlane.f32.xlu0 %v1005_v28  ;;  %v2796_v31 = vpop.f32.mrb[23].mxu1 }
 0x2a9   : > { %v1011_v32 = vpop.xlane.xlu0 %1010 }
 0x2aa   : > { %v1012_v33 = vsub.f32 %v1005_v28, %v1011_v32 }
 0x2ac   : > { %v1013_v34 = vmul.f32 1.442695, %v1012_v33 }
 0x2ae   : > { %3202 = vpow2.f32 %v1013_v34 }
 0x2b8   : > { %v3203_v35 = vpop.eup %3202 }
 0x2b9   : > { %1015 = vadd.xlane.f32.xlu0 %v3203_v35 }
 0x2cf   : > { %1077 = vrot.lane.b32.xlu0 %v3600_v3, %s3369_s16 }
 0x346   : > { %v1016_v36 = vpop.xlane.xlu0 %1015 }
 0x347   : > { %3204 = vrcp.f32 %v1016_v36 }
 0x34a   : > { %v1078_v44 = vpop.permute.xlu0 %1077 }
 0x34b   : > { %v1099_v45 = vsel %vm942_vm2, %v1078_v44, 0 }
 0x351   : > { %v3205_v37 = vpop.eup %3204 }
 0x352   : > { %v3705_v38 = vmul.f32 %v3205_v37, %v3203_v35 }
 0x354   : > { %v1020_v40 = vpack.c.bf16 %v3705_v38, %v3705_v38 }
 0x356   : > { %2814 = vmatmul.mubr.bf16.vlgmr.msra.gmra.mrb[16].mxu0 %v1020_v40 }
 0x357   : > { %2818 = vmatpush3.bf16.xpose.msra.mxu0 %v1093_v42  ;;  %2833 = vmatprep.mubr.msk.bf16.mxu0 %vm3368_vm1, %v3367_v6 }
 0x358   : > { %2819 = vmatprep.subr.bf16.mxu0 %v3367_v6 }
 0x35f   : > { %2820 = vmatpush3.bf16.xpose.msra.mxu0 %v1096_v43 }
 0x360   : > { %2821 = vmatprep.subr.bf16.mxu0 %v3367_v6 }
 0x367   : > { %2822 = vmatpush3.bf16.xpose.msra.mxu0 %v1099_v45 }
 0x368   : > { %2823 = vmatprep.subr.bf16.mxu0 %v3367_v6 }
 0x36f   : > { %2824 = vmatpush3.bf16.xpose.msra.mxu0 %v1102_v46 }
 0x370   : > { %2825 = vmatprep.subr.bf16.mxu0 %v3367_v6 }
 0x377   : > { %2826 = vmatpush3.bf16.xpose.msra.mxu0 %v1105_v47 }
 0x378   : > { %2827 = vmatprep.subr.bf16.mxu0 %v3367_v6 }
 0x37f   : > { %2828 = vmatpush3.bf16.xpose.msra.mxu0 %v1108_v49 }
 0x380   : > { %2829 = vmatprep.subr.bf16.mxu0 %v3367_v6 }
 0x387   : > { %2830 = vmatpush3.bf16.xpose.msra.mxu0 %v1111_v50 }
 0x388   : > { %2831 = vmatprep.subr.bf16.mxu0 %v3367_v6 }
 0x38f   : > { %2832 = vmatpush3.bf16.xpose.msra.mxu0 %v1114_v51 }
 0x390   : > { %2877 = vmatprep.subr.bf16.mxu0 %v3367_v6 }
 0x396   : > { %2834 = vmatmul.mubr.msk.bf16.vlgmr.msra.gmra.mrb[20].mxu0 %vm942_vm2, %v1064_v20 }
 0x397   : > { %2893 = vmatprep.mubr.msk.bf16.mxu0 %vm3368_vm1, %v3367_v6 }
 0x429   : > { %v1055_v54 = vpop.f32.mrb[16].mxu0 }
 0x42a   : > { %1061 = vst.msk [vmem:[#allocation4] sm:$0xff] %vm942_vm2, %v1055_v54  ;;  %v2815_v56 = vpop.f32.mrb[17].mxu0 }
 0x42b   : > { %v1058_v57 = vpop.f32.mrb[18].mxu0 }
 0x42c   : > { %v2816_v58 = vpop.f32.mrb[19].mxu0 }
 0x469   : > { %v1150_v59 = vpop.f32.mrb[20].mxu0 }
 0x46a   : > { %v1151_v60 = vadd.f32 %v1150_v59, %v3700_v26  ;;  %v2835_v62 = vpop.f32.mrb[21].mxu0 }
 0x46b   : > { %v1153_v63 = vpop.f32.mrb[22].mxu0 }
 0x46c   : > { %1156 = vmax.xlane.f32.xlu0 %v1151_v60  ;;  %v2836_v0 = vpop.f32.mrb[23].mxu0 }
 0x482   : > { %1179 = vrot.lane.b32.xlu0 %v3669_v53, %s3369_s16 }
 0x486   : > { %1183 = vrot.lane.b32.xlu0 %v3679_v2, %s3369_s16 }
 0x48a   : > { %1185 = vrot.lane.b32.xlu0 %v3684_v5, %s3369_s16 }
 0x48e   : > { %1187 = vrot.lane.b32.xlu0 %v3688_v9, %s3369_s16  ;;  %s3374_s16 = smov 108  }
 0x492   : > { %1247 = vrot.lane.b32.xlu0 %v3579_v48, %s3371_s24 }
 0x496   : > { %1251 = vrot.lane.b32.xlu0 %v3600_v3, %s3371_s24 }
 0x49a   : > { %1255 = vrot.lane.b32.xlu0 %v3602_v4, %s3371_s24 }
 0x49e   : > { %1259 = vrot.lane.b32.xlu0 %v3613_v8, %s3371_s24 }
 0x4a2   : > { %1245 = vrot.lane.b32.xlu0 %v3627_v13, %s3371_s24 }
 0x4a6   : > { %1341 = vrot.lane.b32.xlu0 %v3652_v39, %s3371_s24 }
 0x4aa   : > { %1343 = vrot.lane.b32.xlu0 %v3660_v41, %s3371_s24 }
 0x4ae   : > { %1347 = vrot.lane.b32.xlu0 %v3666_v52, %s3371_s24 }
 0x4f9   : > { %v1157_v1 = vpop.xlane.xlu0 %1156 }
 0x4fa   : > { %v1158_v11 = vsub.f32 %v1151_v60, %v1157_v1 }
 0x4fc   : > { %v1159_v14 = vmul.f32 1.442695, %v1158_v11 }
 0x4fd   : > { %v1180_v15 = vpop.permute.xlu0 %1179 }
 0x4fe   : > { %3206 = vpow2.f32 %v1159_v14  ;;  %2842 = vmatpush3.bf16.msra.mxu1 %v1180_v15 }
 0x4ff   : > { %2843 = vmatprep.subr.bf16.mxu1 %v3367_v6 }
 0x501   : > { %v1184_v17 = vpop.permute.xlu0 %1183 }
 0x502   : > { %2844 = vmatpush3.bf16.msra.mxu1 %v1182_v16 }
 0x503   : > { %2845 = vmatprep.subr.bf16.mxu1 %v3367_v6 }
 0x505   : > { %v1186_v18 = vpop.permute.xlu0 %1185 }
 0x506   : > { %2846 = vmatpush3.bf16.msra.mxu1 %v1184_v17 }
 0x507   : > { %2847 = vmatprep.subr.bf16.mxu1 %v3367_v6 }
 0x508   : > { %v3207_v19 = vpop.eup %3206 }
 0x509   : > { %1161 = vadd.xlane.f32.xlu1 %v3207_v19  ;;  %v1188_v20 = vpop.permute.xlu0 %1187 }
 0x50a   : > { %2848 = vmatpush3.bf16.msra.mxu1 %v1186_v18 }
 0x50b   : > { %2849 = vmatprep.subr.bf16.mxu1 %v3367_v6 }
 0x50d   : > { %v1248_v21 = vpop.permute.xlu0 %1247 }
 0x50e   : > { %2850 = vmatpush3.bf16.msra.mxu1 %v1188_v20  ;;  %v1267_v34 = vsel %vm942_vm2, %v1248_v21, 0 }
 0x50f   : > { %2851 = vmatprep.subr.bf16.mxu1 %v3367_v6 }
 0x511   : > { %v1252_v23 = vpop.permute.xlu0 %1251 }
 0x512   : > { %2852 = vmatpush3.bf16.msra.mxu1 %v1190_v22  ;;  %v1273_v37 = vsel %vm942_vm2, %v1252_v23, 0 }
 0x513   : > { %2857 = vmatprep.subr.bf16.mxu1 %v3367_v6 }
 0x515   : > { %v1256_v24 = vpop.permute.xlu0 %1255 }
 0x516   : > { %v1279_v43 = vsel %vm942_vm2, %v1256_v24, 0 }
 0x519   : > { %v1260_v25 = vpop.permute.xlu0 %1259 }
 0x51a   : > { %1249 = vrot.lane.b32.xlu1 %v3587_v55, %s3371_s24  ;;  %v1285_v46 = vsel %vm942_vm2, %v1260_v25, 0 }
 0x51d   : > { %v1246_v27 = vpop.permute.xlu0 %1245 }
 0x51e   : > { %1253 = vrot.lane.b32.xlu1 %v3591_v61, %s3371_s24 }
 0x521   : > { %v1342_v28 = vpop.permute.xlu0 %1341 }
 0x522   : > { %1257 = vrot.lane.b32.xlu1 %v3608_v7, %s3371_s24  ;;  %2878 = vmatpush3.bf16.msra.mxu0 %v1342_v28 }
 0x523   : > { %2879 = vmatprep.subr.bf16.mxu0 %v3367_v6 }
 0x525   : > { %v1344_v29 = vpop.permute.xlu0 %1343 }
 0x526   : > { %1261 = vrot.lane.b32.xlu1 %v3622_v12, %s3371_s24  ;;  %2880 = vmatpush3.bf16.msra.mxu0 %v1344_v29 }
 0x527   : > { %2881 = vmatprep.subr.bf16.mxu0 %v3367_v6 }
 0x529   : > { %v1348_v14 = vpop.permute.xlu0 %1347 }
 0x596   : > { %v1162_v30 = vpop.xlane.xlu1 %1161 }
 0x597   : > { %3208 = vrcp.f32 %v1162_v30 }
 0x59a   : > { %v1250_v35 = vpop.permute.xlu1 %1249 }
 0x59b   : > { %v1270_v36 = vsel %vm942_vm2, %v1250_v35, 0 }
 0x59e   : > { %v1254_v40 = vpop.permute.xlu1 %1253 }
 0x59f   : > { %v1276_v42 = vsel %vm942_vm2, %v1254_v40, 0 }
 0x5a1   : > { %v3209_v31 = vpop.eup %3208 }
 0x5a2   : > { %v3772_v32 = vmul.f32 %v3209_v31, %v3207_v19  ;;  %v1258_v44 = vpop.permute.xlu1 %1257 }
 0x5a3   : > { %v1282_v45 = vsel %vm942_vm2, %v1258_v44, 0 }
 0x5a4   : > { %v1166_v33 = vpack.c.bf16 %v3772_v32, %v3772_v32  ;;  %v1165_v30 = vadd.f32 %v3772_v32, %v3705_v38 }
 0x5a6   : > { %2854 = vmatmul.mubr.bf16.vlgmr.msra.gmra.mrb[24].mxu1 %v1166_v33  ;;  %v1262_v47 = vpop.permute.xlu1 %1261 }
 0x5a7   : > { %2858 = vmatpush3.bf16.xpose.msra.mxu1 %v1267_v34  ;;  %2873 = vmatprep.mubr.msk.bf16.mxu1 %vm3368_vm1, %v3367_v6  ;;  %v1288_v49 = vsel %vm942_vm2, %v1262_v47, 0 }
 0x5a8   : > { %2859 = vmatprep.subr.bf16.mxu1 %v3367_v6 }
 0x5af   : > { %2860 = vmatpush3.bf16.xpose.msra.mxu1 %v1270_v36 }
 0x5b0   : > { %2861 = vmatprep.subr.bf16.mxu1 %v3367_v6 }
 0x5b7   : > { %2862 = vmatpush3.bf16.xpose.msra.mxu1 %v1273_v37 }
 0x5b8   : > { %2863 = vmatprep.subr.bf16.mxu1 %v3367_v6 }
 0x5bf   : > { %2864 = vmatpush3.bf16.xpose.msra.mxu1 %v1276_v42 }
 0x5c0   : > { %2865 = vmatprep.subr.bf16.mxu1 %v3367_v6 }
 0x5c7   : > { %2866 = vmatpush3.bf16.xpose.msra.mxu1 %v1279_v43 }
 0x5c8   : > { %2867 = vmatprep.subr.bf16.mxu1 %v3367_v6 }
 0x5cf   : > { %2868 = vmatpush3.bf16.xpose.msra.mxu1 %v1282_v45 }
 0x5d0   : > { %2869 = vmatprep.subr.bf16.mxu1 %v3367_v6 }
 0x5d7   : > { %2870 = vmatpush3.bf16.xpose.msra.mxu1 %v1285_v46 }
 0x5d8   : > { %2871 = vmatprep.subr.bf16.mxu1 %v3367_v6 }
 0x5df   : > { %2872 = vmatpush3.bf16.xpose.msra.mxu1 %v1288_v49 }
 0x5e0   : > { %2917 = vmatprep.subr.bf16.mxu1 %v3367_v6 }
 0x5e6   : > { %2874 = vmatmul.mubr.msk.bf16.vlgmr.msra.gmra.mrb[28].mxu1 %vm942_vm2, %v1246_v27 }
 0x5e7   : > { %2933 = vmatprep.mubr.msk.bf16.mxu1 %vm3368_vm1, %v3367_v6 }
 0x679   : > { %v3797_v50 = vpop.f32.mrb[24].mxu1 }
 0x67a   : > { %v2855_v51 = vpop.f32.mrb[25].mxu1 }
 0x67b   : > { %v1236_v54 = vpop.f32.mrb[26].mxu1 }
 0x67c   : > { %v2856_v56 = vpop.f32.mrb[27].mxu1 }
 0x6b9   : > { %v1324_v57 = vpop.f32.mrb[28].mxu1 }
 0x6ba   : > { %v1325_v58 = vadd.f32 %v1324_v57, %v3700_v26  ;;  %v2875_v59 = vpop.f32.mrb[29].mxu1 }
 0x6bb   : > { %v1327_v60 = vpop.f32.mrb[30].mxu1 }
 0x6bc   : > { %1330 = vmax.xlane.f32.xlu1 %v1325_v58  ;;  %v2876_v62 = vpop.f32.mrb[31].mxu1 }
 0x6cd   : > { %1345 = vrot.lane.b32.xlu1 %v3669_v53, %s3371_s24 }
 0x6d1   : > { %1349 = vrot.lane.b32.xlu1 %v3679_v2, %s3371_s24 }
 0x6d5   : > { %1351 = vrot.lane.b32.xlu1 %v3684_v5, %s3371_s24 }
 0x6d9   : > { %1353 = vrot.lane.b32.xlu1 %v3688_v9, %s3371_s24 }
 0x6dd   : > { %1413 = vrot.lane.b32.xlu1 %v3579_v48, %s3372_s14 }
 0x6e1   : > { %1417 = vrot.lane.b32.xlu1 %v3600_v3, %s3372_s14 }
 0x6e5   : > { %1421 = vrot.lane.b32.xlu1 %v3602_v4, %s3372_s14 }
 0x6e9   : > { %1425 = vrot.lane.b32.xlu1 %v3613_v8, %s3372_s14 }
 0x6ed   : > { %1411 = vrot.lane.b32.xlu1 %v3627_v13, %s3372_s14 }
 0x6f1   : > { %1507 = vrot.lane.b32.xlu1 %v3652_v39, %s3372_s14 }
 0x6f5   : > { %1509 = vrot.lane.b32.xlu1 %v3660_v41, %s3372_s14 }
 0x6f9   : > { %1513 = vrot.lane.b32.xlu1 %v3666_v52, %s3372_s14 }
 0x6fd   : > { %1521 = vrot.lane.b32.xlu1 %v3692_v10, %s3372_s14 }
 0x749   : > { %v1331_v63 = vpop.xlane.xlu1 %1330 }
 0x74a   : > { %v1332_v0 = vsub.f32 %v1325_v58, %v1331_v63 }
 0x74c   : > { %v1333_v1 = vmul.f32 1.442695, %v1332_v0 }
 0x74d   : > { %v1346_v11 = vpop.permute.xlu1 %1345 }
 0x74e   : > { %3210 = vpow2.f32 %v1333_v1  ;;  %2882 = vmatpush3.bf16.msra.mxu0 %v1346_v11 }
 0x74f   : > { %2883 = vmatprep.subr.bf16.mxu0 %v3367_v6 }
 0x751   : > { %v1350_v15 = vpop.permute.xlu1 %1349 }
 0x752   : > { %2884 = vmatpush3.bf16.msra.mxu0 %v1348_v14 }
 0x753   : > { %2885 = vmatprep.subr.bf16.mxu0 %v3367_v6 }
 0x755   : > { %v1352_v16 = vpop.permute.xlu1 %1351 }
 0x756   : > { %2886 = vmatpush3.bf16.msra.mxu0 %v1350_v15 }
 0x757   : > { %2887 = vmatprep.subr.bf16.mxu0 %v3367_v6 }
 0x758   : > { %v3211_v17 = vpop.eup %3210 }
 0x759   : > { %1335 = vadd.xlane.f32.xlu0 %v3211_v17  ;;  %v1354_v18 = vpop.permute.xlu1 %1353 }
 0x75a   : > { %2888 = vmatpush3.bf16.msra.mxu0 %v1352_v16 }
 0x75b   : > { %2889 = vmatprep.subr.bf16.mxu0 %v3367_v6 }
 0x75d   : > { %v1414_v19 = vpop.permute.xlu1 %1413 }
 0x75e   : > { %2890 = vmatpush3.bf16.msra.mxu0 %v1354_v18  ;;  %v1433_v35 = vsel %vm942_vm2, %v1414_v19, 0 }
 0x75f   : > { %2891 = vmatprep.subr.bf16.mxu0 %v3367_v6 }
 0x761   : > { %v1418_v20 = vpop.permute.xlu1 %1417 }
 0x762   : > { %v1439_v38 = vsel %vm942_vm2, %v1418_v20, 0 }
 0x765   : > { %v1422_v21 = vpop.permute.xlu1 %1421 }
 0x766   : > { %v1445_v42 = vsel %vm942_vm2, %v1422_v21, 0 }
 0x769   : > { %v1426_v22 = vpop.permute.xlu1 %1425 }
 0x76a   : > { %v1451_v45 = vsel %vm942_vm2, %v1426_v22, 0 }
 0x76d   : > { %v1412_v23 = vpop.permute.xlu1 %1411 }
 0x76f   : > { %1355 = vrot.lane.b32.xlu0 %v3692_v10, %s3371_s24  ;;  %s3379_s24 = smov 20  }
 0x771   : > { %v1508_v24 = vpop.permute.xlu1 %1507 }
 0x772   : > { %2918 = vmatpush3.bf16.msra.mxu1 %v1508_v24 }
 0x773   : > { %1415 = vrot.lane.b32.xlu0 %v3587_v55, %s3372_s14  ;;  %2919 = vmatprep.subr.bf16.mxu1 %v3367_v6 }
 0x775   : > { %v1510_v25 = vpop.permute.xlu1 %1509 }
 0x776   : > { %2920 = vmatpush3.bf16.msra.mxu1 %v1510_v25 }
 0x777   : > { %1419 = vrot.lane.b32.xlu0 %v3591_v61, %s3372_s14  ;;  %2921 = vmatprep.subr.bf16.mxu1 %v3367_v6 }
 0x779   : > { %v1514_v11 = vpop.permute.xlu1 %1513 }
 0x77b   : > { %1423 = vrot.lane.b32.xlu0 %v3608_v7, %s3372_s14 }
 0x77d   : > { %v1522_v19 = vpop.permute.xlu1 %1521 }
 0x77f   : > { %1427 = vrot.lane.b32.xlu0 %v3622_v12, %s3372_s14 }
 0x7e6   : > { %v1336_v27 = vpop.xlane.xlu0 %1335 }
 0x7e7   : > { %3212 = vrcp.f32 %v1336_v27 }
 0x7ea   : > { %v1356_v28 = vpop.permute.xlu0 %1355 }
 0x7eb   : > { %2892 = vmatpush3.bf16.msra.mxu0 %v1356_v28 }
 0x7ec   : > { %2897 = vmatprep.subr.bf16.mxu0 %v3367_v6 }
 0x7ee   : > { %v1416_v36 = vpop.permute.xlu0 %1415 }
 0x7ef   : > { %v1436_v37 = vsel %vm942_vm2, %v1416_v36, 0 }
 0x7f1   : > { %v3213_v29 = vpop.eup %3212 }
 0x7f2   : > { %v1338_v31 = vmul.f32 %v3213_v29, %v3211_v17  ;;  %v1420_v32 = vpop.permute.xlu0 %1419 }
 0x7f3   : > { %v1442_v40 = vsel %vm942_vm2, %v1420_v32, 0 }
 0x7f4   : > { %v3846_v33 = vadd.f32 %v1338_v31, %v1165_v30  ;;  %v1340_v34 = vpack.c.bf16 %v1338_v31, %v1338_v31 }
 0x7f6   : > { %2894 = vmatmul.mubr.bf16.vlgmr.msra.gmra.mrb[24].mxu0 %v1340_v34  ;;  %v1424_v43 = vpop.permute.xlu0 %1423 }
 0x7f7   : > { %2898 = vmatpush3.bf16.xpose.msra.mxu0 %v1433_v35  ;;  %2913 = vmatprep.mubr.msk.bf16.mxu0 %vm3368_vm1, %v3367_v6  ;;  %v1448_v44 = vsel %vm942_vm2, %v1424_v43, 0 }
 0x7f8   : > { %2899 = vmatprep.subr.bf16.mxu0 %v3367_v6 }
 0x7fa   : > { %v1428_v46 = vpop.permute.xlu0 %1427 }
 0x7fb   : > { %v1454_v47 = vsel %vm942_vm2, %v1428_v46, 0 }
 0x7ff   : > { %2900 = vmatpush3.bf16.xpose.msra.mxu0 %v1436_v37 }
 0x800   : > { %2901 = vmatprep.subr.bf16.mxu0 %v3367_v6 }
 0x807   : > { %2902 = vmatpush3.bf16.xpose.msra.mxu0 %v1439_v38 }
 0x808   : > { %2903 = vmatprep.subr.bf16.mxu0 %v3367_v6 }
 0x80f   : > { %2904 = vmatpush3.bf16.xpose.msra.mxu0 %v1442_v40 }
 0x810   : > { %2905 = vmatprep.subr.bf16.mxu0 %v3367_v6 }
 0x817   : > { %2906 = vmatpush3.bf16.xpose.msra.mxu0 %v1445_v42 }
 0x818   : > { %2907 = vmatprep.subr.bf16.mxu0 %v3367_v6 }
 0x81f   : > { %2908 = vmatpush3.bf16.xpose.msra.mxu0 %v1448_v44 }
 0x820   : > { %2909 = vmatprep.subr.bf16.mxu0 %v3367_v6 }
 0x827   : > { %2910 = vmatpush3.bf16.xpose.msra.mxu0 %v1451_v45 }
 0x828   : > { %2911 = vmatprep.subr.bf16.mxu0 %v3367_v6 }
 0x82f   : > { %2912 = vmatpush3.bf16.xpose.msra.mxu0 %v1454_v47 }
 0x830   : > { %2957 = vmatprep.subr.bf16.mxu0 %v3367_v6 }
 0x836   : > { %2914 = vmatmul.mubr.msk.bf16.vlgmr.msra.gmra.mrb[28].mxu0 %vm942_vm2, %v1412_v23 }
 0x837   : > { %2973 = vmatprep.mubr.msk.bf16.mxu0 %vm3368_vm1, %v3367_v6 }
 0x8c9   : > { %v3869_v49 = vpop.f32.mrb[24].mxu0 }
 0x8ca   : > { %v2895_v51 = vpop.f32.mrb[25].mxu0 }
 0x8cb   : > { %v1402_v54 = vpop.f32.mrb[26].mxu0 }
 0x8cc   : > { %v2896_v56 = vpop.f32.mrb[27].mxu0 }
 0x909   : > { %v1490_v57 = vpop.f32.mrb[28].mxu0 }
 0x90a   : > { %v1491_v58 = vadd.f32 %v1490_v57, %v3700_v26  ;;  %v2915_v59 = vpop.f32.mrb[29].mxu0  ;;  %v3947_v57 = vld [vmem:[#allocation2] sm:$0xff] }
 0x90b   : > { %v1493_v60 = vpop.f32.mrb[30].mxu0 }
 0x90c   : > { %1496 = vmax.xlane.f32.xlu0 %v1491_v58  ;;  %v2916_v62 = vpop.f32.mrb[31].mxu0 }
 0x922   : > { %1511 = vrot.lane.b32.xlu0 %v3669_v53, %s3372_s14 }
 0x926   : > { %1515 = vrot.lane.b32.xlu0 %v3679_v2, %s3372_s14 }
 0x92a   : > { %1517 = vrot.lane.b32.xlu0 %v3684_v5, %s3372_s14 }
 0x92e   : > { %1519 = vrot.lane.b32.xlu0 %v3688_v9, %s3372_s14  ;;  %s3380_s14 = smov 8  }
 0x932   : > { %1579 = vrot.lane.b32.xlu0 %v3579_v48, %s3373_s29 }
 0x936   : > { %1583 = vrot.lane.b32.xlu0 %v3600_v3, %s3373_s29 }
 0x93a   : > { %1587 = vrot.lane.b32.xlu0 %v3602_v4, %s3373_s29 }
 0x93e   : > { %1591 = vrot.lane.b32.xlu0 %v3613_v8, %s3373_s29 }
 0x942   : > { %1577 = vrot.lane.b32.xlu0 %v3627_v13, %s3373_s29 }
 0x946   : > { %1673 = vrot.lane.b32.xlu0 %v3652_v39, %s3373_s29 }
 0x94a   : > { %1675 = vrot.lane.b32.xlu0 %v3660_v41, %s3373_s29 }
 0x94e   : > { %1679 = vrot.lane.b32.xlu0 %v3666_v52, %s3373_s29 }
 0x999   : > { %v1497_v48 = vpop.xlane.xlu0 %1496 }
 0x99a   : > { %v1498_v63 = vsub.f32 %v1491_v58, %v1497_v48 }
 0x99c   : > { %v1499_v0 = vmul.f32 1.442695, %v1498_v63 }
 0x99d   : > { %v1512_v1 = vpop.permute.xlu0 %1511 }
 0x99e   : > { %3214 = vpow2.f32 %v1499_v0  ;;  %2922 = vmatpush3.bf16.msra.mxu1 %v1512_v1 }
 0x99f   : > { %2923 = vmatprep.subr.bf16.mxu1 %v3367_v6 }
 0x9a1   : > { %v1516_v14 = vpop.permute.xlu0 %1515 }
 0x9a2   : > { %2924 = vmatpush3.bf16.msra.mxu1 %v1514_v11  ;;  %v3974_v11 = vld [vmem:[#allocation2 + $0x8] sm:$0xff] }
 0x9a3   : > { %2925 = vmatprep.subr.bf16.mxu1 %v3367_v6 }
 0x9a5   : > { %v1518_v15 = vpop.permute.xlu0 %1517 }
 0x9a6   : > { %2926 = vmatpush3.bf16.msra.mxu1 %v1516_v14 }
 0x9a7   : > { %2927 = vmatprep.subr.bf16.mxu1 %v3367_v6 }
 0x9a8   : > { %v3215_v16 = vpop.eup %3214 }
 0x9a9   : > { %1501 = vadd.xlane.f32.xlu1 %v3215_v16  ;;  %v1520_v17 = vpop.permute.xlu0 %1519 }
 0x9aa   : > { %2928 = vmatpush3.bf16.msra.mxu1 %v1518_v15  ;;  %v3979_v15 = vld [vmem:[#allocation2 + $0x18] sm:$0xff] }
 0x9ab   : > { %2929 = vmatprep.subr.bf16.mxu1 %v3367_v6 }
 0x9ad   : > { %v1580_v18 = vpop.permute.xlu0 %1579 }
 0x9ae   : > { %2930 = vmatpush3.bf16.msra.mxu1 %v1520_v17 }
 0x9af   : > { %2931 = vmatprep.subr.bf16.mxu1 %v3367_v6 }
 0x9b1   : > { %v1584_v20 = vpop.permute.xlu0 %1583 }
 0x9b2   : > { %2932 = vmatpush3.bf16.msra.mxu1 %v1522_v19  ;;  %v1605_v31 = vsel %vm942_vm2, %v1584_v20, 0 }
 0x9b3   : > { %2937 = vmatprep.subr.bf16.mxu1 %v3367_v6 }
 0x9b5   : > { %v1588_v21 = vpop.permute.xlu0 %1587 }
 0x9b6   : > { %v1611_v35 = vsel %vm942_vm2, %v1588_v21, 0 }
 0x9b9   : > { %v1592_v22 = vpop.permute.xlu0 %1591 }
 0x9ba   : > { %1581 = vrot.lane.b32.xlu1 %v3587_v55, %s3373_s29  ;;  %v1617_v38 = vsel %vm942_vm2, %v1592_v22, 0 }
 0x9bd   : > { %v1578_v23 = vpop.permute.xlu0 %1577 }
 0x9be   : > { %1585 = vrot.lane.b32.xlu1 %v3591_v61, %s3373_s29 }
 0x9c1   : > { %v1674_v24 = vpop.permute.xlu0 %1673 }
 0x9c2   : > { %1589 = vrot.lane.b32.xlu1 %v3608_v7, %s3373_s29  ;;  %2958 = vmatpush3.bf16.msra.mxu0 %v1674_v24  ;;  %v1599_v7 = vsel %vm942_vm2, %v1580_v18, 0 }
 0x9c3   : > { %2959 = vmatprep.subr.bf16.mxu0 %v3367_v6 }
 0x9c5   : > { %v1676_v25 = vpop.permute.xlu0 %1675 }
 0x9c6   : > { %1593 = vrot.lane.b32.xlu1 %v3622_v12, %s3373_s29  ;;  %2960 = vmatpush3.bf16.msra.mxu0 %v1676_v25 }
 0x9c7   : > { %2961 = vmatprep.subr.bf16.mxu0 %v3367_v6 }
 0xa36   : > { %v1502_v27 = vpop.xlane.xlu1 %1501 }
 0xa37   : > { %3216 = vrcp.f32 %v1502_v27 }
 0xa3a   : > { %v1582_v12 = vpop.permute.xlu1 %1581 }
 0xa3b   : > { %v1602_v30 = vsel %vm942_vm2, %v1582_v12, 0 }
 0xa41   : > { %v3217_v55 = vpop.eup %3216 }
 0xa42   : > { %v1504_v28 = vmul.f32 %v3217_v55, %v3215_v16  ;;  %v3984_v16 = vld [vmem:[#allocation2 + $0x28] sm:$0xff] }
 0xa44   : > { %v3913_v61 = vadd.f32 %v1504_v28, %v3846_v33  ;;  %v1506_v29 = vpack.c.bf16 %v1504_v28, %v1504_v28  ;;  %v1586_v33 = vpop.permute.xlu1 %1585 }
 0xa45   : > { %v1608_v34 = vsel %vm942_vm2, %v1586_v33, 0 }
 0xa46   : > { %2934 = vmatmul.mubr.bf16.vlgmr.msra.gmra.mrb[32].mxu1 %v1506_v29 }
 0xa47   : > { %2938 = vmatpush3.bf16.xpose.msra.mxu1 %v1599_v7  ;;  %2953 = vmatprep.mubr.msk.bf16.mxu1 %vm3368_vm1, %v3367_v6 }
 0xa48   : > { %2939 = vmatprep.subr.bf16.mxu1 %v3367_v6  ;;  %v1590_v36 = vpop.permute.xlu1 %1589 }
 0xa49   : > { %v1614_v37 = vsel %vm942_vm2, %v1590_v36, 0 }
 0xa4c   : > { %v1594_v32 = vpop.permute.xlu1 %1593 }
 0xa4d   : > { %v1620_v40 = vsel %vm942_vm2, %v1594_v32, 0 }
 0xa4f   : > { %2940 = vmatpush3.bf16.xpose.msra.mxu1 %v1602_v30 }
 0xa50   : > { %2941 = vmatprep.subr.bf16.mxu1 %v3367_v6 }
 0xa57   : > { %2942 = vmatpush3.bf16.xpose.msra.mxu1 %v1605_v31 }
 0xa58   : > { %2943 = vmatprep.subr.bf16.mxu1 %v3367_v6 }
 0xa5f   : > { %2944 = vmatpush3.bf16.xpose.msra.mxu1 %v1608_v34 }
 0xa60   : > { %2945 = vmatprep.subr.bf16.mxu1 %v3367_v6 }
 0xa67   : > { %2946 = vmatpush3.bf16.xpose.msra.mxu1 %v1611_v35 }
 0xa68   : > { %2947 = vmatprep.subr.bf16.mxu1 %v3367_v6 }
 0xa6f   : > { %2948 = vmatpush3.bf16.xpose.msra.mxu1 %v1614_v37 }
 0xa70   : > { %2949 = vmatprep.subr.bf16.mxu1 %v3367_v6 }
 0xa77   : > { %2950 = vmatpush3.bf16.xpose.msra.mxu1 %v1617_v38 }
 0xa78   : > { %2951 = vmatprep.subr.bf16.mxu1 %v3367_v6 }
 0xa7f   : > { %2952 = vmatpush3.bf16.xpose.msra.mxu1 %v1620_v40 }
 0xa80   : > { %2997 = vmatprep.subr.bf16.mxu1 %v3367_v6 }
 0xa86   : > { %2954 = vmatmul.mubr.msk.bf16.vlgmr.msra.gmra.mrb[36].mxu1 %vm942_vm2, %v1578_v23 }
 0xa87   : > { %3013 = vmatprep.mubr.msk.bf16.mxu1 %vm3368_vm1, %v3367_v6 }
 0xb19   : > { %v3936_v42 = vpop.f32.mrb[32].mxu1 }
 0xb1a   : > { %v2935_v43 = vpop.f32.mrb[33].mxu1 }
 0xb1b   : > { %v1568_v44 = vpop.f32.mrb[34].mxu1 }
 0xb1c   : > { %v2936_v45 = vpop.f32.mrb[35].mxu1  ;;  %v4020_v44 = vld [vmem:[#allocation3 + $0x10] sm:$0xff] }
 0xb1d   : > { %v4032_v45 = vld [vmem:[#allocation2 + $0x10] sm:$0xff] }
 0xb59   : > { %v1656_v46 = vpop.f32.mrb[36].mxu1 }
 0xb5a   : > { %v1657_v47 = vadd.f32 %v1656_v46, %v3700_v26  ;;  %v2955_v51 = vpop.f32.mrb[37].mxu1  ;;  %v4036_v46 = vld [vmem:[#allocation2 + $0x20] sm:$0xff] }
 0xb5b   : > { %v1659_v54 = vpop.f32.mrb[38].mxu1 }
 0xb5c   : > { %1662 = vmax.xlane.f32.xlu1 %v1657_v47  ;;  %v2956_v56 = vpop.f32.mrb[39].mxu1 }
 0xb6d   : > { %1677 = vrot.lane.b32.xlu1 %v3669_v53, %s3373_s29 }
 0xb71   : > { %1681 = vrot.lane.b32.xlu1 %v3679_v2, %s3373_s29 }
 0xb75   : > { %1683 = vrot.lane.b32.xlu1 %v3684_v5, %s3373_s29 }
 0xb79   : > { %1685 = vrot.lane.b32.xlu1 %v3688_v9, %s3373_s29 }
 0xb7d   : > { %1745 = vrot.lane.b32.xlu1 %v3947_v57, %s3374_s16 }
 0xb81   : > { %1749 = vrot.lane.b32.xlu1 %v3600_v3, %s3374_s16 }
 0xb85   : > { %1753 = vrot.lane.b32.xlu1 %v3602_v4, %s3374_s16 }
 0xb89   : > { %1757 = vrot.lane.b32.xlu1 %v3613_v8, %s3374_s16  ;;  %v1680_v8 = vpop.permute.xlu0 %1679 }
 0xb8d   : > { %1743 = vrot.lane.b32.xlu1 %v3627_v13, %s3374_s16 }
 0xb91   : > { %1839 = vrot.lane.b32.xlu1 %v3652_v39, %s3374_s16 }
 0xb95   : > { %1841 = vrot.lane.b32.xlu1 %v3660_v41, %s3374_s16 }
 0xb99   : > { %1845 = vrot.lane.b32.xlu1 %v3666_v52, %s3374_s16 }
 0xb9d   : > { %1853 = vrot.lane.b32.xlu1 %v3692_v10, %s3374_s16 }
 0xbe9   : > { %v1663_v3 = vpop.xlane.xlu1 %1662 }
 0xbea   : > { %v1664_v4 = vsub.f32 %v1657_v47, %v1663_v3  ;;  %v4054_v47 = vld [vmem:[#allocation3 + $0x18] sm:$0xff] }
 0xbec   : > { %v1665_v53 = vmul.f32 1.442695, %v1664_v4 }
 0xbed   : > { %v1678_v58 = vpop.permute.xlu1 %1677 }
 0xbee   : > { %3218 = vpow2.f32 %v1665_v53  ;;  %2962 = vmatpush3.bf16.msra.mxu0 %v1678_v58 }
 0xbef   : > { %2963 = vmatprep.subr.bf16.mxu0 %v3367_v6 }
 0xbf1   : > { %v1682_v59 = vpop.permute.xlu1 %1681 }
 0xbf2   : > { %2964 = vmatpush3.bf16.msra.mxu0 %v1680_v8 }
 0xbf3   : > { %2965 = vmatprep.subr.bf16.mxu0 %v3367_v6 }
 0xbf5   : > { %v1684_v39 = vpop.permute.xlu1 %1683 }
 0xbf6   : > { %2966 = vmatpush3.bf16.msra.mxu0 %v1682_v59 }
 0xbf7   : > { %2967 = vmatprep.subr.bf16.mxu0 %v3367_v6 }
 0xbf8   : > { %v3219_v41 = vpop.eup %3218 }
 0xbf9   : > { %1667 = vadd.xlane.f32.xlu0 %v3219_v41  ;;  %v1686_v52 = vpop.permute.xlu1 %1685 }
 0xbfa   : > { %2968 = vmatpush3.bf16.msra.mxu0 %v1684_v39 }
 0xbfb   : > { %2969 = vmatprep.subr.bf16.mxu0 %v3367_v6 }
 0xbfd   : > { %v1746_v60 = vpop.permute.xlu1 %1745 }
 0xbfe   : > { %2970 = vmatpush3.bf16.msra.mxu0 %v1686_v52  ;;  %v1765_v23 = vsel %vm942_vm2, %v1746_v60, 0 }
 0xbff   : > { %2971 = vmatprep.subr.bf16.mxu0 %v3367_v6 }
 0xc01   : > { %v1750_v62 = vpop.permute.xlu1 %1749 }
 0xc02   : > { %v1771_v27 = vsel %vm942_vm2, %v1750_v62, 0 }
 0xc05   : > { %v1754_v48 = vpop.permute.xlu1 %1753 }
 0xc09   : > { %v1758_v63 = vpop.permute.xlu1 %1757 }
 0xc0a   : > { %v1783_v12 = vsel %vm942_vm2, %v1758_v63, 0 }
 0xc0d   : > { %v1744_v0 = vpop.permute.xlu1 %1743 }
 0xc0f   : > { %1687 = vrot.lane.b32.xlu0 %v3692_v10, %s3373_s29  ;;  %v3988_v10 = vld [vmem:[#allocation2 + $0x38] sm:$0xff]  ;;  %s3381_s29 = smov 16  }
 0xc11   : > { %v1840_v1 = vpop.permute.xlu1 %1839 }
 0xc12   : > { %2998 = vmatpush3.bf16.msra.mxu1 %v1840_v1 }
 0xc13   : > { %1747 = vrot.lane.b32.xlu0 %v3974_v11, %s3374_s16  ;;  %2999 = vmatprep.subr.bf16.mxu1 %v3367_v6 }
 0xc15   : > { %v1842_v14 = vpop.permute.xlu1 %1841 }
 0xc16   : > { %3000 = vmatpush3.bf16.msra.mxu1 %v1842_v14 }
 0xc17   : > { %1751 = vrot.lane.b32.xlu0 %v3979_v15, %s3374_s16  ;;  %3001 = vmatprep.subr.bf16.mxu1 %v3367_v6 }
 0xc19   : > { %v1846_v4 = vpop.permute.xlu1 %1845 }
 0xc1b   : > { %1755 = vrot.lane.b32.xlu0 %v3984_v16, %s3374_s16 }
 0xc1f   : > { %1759 = vrot.lane.b32.xlu0 %v3988_v10, %s3374_s16 }
 0xc86   : > { %v1668_v17 = vpop.xlane.xlu0 %1667 }
 0xc87   : > { %3220 = vrcp.f32 %v1668_v17 }
 0xc8a   : > { %v1688_v18 = vpop.permute.xlu0 %1687 }
 0xc8b   : > { %2972 = vmatpush3.bf16.msra.mxu0 %v1688_v18 }
 0xc8c   : > { %2977 = vmatprep.subr.bf16.mxu0 %v3367_v6 }
 0xc8e   : > { %v1748_v24 = vpop.permute.xlu0 %1747 }
 0xc8f   : > { %v1768_v25 = vsel %vm942_vm2, %v1748_v24, 0 }
 0xc91   : > { %v3221_v19 = vpop.eup %3220 }
 0xc92   : > { %v1670_v20 = vmul.f32 %v3221_v19, %v3219_v41  ;;  %v1752_v55 = vpop.permute.xlu0 %1751  ;;  %v1854_v41 = vpop.permute.xlu1 %1853 }
 0xc93   : > { %v1774_v28 = vsel %vm942_vm2, %v1752_v55, 0 }
 0xc94   : > { %v3994_v21 = vadd.f32 %v1670_v20, %v3913_v61  ;;  %v1672_v22 = vpack.c.bf16 %v1670_v20, %v1670_v20  ;;  %v1777_v61 = vsel %vm942_vm2, %v1754_v48, 0 }
 0xc96   : > { %2974 = vmatmul.mubr.bf16.vlgmr.msra.gmra.mrb[32].mxu0 %v1672_v22  ;;  %v1756_v29 = vpop.permute.xlu0 %1755 }
 0xc97   : > { %2978 = vmatpush3.bf16.xpose.msra.mxu0 %v1765_v23  ;;  %2993 = vmatprep.mubr.msk.bf16.mxu0 %vm3368_vm1, %v3367_v6  ;;  %v1780_v7 = vsel %vm942_vm2, %v1756_v29, 0 }
 0xc98   : > { %2979 = vmatprep.subr.bf16.mxu0 %v3367_v6 }
 0xc9a   : > { %v1760_v30 = vpop.permute.xlu0 %1759 }
 0xc9b   : > { %v1786_v31 = vsel %vm942_vm2, %v1760_v30, 0 }
 0xc9f   : > { %2980 = vmatpush3.bf16.xpose.msra.mxu0 %v1768_v25 }
 0xca0   : > { %2981 = vmatprep.subr.bf16.mxu0 %v3367_v6 }
 0xca7   : > { %2982 = vmatpush3.bf16.xpose.msra.mxu0 %v1771_v27 }
 0xca8   : > { %2983 = vmatprep.subr.bf16.mxu0 %v3367_v6 }
 0xcaf   : > { %2984 = vmatpush3.bf16.xpose.msra.mxu0 %v1774_v28 }
 0xcb0   : > { %2985 = vmatprep.subr.bf16.mxu0 %v3367_v6 }
 0xcb7   : > { %2986 = vmatpush3.bf16.xpose.msra.mxu0 %v1777_v61 }
 0xcb8   : > { %2987 = vmatprep.subr.bf16.mxu0 %v3367_v6 }
 0xcbf   : > { %2988 = vmatpush3.bf16.xpose.msra.mxu0 %v1780_v7 }
 0xcc0   : > { %2989 = vmatprep.subr.bf16.mxu0 %v3367_v6 }
 0xcc7   : > { %2990 = vmatpush3.bf16.xpose.msra.mxu0 %v1783_v12 }
 0xcc8   : > { %2991 = vmatprep.subr.bf16.mxu0 %v3367_v6 }
 0xccf   : > { %2992 = vmatpush3.bf16.xpose.msra.mxu0 %v1786_v31 }
 0xcd0   : > { %3037 = vmatprep.subr.bf16.mxu0 %v3367_v6 }
 0xcd6   : > { %2994 = vmatmul.mubr.msk.bf16.vlgmr.msra.gmra.mrb[36].mxu0 %vm942_vm2, %v1744_v0 }
 0xcd7   : > { %3053 = vmatprep.mubr.msk.bf16.mxu0 %vm3368_vm1, %v3367_v6 }
 0xd69   : > { %v4017_v33 = vpop.f32.mrb[32].mxu0 }
 0xd6a   : > { %v2975_v34 = vpop.f32.mrb[33].mxu0 }
 0xd6b   : > { %v1734_v35 = vpop.f32.mrb[34].mxu0 }
 0xd6c   : > { %v2976_v36 = vpop.f32.mrb[35].mxu0 }
 0xda9   : > { %v1822_v37 = vpop.f32.mrb[36].mxu0 }
 0xdaa   : > { %v1823_v38 = vadd.f32 %v1822_v37, %v3700_v26  ;;  %v2995_v32 = vpop.f32.mrb[37].mxu0 }
 0xdab   : > { %v1825_v40 = vpop.f32.mrb[38].mxu0 }
 0xdac   : > { %1828 = vmax.xlane.f32.xlu0 %v1823_v38  ;;  %v2996_v43 = vpop.f32.mrb[39].mxu0  ;;  %v4103_v40 = vld [vmem:[#allocation3 + $0x20] sm:$0xff] }
 0xdad   : > { %v3251_v43 = vld [vmem:[#allocation3 + $0x28] sm:$0xff] }
 0xdc2   : > { %1843 = vrot.lane.b32.xlu0 %v4020_v44, %s3374_s16 }
 0xdc6   : > { %1847 = vrot.lane.b32.xlu0 %v3679_v2, %s3374_s16  ;;  %v4040_v2 = vld [vmem:[#allocation2 + $0x30] sm:$0xff] }
 0xdca   : > { %1849 = vrot.lane.b32.xlu0 %v3684_v5, %s3374_s16  ;;  %v4046_v5 = vld [vmem:[#allocation3] sm:$0xff] }
 0xdce   : > { %1851 = vrot.lane.b32.xlu0 %v3688_v9, %s3374_s16  ;;  %v4050_v9 = vld [vmem:[#allocation3 + $0x8] sm:$0xff]  ;;  %s3382_s16 = smov 24  }
 0xdd2   : > { %1911 = vrot.lane.b32.xlu0 %v3947_v57, %s3375_s17 }
 0xdd6   : > { %1915 = vrot.lane.b32.xlu0 %v4032_v45, %s3375_s17 }
 0xdda   : > { %1919 = vrot.lane.b32.xlu0 %v4036_v46, %s3375_s17 }
 0xdde   : > { %1923 = vrot.lane.b32.xlu0 %v4040_v2, %s3375_s17 }
 0xde2   : > { %1909 = vrot.lane.b32.xlu0 %v3627_v13, %s3375_s17 }
 0xde6   : > { %2005 = vrot.lane.b32.xlu0 %v4046_v5, %s3375_s17 }
 0xdea   : > { %2007 = vrot.lane.b32.xlu0 %v4050_v9, %s3375_s17 }
 0xdee   : > { %2011 = vrot.lane.b32.xlu0 %v4054_v47, %s3375_s17 }
 0xe39   : > { %v1829_v51 = vpop.xlane.xlu0 %1828 }
 0xe3a   : > { %v1830_v54 = vsub.f32 %v1823_v38, %v1829_v51  ;;  %v4108_v51 = vld [vmem:[#allocation3 + $0x30] sm:$0xff] }
 0xe3c   : > { %v1831_v56 = vmul.f32 1.442695, %v1830_v54 }
 0xe3d   : > { %v1844_v3 = vpop.permute.xlu0 %1843 }
 0xe3e   : > { %3222 = vpow2.f32 %v1831_v56  ;;  %3002 = vmatpush3.bf16.msra.mxu1 %v1844_v3 }
 0xe3f   : > { %3003 = vmatprep.subr.bf16.mxu1 %v3367_v6 }
 0xe41   : > { %v1848_v53 = vpop.permute.xlu0 %1847 }
 0xe42   : > { %3004 = vmatpush3.bf16.msra.mxu1 %v1846_v4 }
 0xe43   : > { %3005 = vmatprep.subr.bf16.mxu1 %v3367_v6 }
 0xe45   : > { %v1850_v58 = vpop.permute.xlu0 %1849 }
 0xe46   : > { %3006 = vmatpush3.bf16.msra.mxu1 %v1848_v53 }
 0xe47   : > { %3007 = vmatprep.subr.bf16.mxu1 %v3367_v6 }
 0xe48   : > { %v3223_v8 = vpop.eup %3222 }
 0xe49   : > { %1833 = vadd.xlane.f32.xlu1 %v3223_v8  ;;  %v1852_v59 = vpop.permute.xlu0 %1851 }
 0xe4a   : > { %3008 = vmatpush3.bf16.msra.mxu1 %v1850_v58 }
 0xe4b   : > { %3009 = vmatprep.subr.bf16.mxu1 %v3367_v6 }
 0xe4d   : > { %v1912_v39 = vpop.permute.xlu0 %1911 }
 0xe4e   : > { %3010 = vmatpush3.bf16.msra.mxu1 %v1852_v59  ;;  %v1931_v20 = vsel %vm942_vm2, %v1912_v39, 0  ;;  %v4132_v59 = vld [vmem:[#allocation3 + $0x38] sm:$0xff] }
 0xe4f   : > { %3011 = vmatprep.subr.bf16.mxu1 %v3367_v6 }
 0xe51   : > { %v1916_v52 = vpop.permute.xlu0 %1915 }
 0xe52   : > { %3012 = vmatpush3.bf16.msra.mxu1 %v1854_v41  ;;  %v1937_v24 = vsel %vm942_vm2, %v1916_v52, 0 }
 0xe53   : > { %3017 = vmatprep.subr.bf16.mxu1 %v3367_v6 }
 0xe55   : > { %v1920_v60 = vpop.permute.xlu0 %1919 }
 0xe56   : > { %v1943_v27 = vsel %vm942_vm2, %v1920_v60, 0 }
 0xe59   : > { %v1924_v62 = vpop.permute.xlu0 %1923 }
 0xe5a   : > { %1913 = vrot.lane.b32.xlu1 %v3974_v11, %s3375_s17  ;;  %v1949_v61 = vsel %vm942_vm2, %v1924_v62, 0 }
 0xe5d   : > { %v1910_v48 = vpop.permute.xlu0 %1909 }
 0xe5e   : > { %1917 = vrot.lane.b32.xlu1 %v3979_v15, %s3375_s17 }
 0xe61   : > { %v2006_v63 = vpop.permute.xlu0 %2005 }
 0xe62   : > { %1921 = vrot.lane.b32.xlu1 %v3984_v16, %s3375_s17  ;;  %3038 = vmatpush3.bf16.msra.mxu0 %v2006_v63 }
 0xe63   : > { %3039 = vmatprep.subr.bf16.mxu0 %v3367_v6 }
 0xe65   : > { %v2008_v0 = vpop.permute.xlu0 %2007 }
 0xe66   : > { %1925 = vrot.lane.b32.xlu1 %v3988_v10, %s3375_s17  ;;  %3040 = vmatpush3.bf16.msra.mxu0 %v2008_v0 }
 0xe67   : > { %3041 = vmatprep.subr.bf16.mxu0 %v3367_v6 }
 0xed6   : > { %v1834_v1 = vpop.xlane.xlu1 %1833 }
 0xed7   : > { %3224 = vrcp.f32 %v1834_v1 }
 0xeda   : > { %v1914_v22 = vpop.permute.xlu1 %1913 }
 0xedb   : > { %v1934_v23 = vsel %vm942_vm2, %v1914_v22, 0 }
 0xee1   : > { %v3225_v14 = vpop.eup %3224 }
 0xee2   : > { %v1836_v17 = vmul.f32 %v3225_v14, %v3223_v8 }
 0xee4   : > { %v4075_v18 = vadd.f32 %v1836_v17, %v3994_v21  ;;  %v1838_v19 = vpack.c.bf16 %v1836_v17, %v1836_v17  ;;  %v1918_v21 = vpop.permute.xlu1 %1917 }
 0xee5   : > { %v1940_v25 = vsel %vm942_vm2, %v1918_v21, 0 }
 0xee6   : > { %3014 = vmatmul.mubr.bf16.vlgmr.msra.gmra.mrb[40].mxu1 %v1838_v19 }
 0xee7   : > { %3018 = vmatpush3.bf16.xpose.msra.mxu1 %v1931_v20  ;;  %3033 = vmatprep.mubr.msk.bf16.mxu1 %vm3368_vm1, %v3367_v6 }
 0xee8   : > { %3019 = vmatprep.subr.bf16.mxu1 %v3367_v6  ;;  %v1922_v55 = vpop.permute.xlu1 %1921 }
 0xee9   : > { %v1946_v28 = vsel %vm942_vm2, %v1922_v55, 0 }
 0xeec   : > { %v1926_v29 = vpop.permute.xlu1 %1925 }
 0xeed   : > { %v1952_v7 = vsel %vm942_vm2, %v1926_v29, 0 }
 0xeef   : > { %3020 = vmatpush3.bf16.xpose.msra.mxu1 %v1934_v23 }
 0xef0   : > { %3021 = vmatprep.subr.bf16.mxu1 %v3367_v6 }
 0xef7   : > { %3022 = vmatpush3.bf16.xpose.msra.mxu1 %v1937_v24 }
 0xef8   : > { %3023 = vmatprep.subr.bf16.mxu1 %v3367_v6 }
 0xeff   : > { %3024 = vmatpush3.bf16.xpose.msra.mxu1 %v1940_v25 }
 0xf00   : > { %3025 = vmatprep.subr.bf16.mxu1 %v3367_v6 }
 0xf07   : > { %3026 = vmatpush3.bf16.xpose.msra.mxu1 %v1943_v27 }
 0xf08   : > { %3027 = vmatprep.subr.bf16.mxu1 %v3367_v6 }
 0xf0f   : > { %3028 = vmatpush3.bf16.xpose.msra.mxu1 %v1946_v28 }
 0xf10   : > { %3029 = vmatprep.subr.bf16.mxu1 %v3367_v6 }
 0xf17   : > { %3030 = vmatpush3.bf16.xpose.msra.mxu1 %v1949_v61 }
 0xf18   : > { %3031 = vmatprep.subr.bf16.mxu1 %v3367_v6 }
 0xf1f   : > { %3032 = vmatpush3.bf16.xpose.msra.mxu1 %v1952_v7 }
 0xf20   : > { %3077 = vmatprep.subr.bf16.mxu1 %v3367_v6 }
 0xf26   : > { %3034 = vmatmul.mubr.msk.bf16.vlgmr.msra.gmra.mrb[44].mxu1 %vm942_vm2, %v1910_v48 }
 0xf27   : > { %3093 = vmatprep.mubr.msk.bf16.mxu1 %vm3368_vm1, %v3367_v6 }
 0xfb9   : > { %v4098_v12 = vpop.f32.mrb[40].mxu1 }
 0xfba   : > { %v3015_v30 = vpop.f32.mrb[41].mxu1 }
 0xfbb   : > { %v1900_v31 = vpop.f32.mrb[42].mxu1 }
 0xfbc   : > { %v3016_v34 = vpop.f32.mrb[43].mxu1 }
 0xff9   : > { %v1988_v35 = vpop.f32.mrb[44].mxu1 }
 0xffa   : > { %v1989_v36 = vadd.f32 %v1988_v35, %v3700_v26  ;;  %v3035_v37 = vpop.f32.mrb[45].mxu1 }
 0xffb   : > { %v1991_v38 = vpop.f32.mrb[46].mxu1 }
 0xffc   : > { %1994 = vmax.xlane.f32.xlu1 %v1989_v36  ;;  %v3036_v32 = vpop.f32.mrb[47].mxu1 }
0x100d   : > { %2009 = vrot.lane.b32.xlu1 %v4020_v44, %s3375_s17 }
0x1011   : > { %2013 = vrot.lane.b32.xlu1 %v4103_v40, %s3375_s17 }
0x1015   : > { %2015 = vrot.lane.b32.xlu1 %v3251_v43, %s3375_s17 }
0x1019   : > { %2017 = vrot.lane.b32.xlu1 %v4108_v51, %s3375_s17 }
0x101d   : > { %2077 = vrot.lane.b32.xlu1 %v3947_v57, %s3376_s15 }
0x1021   : > { %2081 = vrot.lane.b32.xlu1 %v4032_v45, %s3376_s15 }
0x1025   : > { %2085 = vrot.lane.b32.xlu1 %v4036_v46, %s3376_s15  ;;  %v2012_v46 = vpop.permute.xlu0 %2011 }
0x1029   : > { %2089 = vrot.lane.b32.xlu1 %v4040_v2, %s3376_s15 }
0x102d   : > { %2075 = vrot.lane.b32.xlu1 %v3627_v13, %s3376_s15 }
0x1031   : > { %2171 = vrot.lane.b32.xlu1 %v4046_v5, %s3376_s15 }
0x1035   : > { %2175 = vrot.lane.b32.xlu1 %v4020_v44, %s3376_s15 }
0x1039   : > { %2181 = vrot.lane.b32.xlu1 %v3251_v43, %s3376_s15 }
0x1089   : > { %v1995_v57 = vpop.xlane.xlu1 %1994 }
0x108a   : > { %v1996_v54 = vsub.f32 %v1989_v36, %v1995_v57 }
0x108c   : > { %v1997_v45 = vmul.f32 1.442695, %v1996_v54 }
0x108d   : > { %v2010_v56 = vpop.permute.xlu1 %2009 }
0x108e   : > { %3226 = vpow2.f32 %v1997_v45  ;;  %3042 = vmatpush3.bf16.msra.mxu0 %v2010_v56 }
0x108f   : > { %3043 = vmatprep.subr.bf16.mxu0 %v3367_v6 }
0x1091   : > { %v2014_v2 = vpop.permute.xlu1 %2013 }
0x1092   : > { %3044 = vmatpush3.bf16.msra.mxu0 %v2012_v46  ;;  %v3200_v46 = vld [vmem:[%s4313_s8] sm:$0xff]  }
0x1093   : > { %3045 = vmatprep.subr.bf16.mxu0 %v3367_v6 }
0x1095   : > { %v2016_v13 = vpop.permute.xlu1 %2015 }
0x1096   : > { %3046 = vmatpush3.bf16.msra.mxu0 %v2014_v2  ;;  %v3201_v2 = vld [vmem:[%s4313_s8 + $0x8] sm:$0xff]  }
0x1097   : > { %3047 = vmatprep.subr.bf16.mxu0 %v3367_v6 }
0x1098   : > { %v3227_v44 = vpop.eup %3226 }
0x1099   : > { %1999 = vadd.xlane.f32.xlu0 %v3227_v44  ;;  %v2018_v5 = vpop.permute.xlu1 %2017 }
0x109a   : > { %3048 = vmatpush3.bf16.msra.mxu0 %v2016_v13 }
0x109b   : > { %3049 = vmatprep.subr.bf16.mxu0 %v3367_v6 }
0x109d   : > { %v2078_v3 = vpop.permute.xlu1 %2077 }
0x109e   : > { %3050 = vmatpush3.bf16.msra.mxu0 %v2018_v5 }
0x109f   : > { %3051 = vmatprep.subr.bf16.mxu0 %v3367_v6 }
0x10a1   : > { %v2082_v4 = vpop.permute.xlu1 %2081 }
0x10a2   : > { %v2103_v63 = vsel %vm942_vm2, %v2082_v4, 0 }
0x10a5   : > { %v2086_v53 = vpop.permute.xlu1 %2085 }
0x10a6   : > { %v2109_v14 = vsel %vm942_vm2, %v2086_v53, 0 }
0x10a9   : > { %v2090_v58 = vpop.permute.xlu1 %2089 }
0x10aa   : > { %v2115_v19 = vsel %vm942_vm2, %v2090_v58, 0 }
0x10ad   : > { %v2076_v8 = vpop.permute.xlu1 %2075 }
0x10af   : > { %2019 = vrot.lane.b32.xlu0 %v4132_v59, %s3375_s17  ;;  %s4194_s17 = sand.u32 1, %s3349_s26  }
0x10b1   : > { %v2172_v39 = vpop.permute.xlu1 %2171 }
0x10b2   : > { %3078 = vmatpush3.bf16.msra.mxu1 %v2172_v39 }
0x10b3   : > { %2079 = vrot.lane.b32.xlu0 %v3974_v11, %s3376_s15  ;;  %3079 = vmatprep.subr.bf16.mxu1 %v3367_v6 }
0x10b7   : > { %2083 = vrot.lane.b32.xlu0 %v3979_v15, %s3376_s15  ;;  %v2097_v15 = vsel %vm942_vm2, %v2078_v3, 0 }
0x10bb   : > { %2087 = vrot.lane.b32.xlu0 %v3984_v16, %s3376_s15 }
0x10bf   : > { %2091 = vrot.lane.b32.xlu0 %v3988_v10, %s3376_s15 }
0x1126   : > { %v2000_v41 = vpop.xlane.xlu0 %1999 }
0x1127   : > { %3228 = vrcp.f32 %v2000_v41 }
0x112a   : > { %v2020_v52 = vpop.permute.xlu0 %2019 }
0x112b   : > { %3052 = vmatpush3.bf16.msra.mxu0 %v2020_v52  ;;  %v3254_v52 = vld [vmem:[%s3546_s19] sm:$0xff] }
0x112c   : > { %3057 = vmatprep.subr.bf16.mxu0 %v3367_v6 }
0x112e   : > { %v2080_v16 = vpop.permute.xlu0 %2079 }
0x112f   : > { %v2100_v10 = vsel %vm942_vm2, %v2080_v16, 0 }
0x1131   : > { %v3229_v60 = vpop.eup %3228 }
0x1132   : > { %v2002_v62 = vmul.f32 %v3229_v60, %v3227_v44  ;;  %v2084_v0 = vpop.permute.xlu0 %2083 }
0x1133   : > { %v2106_v1 = vsel %vm942_vm2, %v2084_v0, 0 }
0x1134   : > { %v2004_v11 = vpack.c.bf16 %v2002_v62, %v2002_v62  ;;  %v4147_v48 = vadd.f32 %v2002_v62, %v4075_v18 }
0x1136   : > { %3054 = vmatmul.mubr.bf16.vlgmr.msra.gmra.mrb[40].mxu0 %v2004_v11  ;;  %v2088_v17 = vpop.permute.xlu0 %2087 }
0x1137   : > { %3058 = vmatpush3.bf16.xpose.msra.mxu0 %v2097_v15  ;;  %3073 = vmatprep.mubr.msk.bf16.mxu0 %vm3368_vm1, %v3367_v6  ;;  %v2112_v18 = vsel %vm942_vm2, %v2088_v17, 0 }
0x1138   : > { %3059 = vmatprep.subr.bf16.mxu0 %v3367_v6 }
0x113a   : > { %v2092_v20 = vpop.permute.xlu0 %2091 }
0x113b   : > { %v2118_v22 = vsel %vm942_vm2, %v2092_v20, 0 }
0x113f   : > { %3060 = vmatpush3.bf16.xpose.msra.mxu0 %v2100_v10 }
0x1140   : > { %3061 = vmatprep.subr.bf16.mxu0 %v3367_v6 }
0x1147   : > { %3062 = vmatpush3.bf16.xpose.msra.mxu0 %v2103_v63 }
0x1148   : > { %3063 = vmatprep.subr.bf16.mxu0 %v3367_v6 }
0x114f   : > { %3064 = vmatpush3.bf16.xpose.msra.mxu0 %v2106_v1 }
0x1150   : > { %3065 = vmatprep.subr.bf16.mxu0 %v3367_v6 }
0x1157   : > { %3066 = vmatpush3.bf16.xpose.msra.mxu0 %v2109_v14 }
0x1158   : > { %3067 = vmatprep.subr.bf16.mxu0 %v3367_v6 }
0x115f   : > { %3068 = vmatpush3.bf16.xpose.msra.mxu0 %v2112_v18 }
0x1160   : > { %3069 = vmatprep.subr.bf16.mxu0 %v3367_v6 }
0x1167   : > { %3070 = vmatpush3.bf16.xpose.msra.mxu0 %v2115_v19 }
0x1168   : > { %3071 = vmatprep.subr.bf16.mxu0 %v3367_v6 }
0x116f   : > { %3072 = vmatpush3.bf16.xpose.msra.mxu0 %v2118_v22 }
0x1176   : > { %3074 = vmatmul.mubr.msk.bf16.vlgmr.msra.gmra.mrb[44].mxu0 %vm942_vm2, %v2076_v8  ;;  %v2546_v8 = vld [vmem:[%s4314_s9] ss:$0 sm:$0xff] }
0x1209   : > { %v2063_v23 = vpop.f32.mrb[40].mxu0 }
0x120a   : > { %v3055_v24 = vpop.f32.mrb[41].mxu0 }
0x120b   : > { %v2066_v21 = vpop.f32.mrb[42].mxu0 }
0x120c   : > { %v3056_v25 = vpop.f32.mrb[43].mxu0 }
0x1249   : > { %v2154_v27 = vpop.f32.mrb[44].mxu0 }
0x124a   : > { %v2155_v55 = vadd.f32 %v2154_v27, %v3700_v26  ;;  %v3075_v28 = vpop.f32.mrb[45].mxu0 }
0x124b   : > { %v2157_v61 = vpop.f32.mrb[46].mxu0 }
0x124c   : > { %2160 = vmax.xlane.f32.xlu0 %v2155_v55  ;;  %v3076_v29 = vpop.f32.mrb[47].mxu0 }
0x1262   : > { %2173 = vrot.lane.b32.xlu0 %v4050_v9, %s3376_s15 }
0x1266   : > { %2177 = vrot.lane.b32.xlu0 %v4054_v47, %s3376_s15  ;;  %v2176_v47 = vpop.permute.xlu1 %2175 }
0x126a   : > { %2179 = vrot.lane.b32.xlu0 %v4103_v40, %s3376_s15  ;;  %v2182_v34 = vpop.permute.xlu1 %2181 }
0x126e   : > { %2183 = vrot.lane.b32.xlu0 %v4108_v51, %s3376_s15 }
0x1272   : > { %1240 = vrot.lane.b32.xlu0 %v3797_v50, %s3377_s22 }
0x1276   : > { %1572 = vrot.lane.b32.xlu0 %v3936_v42, %s3378_s23 }
0x127a   : > { %1904 = vrot.lane.b32.xlu0 %v4098_v12, %s3379_s24  ;;  %s2350_s24 = scalar_lea.sflag [#allocation8], %s4194_s17 }
0x12d9   : > { %v2161_v26 = vpop.xlane.xlu0 %2160 }
0x12da   : > { %v2162_v9 = vsub.f32 %v2155_v55, %v2161_v26 }
0x12dc   : > { %v2163_v7 = vmul.f32 1.442695, %v2162_v9 }
0x12dd   : > { %v2174_v30 = vpop.permute.xlu0 %2173 }
0x12de   : > { %3230 = vpow2.f32 %v2163_v7  ;;  %3080 = vmatpush3.bf16.msra.mxu1 %v2174_v30 }
0x12df   : > { %3081 = vmatprep.subr.bf16.mxu1 %v3367_v6 }
0x12e1   : > { %v2178_v31 = vpop.permute.xlu0 %2177 }
0x12e2   : > { %3082 = vmatpush3.bf16.msra.mxu1 %v2176_v47 }
0x12e3   : > { %3083 = vmatprep.subr.bf16.mxu1 %v3367_v6 }
0x12e5   : > { %v2180_v50 = vpop.permute.xlu0 %2179 }
0x12e6   : > { %3084 = vmatpush3.bf16.msra.mxu1 %v2178_v31 }
0x12e7   : > { %3085 = vmatprep.subr.bf16.mxu1 %v3367_v6 }
0x12e8   : > { %v3231_v42 = vpop.eup %3230 }
0x12e9   : > { %2165 = vadd.xlane.f32.xlu1 %v3231_v42  ;;  %v2184_v12 = vpop.permute.xlu0 %2183 }
0x12ea   : > { %3086 = vmatpush3.bf16.msra.mxu1 %v2180_v50 }
0x12eb   : > { %3087 = vmatprep.subr.bf16.mxu1 %v3367_v6 }
0x12ed   : > { %v1241_v35 = vpop.permute.xlu0 %1240 }
0x12ee   : > { %1244 = vst.msk [vmem:[#allocation4] sm:$0xff] %vm1243_vm4, %v1241_v35  ;;  %3088 = vmatpush3.bf16.msra.mxu1 %v2182_v34 }
0x12ef   : > { %3089 = vmatprep.subr.bf16.mxu1 %v3367_v6 }
0x12f1   : > { %v1573_v38 = vpop.permute.xlu0 %1572 }
0x12f2   : > { %3090 = vmatpush3.bf16.msra.mxu1 %v2184_v12 }
0x12f3   : > { %3091 = vmatprep.subr.bf16.mxu1 %v3367_v6 }
0x12f5   : > { %v1905_v43 = vpop.permute.xlu0 %1904 }
0x12fa   : > { %2185 = vrot.lane.b32.xlu1 %v4132_v59, %s3376_s15  ;;  %s4321_s15 = sshll.u32 %s4194_s17, 3 }
0x12fb   : > { %s4199_s22 = scalar_lea.vmem [#allocation7], %s4321_s15 }
0x12fc   : > { %s2378_s19 = sshll.u32 %s4199_s22, 4  ;;  %s2379_s19 = int_to_ptr.vmem [resolvable:$true] %s2378_s19 }
0x12fd   : > { %s3255_s15 = scalar_lea.vmem %s2379_s19, 128  ;;  %p3262_p1 = scmp.lt.s32.totalorder %s2379_s19, %s3260_s1 }
0x12fe   : > { %1406 = vrot.lane.b32.xlu1 %v3869_v49, %s3380_s14  ;;  %s4322_s14 = sshll.u32 %s3357_s28, 7  ;;  %p3256_p12 = scmp.ne.s32.totalorder %s2379_s19, %s3255_s15 }
0x12ff   : > { %s4222_s23 = scalar_lea.hbm %s4318_s13, %s4322_s14  ;;  %p3263_p2 = scmp.lt.s32.totalorder %s3261_s2, %s3255_s15 }
0x1300   : > { %p3257_p13 = pnand %p3256_p12, %p3496_p4 }
0x1301   : > { %p3264_p3 = por %p3263_p2, %p3262_p1 }
0x1302   : > { %1738 = vrot.lane.b32.xlu1 %v4017_v33, %s3381_s29  ;;  %p3258_p0 = pneg %p3257_p13 }
0x1304   : > { %p3265_p5 = pnand %p3264_p3, %p3258_p0 }
0x1306   : > { %2070 = vrot.lane.b32.xlu1 %v2063_v23, %s3382_s16  ;;  %s3383_s16 = smov 28  }
0x1376   : > { %v2166_v36 = vpop.xlane.xlu1 %2165 }
0x1377   : > { %3232 = vrcp.f32 %v2166_v36 }
0x137a   : > { %v2186_v37 = vpop.permute.xlu1 %2185 }
0x137b   : > { %3092 = vmatpush3.bf16.msra.mxu1 %v2186_v37 }
0x137c   : > { %3097 = vmatprep.subr.bf16.mxu1 %v3367_v6 }
0x137e   : > { %v1407_v32 = vpop.permute.xlu1 %1406 }
0x137f   : > { %1410 = vst.msk [vmem:[#allocation4] sm:$0xff] %vm1409_vm5, %v1407_v32 }
0x1380   : > { %1576 = vst.msk [vmem:[#allocation4] sm:$0xff] %vm1575_vm6, %v1573_v38 }
0x1381   : > { %v3233_v49 = vpop.eup %3232 }
0x1382   : > { %v1739_v40 = vpop.permute.xlu1 %1738  ;;  %v2168_v33 = vmul.f32 %v3233_v49, %v3231_v42 }
0x1383   : > { %1742 = vst.msk [vmem:[#allocation4] sm:$0xff] %vm1741_vm7, %v1739_v40 }
0x1384   : > { %1908 = vst.msk [vmem:[#allocation4] sm:$0xff] %vm1907_vm8, %v1905_v43  ;;  %v2170_v51 = vpack.c.bf16 %v2168_v33, %v2168_v33  ;;  %v2169_v57 = vadd.f32 %v2168_v33, %v4147_v48 }
0x1386   : > { %v2071_v54 = vpop.permute.xlu1 %2070  ;;  %3094 = vmatmul.mubr.bf16.vlgmr.msra.gmra.mrb[48].mxu1 %v2170_v51  ;;  %3234 = vlog2.f32 %v2169_v57 }
0x1387   : > { %2074 = vst.msk [vmem:[#allocation4] sm:$0xff] %vm2073_vm9, %v2071_v54  ;;  %3101 = vmatprep.mubr.msk.bf16.mxu1 %vm3368_vm1, %v3367_v6  ;;  %3098 = vmatpush3.bf16.msra.mxu1 %v3200_v46 }
0x1388   : > { %3099 = vmatprep.subr.bf16.mxu1 %v3367_v6 }
0x138b   : > { %3100 = vmatpush3.bf16.msra.mxu1 %v3201_v2 }
0x1390   : > { %v3235_v45 = vpop.eup %3234 }
0x1391   : > { %v2310_v56 = vmul.f32 0.6931472, %v3235_v45 }
0x1393   : > { %2311 = vst [vmem:[%s4199_s22] sm:$0xff] %v2310_v56 }
0x1459   : > { %v2229_v13 = vpop.f32.mrb[48].mxu1 }
0x145a   : > { %2236 = vrot.lane.b32.xlu0 %v2229_v13, %s3383_s16  ;;  %v3095_v44 = vpop.f32.mrb[49].mxu1 }
0x145b   : > { %v2232_v5 = vpop.f32.mrb[50].mxu1 }
0x145c   : > { %v3096_v3 = vpop.f32.mrb[51].mxu1 }
0x14cc   : > { %v2237_v4 = vpop.permute.xlu0 %2236 }
0x14cd   : > { %2240 = vst.msk [vmem:[#allocation4] sm:$0xff] %vm2239_vm10, %v2237_v4 }
0x14d4   : > { %v2241_v53 = vld [vmem:[#allocation4] sm:$0xff] }
0x14d5   : > { %v2242_v58 = vpack.c.bf16 %v2241_v53, %v2241_v53 }
0x14d7   : > { %3102 = vmatmul.mubr.msk.bf16.vlgmr.msra.gmra.mrb[52].mxu1 %vm579_vm0, %v2242_v58 }
0x15aa   : > { %v2303_v6 = vpop.f32.mrb[52].mxu1 }
0x15ab   : > { %v2304_v59 = vadd.f32 %v2546_v8, %v2303_v6  ;;  %v3103_v39 = vpop.f32.mrb[53].mxu1 }
0x15ac   : > { %v2306_v41 = vpop.f32.mrb[54].mxu1 }
0x15ad   : > { %v2312_v60 = vadd.f32 %v3254_v52, %v2304_v59  ;;  %v3104_v62 = vpop.f32.mrb[55].mxu1 }
0x15af   : > { %v2313_v11 = vsel %vm579_vm0, %v2312_v60, 0.0 }
0x15b0   : > { %2314 = vadd.xlane.f32.xlu1 %v2313_v11 }
0x163d   : > { %v2315_v48 = vpop.xlane.xlu1 %2314 }
0x163e   : > { %v2317_v15 = vmul.f32 0.03125, %v2315_v48 }
0x1640   : > { %v2318_v16 = vsub.f32 %v2312_v60, %v2317_v15 }
0x1642   : > { %v2319_v10 = vmul.f32 %v2318_v16, %v2318_v16 }
0x1644   : > { %v2320_v63 = vsel %vm579_vm0, %v2319_v10, 0.0 }
0x1645   : > { %2321 = vadd.xlane.f32.xlu0 %v2320_v63 }
0x1646   : > { %3268 = shalt.err (!%p3265_p5)
}
0x1647   : > { %s3269_s22 = scalar_lea.hbm %s4222_s23, 128  ;;  %s3273_s0 = scalar_lea.hbm %s4318_s13, 256 }
0x1648   : > { %p3270_p6 = scmp.ne.s32.totalorder %s4222_s23, %s3269_s22  ;;  %p3274_p10 = scmp.lt.u32.totalorder %s4222_s23, %s4318_s13 }
0x1649   : > { %p3275_p11 = scmp.lt.u32.totalorder %s3273_s0, %s3269_s22  ;;  %p3277_p13 = scmp.lt.u32.totalorder %s3269_s22, %s4222_s23 }
0x164a   : > { %p3271_p7 = pnand %p3270_p6, %p3496_p4 }
0x164b   : > { %p3276_p12 = por %p3275_p11, %p3274_p10 }
0x164c   : > { %p3272_p9 = pneg %p3271_p7 }
0x164d   : > { %p3278_p0 = por %p3277_p13, %p3276_p12 }
0x164f   : > { %p3279_p1 = pnand %p3278_p0, %p3272_p9 }
0x1651   : > { %3282 = shalt.err (!%p3279_p1)
}
0x1652   : > { %3110 = dma.vmem_to_hbm [thread:$0]  (%p3496_p4), %s2379_s19, 128, %s4222_s23, %s2350_s24   ;;  %v2550_v18 = vld [vmem:[%s4315_s10] ss:$0 sm:$0xff] }
0x1653   : > { %v2551_v20 = vld [vmem:[%s4316_s11] ss:$0 sm:$0xff]  ;;  %s4333_s29 = sshll.u32 %s4194_s17, 3  ;;  %s4334_s23 = sshll.u32 %s3357_s28, 7 }
0x1654   : > { %s474_s16 = scalar_lea.vmem [#allocation5], %s4333_s29  ;;  %s4256_s1 = scalar_lea.hbm %s4317_s12, %s4334_s23 }
0x1655   : > { %s2364_s0 = sshll.u32 %s474_s16, 4  ;;  %s2345_s2 = scalar_lea.sflag [#allocation6], %s4194_s17  ;;  %s4258_s0 = int_to_ptr.vmem [resolvable:$true] %s2364_s0 }
0x1656   : > { %s3283_s15 = scalar_lea.vmem %s4258_s0, 128  ;;  %s3385_s14 = smov [#allocation5]  }
0x1657   : > { %p3284_p2 = scmp.ne.s32.totalorder %s4258_s0, %s3283_s15  ;;  %s3287_s28 = sshll.u32 %s3385_s14, 4  ;;  %s3288_s28 = int_to_ptr.vmem [resolvable:$false] %s3287_s28 }
0x1658   : > { %s3289_s22 = scalar_lea.vmem %s3288_s28, 256  ;;  %p3290_p6 = scmp.lt.s32.totalorder %s4258_s0, %s3288_s28 }
0x1659   : > { %p3285_p3 = pnand %p3284_p2, %p3496_p4  ;;  %p3291_p7 = scmp.lt.s32.totalorder %s3289_s22, %s3283_s15 }
0x165b   : > { %p3286_p5 = pneg %p3285_p3  ;;  %p3292_p9 = por %p3291_p7, %p3290_p6 }
0x165d   : > { %p3293_p10 = pnand %p3292_p9, %p3286_p5 }
0x16d2   : > { %v2322_v0 = vpop.xlane.xlu0 %2321 }
0x16d3   : > { %v2323_v1 = vmul.f32 0.03125, %v2322_v0 }
0x16d5   : > { %v2324_v14 = vadd.f32 1e-05, %v2323_v1 }
0x16d7   : > { %3236 = vrsqrt.f32 %v2324_v14 }
0x16e1   : > { %v3237_v17 = vpop.eup %3236 }
0x16e2   : > { %v2326_v19 = vmul.f32 %v3237_v17, %v2318_v16 }
0x16e4   : > { %v2334_v22 = vmul.f32 %v2550_v18, %v2326_v19 }
0x16e6   : > { %v2342_v23 = vadd.f32 %v2551_v20, %v2334_v22 }
0x16e8   : > { %2343 = vst.msk [vmem:[%s474_s16] sm:$0xff] %vm579_vm0, %v2342_v23 }
0x16e9   : > { %3296 = shalt.err (!%p3293_p10)
}
0x16ea   : > { %s3297_s17 = scalar_lea.hbm %s4256_s1, 128  ;;  %s3301_s23 = scalar_lea.hbm %s4317_s12, 256 }
0x16eb   : > { %p3298_p11 = scmp.ne.s32.totalorder %s4256_s1, %s3297_s17  ;;  %p3302_p0 = scmp.lt.u32.totalorder %s4256_s1, %s4317_s12 }
0x16ec   : > { %p3303_p1 = scmp.lt.u32.totalorder %s3301_s23, %s3297_s17  ;;  %p3305_p3 = scmp.lt.u32.totalorder %s3297_s17, %s4256_s1 }
0x16ed   : > { %p3299_p12 = pnand %p3298_p11, %p3496_p4 }
0x16ee   : > { %p3304_p2 = por %p3303_p1, %p3302_p0 }
0x16ef   : > { %p3300_p13 = pneg %p3299_p12 }
0x16f0   : > { %p3306_p5 = por %p3305_p3, %p3304_p2 }
0x16f2   : > { %p3307_p6 = pnand %p3306_p5, %p3300_p13 }
0x16f4   : > { %3310 = shalt.err (!%p3307_p6)
}
0x16f5   : > { %3109 = dma.vmem_to_hbm [thread:$0]  (%p3496_p4), %s4258_s0, 128, %s4256_s1, %s2345_s2  }
0x16f6 PF: > { %p3120_p7 = scmp.ge.s32.totalorder %s3365_s30, 2  ;;  %s2390_s15 = sand.u32 1, %s3345_s25  }
0x16f7   : > { %s2391_s14 = scalar_lea.sflag [#allocation6], %s2390_s15 }
0x16f8   : > { %p3114_p9 = pnand %p3120_p7, %p3503_p8 }
0x16fa   : > { %3336 = dma.done.wait (!%p3114_p9), %s2391_s14, 128  }
0x16fb   : > { %3338 = vsyncadd (!%p3114_p9), %s2391_s14, 4294967168  ;;  %s2400_s28 = scalar_lea.sflag [#allocation8], %s2390_s15 }
0x16fc   : > { %3340 = dma.done.wait (!%p3114_p9), %s2400_s28, 128  }
0x16fd   : > { %3342 = vsyncadd (!%p3114_p9), %s2400_s28, 4294967168  ;;  %s30_s30 = sadd.s32 1, %s3365_s30   ;;  %s4335_s28 = sld [smem:[#allocation11_spill]] }
0x16fe   : > { %p27_p10 = scmp.ge.s32.totalorder %s30_s30, 4   ;;  %s4336_s29 = sld [smem:[#allocation12_spill]] }
0x16ff   : > { %s4337_s25 = smov %s3349_s26  ;;  %s4338_s26 = smov %s3353_s27 }
0x1700   : > { %s4339_s27 = smov %s3509_s21  ;;  %29 = sbr.rel (!%p27_p10) target bundleno = 10 (0xa), region = 127 }
0x1707   :  { %2405 = vsyncpa [#allocation6], 1 }
0x1708   :  { %2407 = vsyncpa [#allocation6 + $0x1], 1 }
0x1709   :  { %2408 = vsyncpa [#allocation8], 1 }
0x170a   :  { %2410 = vsyncpa [#allocation8 + $0x1], 1 }

</bundles_post_ra>
